<compile_context>
chip_gen: v5e
topology: v5e:2x2
jax: 0.10.0
libtpu: 0.0.40
codegen_flags: <defaults>
</compile_context>

<pallas_src>
import functools
import math

import jax
import jax.numpy as jnp
from jax.experimental import pallas as pl
from jax.experimental.pallas import tpu as pltpu


# ----------------------------------------------------------------------------
# Pallas kernel: fused (single wide-K im2col matmul) + folded-BN bias + SiLU
# ----------------------------------------------------------------------------
def _conv_bn_silu_kernel(x_ref, w_ref, b_ref, o_ref, *, k, s, cin, th, wo, act,
                         fuse_taps):
    """One (batch, output-row-tile, cout-tile) grid step.

    x_ref : (1, Hq, s, Wq, s*Cin) bf16 stride-folded padded image (VMEM-resident
                                  across the row / cout tiles of one batch element)
    w_ref : (k*k*Cin, tCout)      bf16 weights with BN scale folded in
    b_ref : (1, tCout)            f32 folded-BN bias
    o_ref : (1, th, Wo, tCout)    output tile
    """
    i = pl.program_id(1)
    row0 = i * th
    if th % 8 == 0:
        row0 = pl.multiple_of(row0, 8)       # aligned sublane-origin slices
    tcout = w_ref.shape[-1]

    def tap(kh, kw):
        # Output (oi, oj) of tap (kh, kw) reads padded pixel ((row0+oi)*s + kh,
        # oj*s + kw); in the stride-folded layout that is the unit-stride slab
        # below, shape (th, wo, cin).
        return x_ref[0, pl.ds(row0 + kh // s, th), kh % s,
                     pl.ds(kw // s, wo), pl.ds((kw % s) * cin, cin)]

    if fuse_taps:
        # Fused im2col -> ONE wide-K MXU dot (K = k*k*Cin): no per-tap f32
        # accumulator passes through the VPU / vld / vst slots.
        slabs = [tap(kh, kw).reshape(th * wo, cin)
                 for kh in range(k) for kw in range(k)]
        a = slabs[0] if len(slabs) == 1 else jnp.concatenate(slabs, axis=-1)
        y = jnp.dot(a, w_ref[...], preferred_element_type=jnp.float32)
    else:
        # Large-Cin fallback: consecutive per-tap dots on one accumulator with no
        # interleaved VPU work (v7x MRB accumulates successive vmatmuls in place).
        y = None
        for t in range(k * k):
            a = tap(t // k, t % k).reshape(th * wo, cin)
            part = jnp.dot(a, w_ref[pl.ds(t * cin, cin), :],
                           preferred_element_type=jnp.float32)
            y = part if y is None else y + part

    y = y + b_ref[...]                       # folded-BN bias (scale is in weights)
    if act:
        # SiLU: exp and approx reciprocal both run on the EUP slot (no VALU divide).
        y = y * pl.reciprocal(1.0 + jnp.exp(-y), approx=True)
    o_ref[...] = y.reshape(1, th, wo, tcout).astype(o_ref.dtype)


# ----------------------------------------------------------------------------
# Host-side tiling heuristics (generation-aware)
# ----------------------------------------------------------------------------
def _vmem_capacity_bytes():
    try:
        info = pltpu.get_tpu_info()
        cap = getattr(info, "vmem_capacity_bytes", None)
        if cap:
            return int(cap)
    except Exception:
        pass
    return 64 << 20          # conservative default (v7x per-core VMEM)


def _pick_tcout(cout):
    """Cout tile: full when narrow; 256 (v6e/v7x MXU N) or 128 (v5e-safe) when big."""
    if cout < 128:
        return cout
    for t in (256, 128):
        if cout % t == 0:
            return t
    return cout


def _pick_tile_h(n, ho, wo, tcout, vmem_cap):
    """Output-row tile: a divisor of Ho (no masked last tile), f32 result tile
    capped at ~2 MiB (v5e-safe; 512-1024 output rows already reach ~85% of the
    HBM roofline), preferring multiples of 8 (aligned slices/stores) and keeping
    >= 2 grid steps when batch == 1 so both v7x TensorCores get work."""
    acc_cap = min(2 << 20, max(256 << 10, vmem_cap // 16))
    cap_th = max(1, min(ho, acc_cap // max(1, 4 * tcout * wo)))
    divs = [d for d in range(1, ho + 1) if ho % d == 0 and d <= cap_th]
    if not divs:
        return 1
    if n == 1 and len(divs) > 1 and divs[-1] == ho:
        divs = divs[:-1]                      # >= 2 row tiles for megacore
    div8 = [d for d in divs if d % 8 == 0]
    # TODO(synk): masked last tile for prime Ho (falls back to tiny tiles there).
    return (div8 or divs)[-1]


# ----------------------------------------------------------------------------
# Wrapper: Conv2d(k, s, p=k//2, bias=False) + BatchNorm2d(eval) + SiLU
# ----------------------------------------------------------------------------
def conv_bn_silu(x, w_hwio, gamma, beta, mean, var, *, stride=1, padding=None,
                 act=True, eps=1e-5, out_dtype=None):
    """x: (N, H, W, Cin); w_hwio: (k, k, Cin, Cout); BN params: (Cout,).
    Returns (N, Ho, Wo, Cout) with Ho = floor((H + 2p - k)/s) + 1 (PyTorch conv)."""
    n, h, w, cin = x.shape
    kh_, kw_, wcin, cout = w_hwio.shape
    assert kh_ == kw_ and wcin == cin
    k = kh_
    s = int(stride)
    p = k // 2 if padding is None else int(padding)
    out_dtype = out_dtype if out_dtype is not None else x.dtype

    # Fold inference-mode BN into the conv (scale -> weights, shift -> bias) and
    # pre-reshape the weights to (k*k*Cin, Cout) for the single wide-K dot.
    scale = (gamma / jnp.sqrt(var + eps)).astype(jnp.float32)
    w_f = w_hwio.astype(jnp.float32) * scale[None, None, None, :]
    w2 = w_f.reshape(k * k * cin, cout).astype(jnp.bfloat16)
    bias = (beta - mean * scale).astype(jnp.float32).reshape(1, cout)

    hp, wp = h + 2 * p, w + 2 * p
    ho = (hp - k) // s + 1
    wo = (wp - k) // s + 1
    hq = -(-hp // s)          # ceil(hp / s)
    wq = -(-wp // s)

    # Zero-pad and fold the stride into the layout:
    #   (N, s*Hq, s*Wq, Cin) -> (N, Hq, s, Wq, s*Cin)   (pure row-major reshape).
    # TODO(synk): move the zero-pad in-kernel to avoid this extra HBM round trip.
    xb = x.astype(jnp.bfloat16)
    xb = jnp.pad(xb, ((0, 0), (p, s * hq - hp + p), (p, s * wq - wp + p), (0, 0)))
    xr = xb.reshape(n, hq, s, wq, s * cin)

    vmem_cap = _vmem_capacity_bytes()
    tcout = _pick_tcout(cout)
    n_ct = cout // tcout
    th = _pick_tile_h(n, ho, wo, tcout, vmem_cap)
    n_rt = ho // th
    fuse_taps = cin < 128
    kkcin = k * k * cin

    itemsize_out = jnp.dtype(out_dtype).itemsize
    x_block = hq * s * wq * s * cin * 2
    w_block = kkcin * tcout * 2
    o_block = th * wo * tcout * itemsize_out
    work = 2 * th * wo * (kkcin * 2 + tcout * 4)          # patches + f32 result
    vmem_need = 2 * (x_block + w_block + o_block) + work + (4 << 20)
    vmem_limit = int(min(0.9 * vmem_cap, max(32 << 20, vmem_need)))

    cost = pl.CostEstimate(
        flops=2 * n * ho * wo * k * k * cin * cout,
        transcendentals=(n * ho * wo * cout) if act else 0,
        bytes_accessed=(xr.size * 2 + w2.size * 2 + bias.size * 4
                        + n * ho * wo * cout * itemsize_out),
    )

    out = pl.pallas_call(
        functools.partial(_conv_bn_silu_kernel, k=k, s=s, cin=cin, th=th, wo=wo,
                          act=act, fuse_taps=fuse_taps),
        out_shape=jax.ShapeDtypeStruct((n, ho, wo, cout), out_dtype),
        grid_spec=pltpu.PrefetchScalarGridSpec(
            num_scalar_prefetch=0,
            grid=(n, n_rt, n_ct),
            in_specs=[
                # Whole stride-folded padded image for batch element b: the block
                # index ignores (i, j), so it is DMA'd once per batch element and
                # stays VMEM-resident across all row / cout tiles.
                pl.BlockSpec((1, hq, s, wq, s * cin),
                             lambda b, i, j: (b, 0, 0, 0, 0)),
                pl.BlockSpec((kkcin, tcout), lambda b, i, j: (0, j)),
                pl.BlockSpec((1, tcout), lambda b, i, j: (0, j)),
            ],
            out_specs=pl.BlockSpec((1, th, wo, tcout), lambda b, i, j: (b, i, 0, j)),
        ),
        compiler_params=pltpu.CompilerParams(
            dimension_semantics=("parallel", "parallel", "parallel"),
            vmem_limit_bytes=vmem_limit),
        cost_estimate=cost,
    )(xr, w2, bias)
    return out


# ----------------------------------------------------------------------------
# Pure-JAX reference (same bf16 operand rounding, f32 accumulation)
# ----------------------------------------------------------------------------
def _reference_conv_bn_silu(x, w_hwio, gamma, beta, mean, var, *, stride=1,
                            act=True, eps=1e-5):
    scale = gamma / jnp.sqrt(var + eps)
    w_f = (w_hwio * scale[None, None, None, :]).astype(jnp.bfloat16).astype(jnp.float32)
    bias = beta - mean * scale
    xb = x.astype(jnp.bfloat16).astype(jnp.float32)
    k = w_hwio.shape[0]
    p = k // 2
    y = jax.lax.conv_general_dilated(
        xb, w_f, window_strides=(stride, stride), padding=[(p, p), (p, p)],
        dimension_numbers=("NHWC", "HWIO", "NHWC"),
        precision=jax.lax.Precision.HIGHEST)
    y = y + bias[None, None, None, :]
    if act:
        y = y * (1.0 / (1.0 + jnp.exp(-y)))
    return y


# ----------------------------------------------------------------------------
if __name__ == "__main__":
    root = jax.random.PRNGKey(0)
    kx, kw1, kw2, kw3 = jax.random.split(root, 4)

    # NHWC input, equivalent to torch NCHW (2, 4, 16, 16).
    N, H, W, C1, C2, C3 = 2, 16, 16, 4, 32, 64
    x = jax.random.normal(kx, (N, H, W, C1), jnp.float32)

    def bn_params(c):  # PyTorch BatchNorm2d init: gamma=1, beta=0, mean=0, var=1
        return (jnp.ones((c,), jnp.float32), jnp.zeros((c,), jnp.float32),
                jnp.zeros((c,), jnp.float32), jnp.ones((c,), jnp.float32))

    w1 = jax.random.normal(kw1, (3, 3, C1, C2), jnp.float32) / math.sqrt(9 * C1)
    w2 = jax.random.normal(kw2, (1, 1, C2, C3), jnp.float32) / math.sqrt(C2)
    w3 = jax.random.normal(kw3, (3, 3, C1, C2), jnp.float32) / math.sqrt(9 * C1)
    g1, b1, m1, v1 = bn_params(C2)
    g2, b2, m2, v2 = bn_params(C3)

    @jax.jit
    def run(x):
        y1 = conv_bn_silu(x, w1, g1, b1, m1, v1, stride=1)    # Conv(4,32,k=3,s=1)
        y2 = conv_bn_silu(y1, w2, g2, b2, m2, v2, stride=1)   # Conv(32,64,k=1,s=1)
        y3 = conv_bn_silu(x, w3, g1, b1, m1, v1, stride=2)    # Conv(4,32,k=3,s=2)
        return y1, y2, y3

    y1, y2, y3 = jax.block_until_ready(run(x))

    assert y1.shape == (N, H, W, C2), y1.shape
    assert y2.shape == (N, H, W, C3), y2.shape
    assert y3.shape == (N, H // 2, W // 2, C2), y3.shape
    for y in (y1, y2, y3):
        assert bool(jnp.all(jnp.isfinite(y)))

    r1 = _reference_conv_bn_silu(x, w1, g1, b1, m1, v1, stride=1)
    r2 = _reference_conv_bn_silu(y1, w2, g2, b2, m2, v2, stride=1)
    r3 = _reference_conv_bn_silu(x, w3, g1, b1, m1, v1, stride=2)
    for got, ref in ((y1, r1), (y2, r2), (y3, r3)):
        err = float(jnp.max(jnp.abs(got - ref)))
        assert jnp.allclose(got, ref, atol=2e-2, rtol=2e-2), err

    print("KERNEL_OK")
</pallas_src>

<mosaic_0001>
module attributes {stable_mosaic.version = 11 : i64} {
  func.func @_conv_bn_silu_kernel(%arg0: i32, %arg1: i32, %arg2: i32, %arg3: memref<1x18x1x18x4xbf16, #tpu.memory_space<vmem>>, %arg4: memref<36x32xbf16, #tpu.memory_space<vmem>>, %arg5: memref<1x32xf32, #tpu.memory_space<vmem>>, %arg6: memref<1x16x16x32xf32, #tpu.memory_space<vmem>>) attributes {dimension_semantics = [#tpu.dimension_semantics<parallel>, #tpu.dimension_semantics<parallel>, #tpu.dimension_semantics<parallel>], iteration_bounds = array<i64: 2, 1, 1>, scalar_prefetch = 0 : i64, scratch_operands = 0 : i64, tpu.core_type = #tpu.core_type<tc>, window_params = [{transform_indices = @transform_0, window_bounds = array<i64: 1, 18, 1, 18, 4>}, {transform_indices = @transform_1, window_bounds = array<i64: 36, 32>}, {transform_indices = @transform_2, window_bounds = array<i64: 1, 32>}, {transform_indices = @transform_3, window_bounds = array<i64: 1, 16, 16, 32>}]} {
    %c16_i32 = arith.constant 16 : i32
    %0 = arith.muli %arg1, %c16_i32 : i32
    %1 = tpu.assume_multiple %0, 8 : i32
    %c0_i32 = arith.constant 0 : i32
    %2 = arith.addi %1, %c0_i32 : i32
    %c0 = arith.constant 0 : index
    %3 = arith.index_cast %2 : i32 to index
    %c0_0 = arith.constant 0 : index
    %c0_1 = arith.constant 0 : index
    %c0_2 = arith.constant 0 : index
    %4 = vector.load %arg3[%c0, %3, %c0_0, %c0_1, %c0_2] : memref<1x18x1x18x4xbf16, #tpu.memory_space<vmem>>, vector<1x16x1x16x4xbf16>
    %5 = vector.shape_cast %4 : vector<1x16x1x16x4xbf16> to vector<16x16x4xbf16>
    %6 = vector.shape_cast %5 : vector<16x16x4xbf16> to vector<256x4xbf16>
    %c0_i32_3 = arith.constant 0 : i32
    %7 = arith.addi %1, %c0_i32_3 : i32
    %c0_4 = arith.constant 0 : index
    %8 = arith.index_cast %7 : i32 to index
    %c0_5 = arith.constant 0 : index
    %c1 = arith.constant 1 : index
    %c0_6 = arith.constant 0 : index
    %9 = vector.load %arg3[%c0_4, %8, %c0_5, %c1, %c0_6] : memref<1x18x1x18x4xbf16, #tpu.memory_space<vmem>>, vector<1x16x1x16x4xbf16>
    %10 = vector.shape_cast %9 : vector<1x16x1x16x4xbf16> to vector<16x16x4xbf16>
    %11 = vector.shape_cast %10 : vector<16x16x4xbf16> to vector<256x4xbf16>
    %c0_i32_7 = arith.constant 0 : i32
    %12 = arith.addi %1, %c0_i32_7 : i32
    %c0_8 = arith.constant 0 : index
    %13 = arith.index_cast %12 : i32 to index
    %c0_9 = arith.constant 0 : index
    %c2 = arith.constant 2 : index
    %c0_10 = arith.constant 0 : index
    %14 = vector.load %arg3[%c0_8, %13, %c0_9, %c2, %c0_10] : memref<1x18x1x18x4xbf16, #tpu.memory_space<vmem>>, vector<1x16x1x16x4xbf16>
    %15 = vector.shape_cast %14 : vector<1x16x1x16x4xbf16> to vector<16x16x4xbf16>
    %16 = vector.shape_cast %15 : vector<16x16x4xbf16> to vector<256x4xbf16>
    %c1_i32 = arith.constant 1 : i32
    %17 = arith.addi %1, %c1_i32 : i32
    %c0_11 = arith.constant 0 : index
    %18 = arith.index_cast %17 : i32 to index
    %c0_12 = arith.constant 0 : index
    %c0_13 = arith.constant 0 : index
    %c0_14 = arith.constant 0 : index
    %19 = vector.load %arg3[%c0_11, %18, %c0_12, %c0_13, %c0_14] : memref<1x18x1x18x4xbf16, #tpu.memory_space<vmem>>, vector<1x16x1x16x4xbf16>
    %20 = vector.shape_cast %19 : vector<1x16x1x16x4xbf16> to vector<16x16x4xbf16>
    %21 = vector.shape_cast %20 : vector<16x16x4xbf16> to vector<256x4xbf16>
    %c1_i32_15 = arith.constant 1 : i32
    %22 = arith.addi %1, %c1_i32_15 : i32
    %c0_16 = arith.constant 0 : index
    %23 = arith.index_cast %22 : i32 to index
    %c0_17 = arith.constant 0 : index
    %c1_18 = arith.constant 1 : index
    %c0_19 = arith.constant 0 : index
    %24 = vector.load %arg3[%c0_16, %23, %c0_17, %c1_18, %c0_19] : memref<1x18x1x18x4xbf16, #tpu.memory_space<vmem>>, vector<1x16x1x16x4xbf16>
    %25 = vector.shape_cast %24 : vector<1x16x1x16x4xbf16> to vector<16x16x4xbf16>
    %26 = vector.shape_cast %25 : vector<16x16x4xbf16> to vector<256x4xbf16>
    %c1_i32_20 = arith.constant 1 : i32
    %27 = arith.addi %1, %c1_i32_20 : i32
    %c0_21 = arith.constant 0 : index
    %28 = arith.index_cast %27 : i32 to index
    %c0_22 = arith.constant 0 : index
    %c2_23 = arith.constant 2 : index
    %c0_24 = arith.constant 0 : index
    %29 = vector.load %arg3[%c0_21, %28, %c0_22, %c2_23, %c0_24] : memref<1x18x1x18x4xbf16, #tpu.memory_space<vmem>>, vector<1x16x1x16x4xbf16>
    %30 = vector.shape_cast %29 : vector<1x16x1x16x4xbf16> to vector<16x16x4xbf16>
    %31 = vector.shape_cast %30 : vector<16x16x4xbf16> to vector<256x4xbf16>
    %c2_i32 = arith.constant 2 : i32
    %32 = arith.addi %1, %c2_i32 : i32
    %c0_25 = arith.constant 0 : index
    %33 = arith.index_cast %32 : i32 to index
    %c0_26 = arith.constant 0 : index
    %c0_27 = arith.constant 0 : index
    %c0_28 = arith.constant 0 : index
    %34 = vector.load %arg3[%c0_25, %33, %c0_26, %c0_27, %c0_28] : memref<1x18x1x18x4xbf16, #tpu.memory_space<vmem>>, vector<1x16x1x16x4xbf16>
    %35 = vector.shape_cast %34 : vector<1x16x1x16x4xbf16> to vector<16x16x4xbf16>
    %36 = vector.shape_cast %35 : vector<16x16x4xbf16> to vector<256x4xbf16>
    %c2_i32_29 = arith.constant 2 : i32
    %37 = arith.addi %1, %c2_i32_29 : i32
    %c0_30 = arith.constant 0 : index
    %38 = arith.index_cast %37 : i32 to index
    %c0_31 = arith.constant 0 : index
    %c1_32 = arith.constant 1 : index
    %c0_33 = arith.constant 0 : index
    %39 = vector.load %arg3[%c0_30, %38, %c0_31, %c1_32, %c0_33] : memref<1x18x1x18x4xbf16, #tpu.memory_space<vmem>>, vector<1x16x1x16x4xbf16>
    %40 = vector.shape_cast %39 : vector<1x16x1x16x4xbf16> to vector<16x16x4xbf16>
    %41 = vector.shape_cast %40 : vector<16x16x4xbf16> to vector<256x4xbf16>
    %c2_i32_34 = arith.constant 2 : i32
    %42 = arith.addi %1, %c2_i32_34 : i32
    %c0_35 = arith.constant 0 : index
    %43 = arith.index_cast %42 : i32 to index
    %c0_36 = arith.constant 0 : index
    %c2_37 = arith.constant 2 : index
    %c0_38 = arith.constant 0 : index
    %44 = vector.load %arg3[%c0_35, %43, %c0_36, %c2_37, %c0_38] : memref<1x18x1x18x4xbf16, #tpu.memory_space<vmem>>, vector<1x16x1x16x4xbf16>
    %45 = vector.shape_cast %44 : vector<1x16x1x16x4xbf16> to vector<16x16x4xbf16>
    %46 = vector.shape_cast %45 : vector<16x16x4xbf16> to vector<256x4xbf16>
    %47 = tpu.concatenate %6, %11, %16, %21, %26, %31, %36, %41, %46 in 1 : vector<256x4xbf16>, vector<256x4xbf16>, vector<256x4xbf16>, vector<256x4xbf16>, vector<256x4xbf16>, vector<256x4xbf16>, vector<256x4xbf16>, vector<256x4xbf16>, vector<256x4xbf16> -> vector<256x36xbf16>
    %c0_39 = arith.constant 0 : index
    %c0_40 = arith.constant 0 : index
    %48 = vector.load %arg4[%c0_39, %c0_40] : memref<36x32xbf16, #tpu.memory_space<vmem>>, vector<36x32xbf16>
    %cst = arith.constant dense<0.000000e+00> : vector<256x32xf32>
    %49 = tpu.matmul %47, %48, %cst {dimension_numbers = #tpu.dot_dimension_numbers<[1], [0], [0], [1], [0, 0, 1, 1], [], []>} : vector<256x36xbf16>, vector<36x32xbf16>, vector<256x32xf32> -> vector<256x32xf32>
    %c0_41 = arith.constant 0 : index
    %c0_42 = arith.constant 0 : index
    %50 = vector.load %arg5[%c0_41, %c0_42] : memref<1x32xf32, #tpu.memory_space<vmem>>, vector<1x32xf32>
    %51 = vector.broadcast %50 : vector<1x32xf32> to vector<256x32xf32>
    %52 = arith.addf %49, %51 : vector<256x32xf32>
    %cst_43 = arith.constant 0.000000e+00 : f32
    %53 = vector.broadcast %cst_43 : f32 to vector<256x32xf32>
    %54 = arith.subf %53, %52 : vector<256x32xf32>
    %55 = math.exp %54 : vector<256x32xf32>
    %cst_44 = arith.constant 1.000000e+00 : f32
    %56 = vector.broadcast %cst_44 : f32 to vector<256x32xf32>
    %57 = arith.addf %56, %55 : vector<256x32xf32>
    %58 = tpu.reciprocal %57 {approx = true} : vector<256x32xf32> -> vector<256x32xf32>
    %59 = arith.mulf %52, %58 : vector<256x32xf32>
    %60 = vector.shape_cast %59 : vector<256x32xf32> to vector<1x16x16x32xf32>
    %c0_45 = arith.constant 0 : index
    %c0_46 = arith.constant 0 : index
    %c0_47 = arith.constant 0 : index
    %c0_48 = arith.constant 0 : index
    %61 = vector.load %arg6[%c0_45, %c0_46, %c0_47, %c0_48] : memref<1x16x16x32xf32, #tpu.memory_space<vmem>>, vector<1x16x16x32xf32>
    tpu.vector_store %arg6[%c0_45, %c0_46, %c0_47, %c0_48], %60 {strides = array<i32>} : memref<1x16x16x32xf32, #tpu.memory_space<vmem>>, vector<1x16x16x32xf32>,
    return
  }
  func.func @transform_0(%arg0: i32, %arg1: i32, %arg2: i32) -> (i32, i32, i32, i32, i32) {
    %c0_i32 = arith.constant 0 : i32
    %c0_i32_0 = arith.constant 0 : i32
    %c0_i32_1 = arith.constant 0 : i32
    %c0_i32_2 = arith.constant 0 : i32
    %c0_i32_3 = arith.constant 0 : i32
    return %arg0, %c0_i32, %c0_i32_0, %c0_i32_1, %c0_i32_2 : i32, i32, i32, i32, i32
  }
  func.func @transform_1(%arg0: i32, %arg1: i32, %arg2: i32) -> (i32, i32) {
    %c0_i32 = arith.constant 0 : i32
    %c0_i32_0 = arith.constant 0 : i32
    return %c0_i32, %arg2 : i32, i32
  }
  func.func @transform_2(%arg0: i32, %arg1: i32, %arg2: i32) -> (i32, i32) {
    %c0_i32 = arith.constant 0 : i32
    %c0_i32_0 = arith.constant 0 : i32
    return %c0_i32, %arg2 : i32, i32
  }
  func.func @transform_3(%arg0: i32, %arg1: i32, %arg2: i32) -> (i32, i32, i32, i32) {
    %c0_i32 = arith.constant 0 : i32
    %c0_i32_0 = arith.constant 0 : i32
    return %arg0, %arg1, %c0_i32, %arg2 : i32, i32, i32, i32
  }
}

module attributes {stable_mosaic.version = 11 : i64} {
  func.func @_conv_bn_silu_kernel(%arg0: i32, %arg1: i32, %arg2: i32, %arg3: memref<1x9x2x9x8xbf16, #tpu.memory_space<vmem>>, %arg4: memref<36x32xbf16, #tpu.memory_space<vmem>>, %arg5: memref<1x32xf32, #tpu.memory_space<vmem>>, %arg6: memref<1x8x8x32xf32, #tpu.memory_space<vmem>>) attributes {dimension_semantics = [#tpu.dimension_semantics<parallel>, #tpu.dimension_semantics<parallel>, #tpu.dimension_semantics<parallel>], iteration_bounds = array<i64: 2, 1, 1>, scalar_prefetch = 0 : i64, scratch_operands = 0 : i64, tpu.core_type = #tpu.core_type<tc>, window_params = [{transform_indices = @transform_0, window_bounds = array<i64: 1, 9, 2, 9, 8>}, {transform_indices = @transform_1, window_bounds = array<i64: 36, 32>}, {transform_indices = @transform_2, window_bounds = array<i64: 1, 32>}, {transform_indices = @transform_3, window_bounds = array<i64: 1, 8, 8, 32>}]} {
    %c8_i32 = arith.constant 8 : i32
    %0 = arith.muli %arg1, %c8_i32 : i32
    %1 = tpu.assume_multiple %0, 8 : i32
    %c0_i32 = arith.constant 0 : i32
    %2 = arith.addi %1, %c0_i32 : i32
    %c0 = arith.constant 0 : index
    %3 = arith.index_cast %2 : i32 to index
    %c0_0 = arith.constant 0 : index
    %c0_1 = arith.constant 0 : index
    %c0_2 = arith.constant 0 : index
    %4 = vector.load %arg3[%c0, %3, %c0_0, %c0_1, %c0_2] : memref<1x9x2x9x8xbf16, #tpu.memory_space<vmem>>, vector<1x8x1x8x4xbf16>
    %5 = vector.shape_cast %4 : vector<1x8x1x8x4xbf16> to vector<8x8x4xbf16>
    %6 = vector.shape_cast %5 : vector<8x8x4xbf16> to vector<64x4xbf16>
    %c0_i32_3 = arith.constant 0 : i32
    %7 = arith.addi %1, %c0_i32_3 : i32
    %c0_4 = arith.constant 0 : index
    %8 = arith.index_cast %7 : i32 to index
    %c0_5 = arith.constant 0 : index
    %c0_6 = arith.constant 0 : index
    %c4 = arith.constant 4 : index
    %9 = vector.load %arg3[%c0_4, %8, %c0_5, %c0_6, %c4] : memref<1x9x2x9x8xbf16, #tpu.memory_space<vmem>>, vector<1x8x1x8x4xbf16>
    %10 = vector.shape_cast %9 : vector<1x8x1x8x4xbf16> to vector<8x8x4xbf16>
    %11 = vector.shape_cast %10 : vector<8x8x4xbf16> to vector<64x4xbf16>
    %c0_i32_7 = arith.constant 0 : i32
    %12 = arith.addi %1, %c0_i32_7 : i32
    %c0_8 = arith.constant 0 : index
    %13 = arith.index_cast %12 : i32 to index
    %c0_9 = arith.constant 0 : index
    %c1 = arith.constant 1 : index
    %c0_10 = arith.constant 0 : index
    %14 = vector.load %arg3[%c0_8, %13, %c0_9, %c1, %c0_10] : memref<1x9x2x9x8xbf16, #tpu.memory_space<vmem>>, vector<1x8x1x8x4xbf16>
    %15 = vector.shape_cast %14 : vector<1x8x1x8x4xbf16> to vector<8x8x4xbf16>
    %16 = vector.shape_cast %15 : vector<8x8x4xbf16> to vector<64x4xbf16>
    %c0_i32_11 = arith.constant 0 : i32
    %17 = arith.addi %1, %c0_i32_11 : i32
    %c0_12 = arith.constant 0 : index
    %18 = arith.index_cast %17 : i32 to index
    %c1_13 = arith.constant 1 : index
    %c0_14 = arith.constant 0 : index
    %c0_15 = arith.constant 0 : index
    %19 = vector.load %arg3[%c0_12, %18, %c1_13, %c0_14, %c0_15] : memref<1x9x2x9x8xbf16, #tpu.memory_space<vmem>>, vector<1x8x1x8x4xbf16>
    %20 = vector.shape_cast %19 : vector<1x8x1x8x4xbf16> to vector<8x8x4xbf16>
    %21 = vector.shape_cast %20 : vector<8x8x4xbf16> to vector<64x4xbf16>
    %c0_i32_16 = arith.constant 0 : i32
    %22 = arith.addi %1, %c0_i32_16 : i32
    %c0_17 = arith.constant 0 : index
    %23 = arith.index_cast %22 : i32 to index
    %c1_18 = arith.constant 1 : index
    %c0_19 = arith.constant 0 : index
    %c4_20 = arith.constant 4 : index
    %24 = vector.load %arg3[%c0_17, %23, %c1_18, %c0_19, %c4_20] : memref<1x9x2x9x8xbf16, #tpu.memory_space<vmem>>, vector<1x8x1x8x4xbf16>
    %25 = vector.shape_cast %24 : vector<1x8x1x8x4xbf16> to vector<8x8x4xbf16>
    %26 = vector.shape_cast %25 : vector<8x8x4xbf16> to vector<64x4xbf16>
    %c0_i32_21 = arith.constant 0 : i32
    %27 = arith.addi %1, %c0_i32_21 : i32
    %c0_22 = arith.constant 0 : index
    %28 = arith.index_cast %27 : i32 to index
    %c1_23 = arith.constant 1 : index
    %c1_24 = arith.constant 1 : index
    %c0_25 = arith.constant 0 : index
    %29 = vector.load %arg3[%c0_22, %28, %c1_23, %c1_24, %c0_25] : memref<1x9x2x9x8xbf16, #tpu.memory_space<vmem>>, vector<1x8x1x8x4xbf16>
    %30 = vector.shape_cast %29 : vector<1x8x1x8x4xbf16> to vector<8x8x4xbf16>
    %31 = vector.shape_cast %30 : vector<8x8x4xbf16> to vector<64x4xbf16>
    %c1_i32 = arith.constant 1 : i32
    %32 = arith.addi %1, %c1_i32 : i32
    %c0_26 = arith.constant 0 : index
    %33 = arith.index_cast %32 : i32 to index
    %c0_27 = arith.constant 0 : index
    %c0_28 = arith.constant 0 : index
    %c0_29 = arith.constant 0 : index
    %34 = vector.load %arg3[%c0_26, %33, %c0_27, %c0_28, %c0_29] : memref<1x9x2x9x8xbf16, #tpu.memory_space<vmem>>, vector<1x8x1x8x4xbf16>
    %35 = vector.shape_cast %34 : vector<1x8x1x8x4xbf16> to vector<8x8x4xbf16>
    %36 = vector.shape_cast %35 : vector<8x8x4xbf16> to vector<64x4xbf16>
    %c1_i32_30 = arith.constant 1 : i32
    %37 = arith.addi %1, %c1_i32_30 : i32
    %c0_31 = arith.constant 0 : index
    %38 = arith.index_cast %37 : i32 to index
    %c0_32 = arith.constant 0 : index
    %c0_33 = arith.constant 0 : index
    %c4_34 = arith.constant 4 : index
    %39 = vector.load %arg3[%c0_31, %38, %c0_32, %c0_33, %c4_34] : memref<1x9x2x9x8xbf16, #tpu.memory_space<vmem>>, vector<1x8x1x8x4xbf16>
    %40 = vector.shape_cast %39 : vector<1x8x1x8x4xbf16> to vector<8x8x4xbf16>
    %41 = vector.shape_cast %40 : vector<8x8x4xbf16> to vector<64x4xbf16>
    %c1_i32_35 = arith.constant 1 : i32
    %42 = arith.addi %1, %c1_i32_35 : i32
    %c0_36 = arith.constant 0 : index
    %43 = arith.index_cast %42 : i32 to index
    %c0_37 = arith.constant 0 : index
    %c1_38 = arith.constant 1 : index
    %c0_39 = arith.constant 0 : index
    %44 = vector.load %arg3[%c0_36, %43, %c0_37, %c1_38, %c0_39] : memref<1x9x2x9x8xbf16, #tpu.memory_space<vmem>>, vector<1x8x1x8x4xbf16>
    %45 = vector.shape_cast %44 : vector<1x8x1x8x4xbf16> to vector<8x8x4xbf16>
    %46 = vector.shape_cast %45 : vector<8x8x4xbf16> to vector<64x4xbf16>
    %47 = tpu.concatenate %6, %11, %16, %21, %26, %31, %36, %41, %46 in 1 : vector<64x4xbf16>, vector<64x4xbf16>, vector<64x4xbf16>, vector<64x4xbf16>, vector<64x4xbf16>, vector<64x4xbf16>, vector<64x4xbf16>, vector<64x4xbf16>, vector<64x4xbf16> -> vector<64x36xbf16>
    %c0_40 = arith.constant 0 : index
    %c0_41 = arith.constant 0 : index
    %48 = vector.load %arg4[%c0_40, %c0_41] : memref<36x32xbf16, #tpu.memory_space<vmem>>, vector<36x32xbf16>
    %cst = arith.constant dense<0.000000e+00> : vector<64x32xf32>
    %49 = tpu.matmul %47, %48, %cst {dimension_numbers = #tpu.dot_dimension_numbers<[1], [0], [0], [1], [0, 0, 1, 1], [], []>} : vector<64x36xbf16>, vector<36x32xbf16>, vector<64x32xf32> -> vector<64x32xf32>
    %c0_42 = arith.constant 0 : index
    %c0_43 = arith.constant 0 : index
    %50 = vector.load %arg5[%c0_42, %c0_43] : memref<1x32xf32, #tpu.memory_space<vmem>>, vector<1x32xf32>
    %51 = vector.broadcast %50 : vector<1x32xf32> to vector<64x32xf32>
    %52 = arith.addf %49, %51 : vector<64x32xf32>
    %cst_44 = arith.constant 0.000000e+00 : f32
    %53 = vector.broadcast %cst_44 : f32 to vector<64x32xf32>
    %54 = arith.subf %53, %52 : vector<64x32xf32>
    %55 = math.exp %54 : vector<64x32xf32>
    %cst_45 = arith.constant 1.000000e+00 : f32
    %56 = vector.broadcast %cst_45 : f32 to vector<64x32xf32>
    %57 = arith.addf %56, %55 : vector<64x32xf32>
    %58 = tpu.reciprocal %57 {approx = true} : vector<64x32xf32> -> vector<64x32xf32>
    %59 = arith.mulf %52, %58 : vector<64x32xf32>
    %60 = vector.shape_cast %59 : vector<64x32xf32> to vector<1x8x8x32xf32>
    %c0_46 = arith.constant 0 : index
    %c0_47 = arith.constant 0 : index
    %c0_48 = arith.constant 0 : index
    %c0_49 = arith.constant 0 : index
    %61 = vector.load %arg6[%c0_46, %c0_47, %c0_48, %c0_49] : memref<1x8x8x32xf32, #tpu.memory_space<vmem>>, vector<1x8x8x32xf32>
    tpu.vector_store %arg6[%c0_46, %c0_47, %c0_48, %c0_49], %60 {strides = array<i32>} : memref<1x8x8x32xf32, #tpu.memory_space<vmem>>, vector<1x8x8x32xf32>,
    return
  }
  func.func @transform_0(%arg0: i32, %arg1: i32, %arg2: i32) -> (i32, i32, i32, i32, i32) {
    %c0_i32 = arith.constant 0 : i32
    %c0_i32_0 = arith.constant 0 : i32
    %c0_i32_1 = arith.constant 0 : i32
    %c0_i32_2 = arith.constant 0 : i32
    %c0_i32_3 = arith.constant 0 : i32
    return %arg0, %c0_i32, %c0_i32_0, %c0_i32_1, %c0_i32_2 : i32, i32, i32, i32, i32
  }
  func.func @transform_1(%arg0: i32, %arg1: i32, %arg2: i32) -> (i32, i32) {
    %c0_i32 = arith.constant 0 : i32
    %c0_i32_0 = arith.constant 0 : i32
    return %c0_i32, %arg2 : i32, i32
  }
  func.func @transform_2(%arg0: i32, %arg1: i32, %arg2: i32) -> (i32, i32) {
    %c0_i32 = arith.constant 0 : i32
    %c0_i32_0 = arith.constant 0 : i32
    return %c0_i32, %arg2 : i32, i32
  }
  func.func @transform_3(%arg0: i32, %arg1: i32, %arg2: i32) -> (i32, i32, i32, i32) {
    %c0_i32 = arith.constant 0 : i32
    %c0_i32_0 = arith.constant 0 : i32
    return %arg0, %arg1, %c0_i32, %arg2 : i32, i32, i32, i32
  }
}

module attributes {stable_mosaic.version = 11 : i64} {
  func.func @_conv_bn_silu_kernel(%arg0: i32, %arg1: i32, %arg2: i32, %arg3: memref<1x16x1x16x32xbf16, #tpu.memory_space<vmem>>, %arg4: memref<32x64xbf16, #tpu.memory_space<vmem>>, %arg5: memref<1x64xf32, #tpu.memory_space<vmem>>, %arg6: memref<1x16x16x64xf32, #tpu.memory_space<vmem>>) attributes {dimension_semantics = [#tpu.dimension_semantics<parallel>, #tpu.dimension_semantics<parallel>, #tpu.dimension_semantics<parallel>], iteration_bounds = array<i64: 2, 1, 1>, scalar_prefetch = 0 : i64, scratch_operands = 0 : i64, tpu.core_type = #tpu.core_type<tc>, window_params = [{transform_indices = @transform_0, window_bounds = array<i64: 1, 16, 1, 16, 32>}, {transform_indices = @transform_1, window_bounds = array<i64: 32, 64>}, {transform_indices = @transform_2, window_bounds = array<i64: 1, 64>}, {transform_indices = @transform_3, window_bounds = array<i64: 1, 16, 16, 64>}]} {
    %c16_i32 = arith.constant 16 : i32
    %0 = arith.muli %arg1, %c16_i32 : i32
    %1 = tpu.assume_multiple %0, 8 : i32
    %c0_i32 = arith.constant 0 : i32
    %2 = arith.addi %1, %c0_i32 : i32
    %c0 = arith.constant 0 : index
    %3 = arith.index_cast %2 : i32 to index
    %c0_0 = arith.constant 0 : index
    %c0_1 = arith.constant 0 : index
    %c0_2 = arith.constant 0 : index
    %4 = vector.load %arg3[%c0, %3, %c0_0, %c0_1, %c0_2] : memref<1x16x1x16x32xbf16, #tpu.memory_space<vmem>>, vector<1x16x1x16x32xbf16>
    %5 = vector.shape_cast %4 : vector<1x16x1x16x32xbf16> to vector<16x16x32xbf16>
    %6 = vector.shape_cast %5 : vector<16x16x32xbf16> to vector<256x32xbf16>
    %c0_3 = arith.constant 0 : index
    %c0_4 = arith.constant 0 : index
    %7 = vector.load %arg4[%c0_3, %c0_4] : memref<32x64xbf16, #tpu.memory_space<vmem>>, vector<32x64xbf16>
    %cst = arith.constant dense<0.000000e+00> : vector<256x64xf32>
    %8 = tpu.matmul %6, %7, %cst {dimension_numbers = #tpu.dot_dimension_numbers<[1], [0], [0], [1], [0, 0, 1, 1], [], []>} : vector<256x32xbf16>, vector<32x64xbf16>, vector<256x64xf32> -> vector<256x64xf32>
    %c0_5 = arith.constant 0 : index
    %c0_6 = arith.constant 0 : index
    %9 = vector.load %arg5[%c0_5, %c0_6] : memref<1x64xf32, #tpu.memory_space<vmem>>, vector<1x64xf32>
    %10 = vector.broadcast %9 : vector<1x64xf32> to vector<256x64xf32>
    %11 = arith.addf %8, %10 : vector<256x64xf32>
    %cst_7 = arith.constant 0.000000e+00 : f32
    %12 = vector.broadcast %cst_7 : f32 to vector<256x64xf32>
    %13 = arith.subf %12, %11 : vector<256x64xf32>
    %14 = math.exp %13 : vector<256x64xf32>
    %cst_8 = arith.constant 1.000000e+00 : f32
    %15 = vector.broadcast %cst_8 : f32 to vector<256x64xf32>
    %16 = arith.addf %15, %14 : vector<256x64xf32>
    %17 = tpu.reciprocal %16 {approx = true} : vector<256x64xf32> -> vector<256x64xf32>
    %18 = arith.mulf %11, %17 : vector<256x64xf32>
    %19 = vector.shape_cast %18 : vector<256x64xf32> to vector<1x16x16x64xf32>
    %c0_9 = arith.constant 0 : index
    %c0_10 = arith.constant 0 : index
    %c0_11 = arith.constant 0 : index
    %c0_12 = arith.constant 0 : index
    %20 = vector.load %arg6[%c0_9, %c0_10, %c0_11, %c0_12] : memref<1x16x16x64xf32, #tpu.memory_space<vmem>>, vector<1x16x16x64xf32>
    tpu.vector_store %arg6[%c0_9, %c0_10, %c0_11, %c0_12], %19 {strides = array<i32>} : memref<1x16x16x64xf32, #tpu.memory_space<vmem>>, vector<1x16x16x64xf32>,
    return
  }
  func.func @transform_0(%arg0: i32, %arg1: i32, %arg2: i32) -> (i32, i32, i32, i32, i32) {
    %c0_i32 = arith.constant 0 : i32
    %c0_i32_0 = arith.constant 0 : i32
    %c0_i32_1 = arith.constant 0 : i32
    %c0_i32_2 = arith.constant 0 : i32
    %c0_i32_3 = arith.constant 0 : i32
    return %arg0, %c0_i32, %c0_i32_0, %c0_i32_1, %c0_i32_2 : i32, i32, i32, i32, i32
  }
  func.func @transform_1(%arg0: i32, %arg1: i32, %arg2: i32) -> (i32, i32) {
    %c0_i32 = arith.constant 0 : i32
    %c0_i32_0 = arith.constant 0 : i32
    return %c0_i32, %arg2 : i32, i32
  }
  func.func @transform_2(%arg0: i32, %arg1: i32, %arg2: i32) -> (i32, i32) {
    %c0_i32 = arith.constant 0 : i32
    %c0_i32_0 = arith.constant 0 : i32
    return %c0_i32, %arg2 : i32, i32
  }
  func.func @transform_3(%arg0: i32, %arg1: i32, %arg2: i32) -> (i32, i32, i32, i32) {
    %c0_i32 = arith.constant 0 : i32
    %c0_i32_0 = arith.constant 0 : i32
    return %arg0, %arg1, %c0_i32, %arg2 : i32, i32, i32, i32
  }
}

</mosaic_0001>

<bundles_post_ra>
// kernel: run.4
= control target key start
LH: loop header
LB: loop body
LE: loop exit
PB: predicated region body
PF: predicated region fallthrough
CT: control target
= control target key end

     0   :  { %8 = vsyncpa [#allocation3], 0  ;;  %s1636_s0 = inlined_call_operand.vmem [shape: bf16[2,16,1,16,32], index: 0, kind: input, shape index: {}]   ;;  %s1637_s1 = inlined_call_operand.vmem [shape: bf16[32,64], index: 1, kind: input, shape index: {}]   ;;  %s1638_s2 = inlined_call_operand.vmem [shape: f32[1,64], index: 2, kind: input, shape index: {}]   ;;  %s1639_s3 = inlined_call_operand.hbm [shape: f32[2,16,16,64], index: 3, kind: output, shape index: {}]  }
   0x1   :  { %10 = vsyncpa [#allocation3 + $0x1], 0  ;;  %s1267_s12 = smov 0   ;;  %s1269_s13 = smov 0  }
   0x2   :  { %s1271_s14 = smov 0   ;;  %s1273_s15 = smov 0  }
   0x3   :  { %s1275_s16 = smov 0   ;;  %s1277_s17 = smov 0  }
   0x4 LB: > { %s850_s18 = sadd.s32 4294967295, %s1243_s17   ;;  %s851_s19 = sadd.s32 4294967294, %s1243_s17   ;;  %s1243_s17 = sphi %s1277_s17, %s16_s17   ;;  %s1239_s16 = sphi %s1275_s16, %s1646_s16   ;;  %s1235_s15 = sphi %s1273_s15, %s1645_s15   ;;  %s1231_s14 = sphi %s1271_s14, %s1644_s14   ;;  %s1227_s13 = sphi %s1269_s13, %s1643_s13   ;;  %s1223_s12 = sphi %s1267_s12, %s1642_s12  }
   0x5   : > { %s35_s20 = sadd.s32 1, %s1239_s16  ;;  %s124_s21 = sadd.s32 1, %s1231_s14 }
   0x6   : > { %p37_p0 = scmp.ge.s32.totalorder %s35_s20, 2  ;;  %p134_p1 = scmp.ne.s32.totalorder %s1231_s14, %s1227_s13 }
   0x7   : > { %p135_p2 = scmp.eq.s32.totalorder %s850_s18, 1  ;;  %p140_p3 = scmp.ne.s32.totalorder %s1227_s13, %s1223_s12 }
   0x8   : > { %s1648_s20 = smov (%p37_p0, %s35_s20), 0  ;;  %p141_p5 = scmp.eq.s32.totalorder %s851_s19, 1 }
   0x9   : > { %p1307_p4 = por %p135_p2, %p134_p1  ;;  %s117_s23 = ssub.s32 %s1239_s16, %s1648_s20 }
   0xa   : > { %p856_p6 = scmp.ge.s32.totalorder %s1243_s17, 1  ;;  %p122_p7 = scmp.eq.s32.totalorder %s117_s23, 0 }
   0xb   : > { %p1314_p8 = por %p141_p5, %p140_p3  ;;  %p180_p9 = scmp.lt.s32.totalorder %s1243_s17, 3 }
   0xc   : > { %s1320_s25 = scalar_select %p122_p7, %s1231_s14, %s124_s21  }
   0xd   : > { %p181_p10 = pnand %p856_p6, %p180_p9 }
   0xe   : > { %p211_p11 = scmp.lt.s32.totalorder (!%p181_p10), %s1235_s15, 1  ;;  %s208_s10 = sand.u32 (!%p181_p10), 1, %s1227_s13  }
   0xf   : > { %184 = sbr.rel (%p181_p10) target bundleno = 252 (0xfc), region = 32  ;;  %s857_s11 = sshll.u32 (!%p181_p10), %s208_s10, 8 }
  0x10   : > { %s1419_s18 = scalar_lea.vmem (!%p181_p10), [#allocation2], %s857_s11  ;;  %s972_s19 = sshll.u32 (!%p181_p10), %s1235_s15, 8 }
  0x11   : > { %s740_s26 = scalar_lea.hbm (!%p181_p10), %s1639_s3, %s972_s19  ;;  %s725_s28 = scalar_lea.sflag (!%p181_p10), [#allocation3], %s208_s10 }
  0x12   : > { %s743_s27 = sshll.u32 (!%p181_p10), %s740_s26, 4  ;;  %s1185_s6 = scalar_lea.hbm (!%p181_p10), %s1639_s3, 512  ;;  %s744_s27 = int_to_ptr.hbm [resolvable:$true] %s743_s27 }
  0x13   : > { %s1179_s29 = sshra.s32 (!%p181_p10), %s744_s27, 4  ;;  %s1180_s29 = int_to_ptr.hbm [resolvable:$true] %s1179_s29 }
  0x14   : > { %v971_v0 = vld [vmem:[%s1637_s1 + $0x8] sm:$0xff]  ;;  %v970_v1 = vld [vmem:[%s1637_s1] sm:$0xff]  ;;  %s212_s30 = scalar_select %p211_p11, %s1235_s15, 1  ;;  %vm361_vm0 = vcmask 261120   ;;  %vm691_vm1 = vcmask 523264  }
  0x15   : > { %416 = vmatpush.bf16.msra.mxu0 %v971_v0  ;;  %973 = vmatpush.bf16.msra.mxu1 %v971_v0  ;;  %v1370_v18 = vld [vmem:[%s1638_s2] ss:$0 sm:$0xff]  ;;  %s741_s15 = sshll.u32 %s1419_s18, 4  ;;  %p1186_p1 = scmp.lt.s32.totalorder %s1180_s29, %s1639_s3  ;;  %s742_s15 = int_to_ptr.vmem [resolvable:$true] %s741_s15 }
  0x16   : > { %974 = vmatpush.bf16.msra.mxu2 %v971_v0  ;;  %975 = vmatpush.bf16.msra.mxu3 %v971_v0  ;;  %s953_s4 = sshll.u32 %s212_s30, 7  ;;  %s1181_s30 = scalar_lea.hbm %s1180_s29, 256 }
  0x17   : > { %s1333_s7 = scalar_lea.vmem %s1636_s0, %s953_s4  ;;  %p1182_p12 = scmp.ne.s32.totalorder %s1180_s29, %s1181_s30 }
  0x18   : > { %v954_v2 = vld [vmem:[%s1333_s7] sm:$0xff]  ;;  %v955_v6 = vld [vmem:[%s1333_s7 + $0x8] sm:$0xff]  ;;  %v956_v10 = vld [vmem:[%s1333_s7 + $0x10] sm:$0xff]  ;;  %p1187_p2 = scmp.lt.s32.totalorder %s1185_s6, %s1181_s30 }
  0x19   : > { %417 = vmatpush.bf16.msra.mxu0 %v970_v1  ;;  %976 = vmatpush.bf16.msra.mxu1 %v970_v1  ;;  %v958_v3 = vld [vmem:[%s1333_s7 + $0x20] sm:$0xff]  ;;  %v959_v7 = vld [vmem:[%s1333_s7 + $0x28] sm:$0xff]  ;;  %v960_v11 = vld [vmem:[%s1333_s7 + $0x30] sm:$0xff]  ;;  %p1183_p13 = pnand %p1182_p12, %p1307_p4 }
  0x1a   : > { %v962_v4 = vld [vmem:[%s1333_s7 + $0x40] sm:$0xff]  ;;  %977 = vmatpush.bf16.msra.mxu2 %v970_v1  ;;  %978 = vmatpush.bf16.msra.mxu3 %v970_v1  ;;  %v963_v8 = vld [vmem:[%s1333_s7 + $0x48] sm:$0xff]  ;;  %v964_v12 = vld [vmem:[%s1333_s7 + $0x50] sm:$0xff]  ;;  %p1188_p3 = por %p1187_p2, %p1186_p1 }
  0x1b   : > { %v966_v5 = vld [vmem:[%s1333_s7 + $0x60] sm:$0xff]  ;;  %v967_v9 = vld [vmem:[%s1333_s7 + $0x68] sm:$0xff]  ;;  %v968_v13 = vld [vmem:[%s1333_s7 + $0x70] sm:$0xff]  ;;  %p1184_p0 = pneg %p1183_p13 }
  0x1c   : > { %932 = vmatmul.msk.bf16.vlgmr.msra.gmra.mxu0 %vm361_vm0, %v954_v2  ;;  %936 = vmatmul.msk.bf16.vlgmr.msra.gmra.mxu1 %vm361_vm0, %v958_v3  ;;  %v957_v14 = vld [vmem:[%s1333_s7 + $0x18] sm:$0xff] }
  0x1d   : > { %940 = vmatmul.msk.bf16.vlgmr.msra.gmra.mxu2 %vm361_vm0, %v962_v4  ;;  %944 = vmatmul.msk.bf16.vlgmr.msra.gmra.mxu3 %vm361_vm0, %v966_v5  ;;  %v961_v15 = vld [vmem:[%s1333_s7 + $0x38] sm:$0xff]  ;;  %p1189_p5 = pnand %p1188_p3, %p1184_p0 }
  0x1e   : > { %v965_v16 = vld [vmem:[%s1333_s7 + $0x58] sm:$0xff] }
  0x1f   : > { %v969_v17 = vld [vmem:[%s1333_s7 + $0x78] sm:$0xff] }
  0x2c   : > { %933 = vmatmul.msk.bf16.gmra.mxu0 %vm361_vm0, %v955_v6  ;;  %937 = vmatmul.msk.bf16.gmra.mxu1 %vm361_vm0, %v959_v7 }
  0x2d   : > { %941 = vmatmul.msk.bf16.gmra.mxu2 %vm361_vm0, %v963_v8  ;;  %945 = vmatmul.msk.bf16.gmra.mxu3 %vm361_vm0, %v967_v9 }
  0x3c   : > { %934 = vmatmul.msk.bf16.gmra.mxu0 %vm361_vm0, %v956_v10  ;;  %938 = vmatmul.msk.bf16.gmra.mxu1 %vm361_vm0, %v960_v11 }
  0x3d   : > { %942 = vmatmul.msk.bf16.gmra.mxu2 %vm361_vm0, %v964_v12  ;;  %946 = vmatmul.msk.bf16.gmra.mxu3 %vm361_vm0, %v968_v13 }
  0x4c   : > { %935 = vmatmul.msk.bf16.gmra.mxu0 %vm361_vm0, %v957_v14  ;;  %939 = vmatmul.msk.bf16.gmra.mxu1 %vm361_vm0, %v961_v15 }
  0x4d   : > { %943 = vmatmul.msk.bf16.gmra.mxu2 %vm361_vm0, %v965_v16  ;;  %947 = vmatmul.msk.bf16.gmra.mxu3 %vm361_vm0, %v969_v17 }
  0x99   : > { %v419_v19 = vpop.f32.mrf.mxu0  ;;  %v439_v20 = vpop.f32.mrf.mxu1 }
  0x9a   : > { %v420_v21 = vadd.f32 %v1370_v18, %v419_v19  ;;  %v1374_v22 = vadd.f32 %v1370_v18, %v439_v20 }
  0x9c   : > { %v499_v23 = vsub.f32 0.0, %v420_v21  ;;  %v507_v24 = vsub.f32 0.0, %v1374_v22 }
  0x9e   : > { %v531_v25 = vmul.f32 1.442695, %v499_v23  ;;  %v547_v26 = vmul.f32 1.442695, %v507_v24 }
  0xa0   : > { %1037 = vpow2.f32 %v531_v25  ;;  %v459_v27 = vpop.f32.mrf.mxu2  ;;  %v479_v28 = vpop.f32.mrf.mxu3 }
  0xa1   : > { %1039 = vpow2.f32 %v547_v26  ;;  %v1378_v29 = vadd.f32 %v1370_v18, %v459_v27  ;;  %v1381_v30 = vadd.f32 %v1370_v18, %v479_v28  ;;  %v421_v31 = vpop.f32.mrf.mxu0  ;;  %v441_v32 = vpop.f32.mrf.mxu1 }
  0xa2   : > { %v1384_v33 = vadd.f32 %v1370_v18, %v421_v31  ;;  %v1387_v34 = vadd.f32 %v1370_v18, %v441_v32 }
  0xa3   : > { %v515_v35 = vsub.f32 0.0, %v1378_v29  ;;  %v523_v36 = vsub.f32 0.0, %v1381_v30 }
  0xa4   : > { %v500_v37 = vsub.f32 0.0, %v1384_v33  ;;  %v508_v38 = vsub.f32 0.0, %v1387_v34 }
  0xa5   : > { %v563_v39 = vmul.f32 1.442695, %v515_v35  ;;  %v579_v40 = vmul.f32 1.442695, %v523_v36 }
  0xa6   : > { %v1038_v41 = vpop.eup %1037  ;;  %v533_v44 = vmul.f32 1.442695, %v500_v37  ;;  %v549_v46 = vmul.f32 1.442695, %v508_v38 }
  0xa7   : > { %v1040_v42 = vpop.eup %1039  ;;  %v595_v43 = vadd.f32 1.0, %v1038_v41  ;;  %1041 = vpow2.f32 %v563_v39 }
  0xa8   : > { %v603_v45 = vadd.f32 1.0, %v1040_v42  ;;  %1043 = vpow2.f32 %v579_v40  ;;  %v461_v47 = vpop.f32.mrf.mxu2  ;;  %v481_v48 = vpop.f32.mrf.mxu3 }
  0xa9   : > { %1045 = vrcp.f32 %v595_v43  ;;  %v1395_v49 = vadd.f32 %v1370_v18, %v461_v47  ;;  %v1398_v50 = vadd.f32 %v1370_v18, %v481_v48  ;;  %v424_v51 = vpop.f32.mrf.mxu0  ;;  %v444_v52 = vpop.f32.mrf.mxu1 }
  0xaa   : > { %1047 = vrcp.f32 %v603_v45  ;;  %v1401_v53 = vadd.f32 %v1370_v18, %v424_v51  ;;  %v1404_v54 = vadd.f32 %v1370_v18, %v444_v52 }
  0xab   : > { %1049 = vpow2.f32 %v533_v44  ;;  %v516_v55 = vsub.f32 0.0, %v1395_v49  ;;  %v524_v56 = vsub.f32 0.0, %v1398_v50 }
  0xac   : > { %1051 = vpow2.f32 %v549_v46  ;;  %v501_v57 = vsub.f32 0.0, %v1401_v53  ;;  %v509_v58 = vsub.f32 0.0, %v1404_v54 }
  0xad   : > { %v1042_v59 = vpop.eup %1041  ;;  %v565_v60 = vmul.f32 1.442695, %v516_v55  ;;  %v581_v63 = vmul.f32 1.442695, %v524_v56 }
  0xae   : > { %v1044_v61 = vpop.eup %1043  ;;  %v611_v62 = vadd.f32 1.0, %v1042_v59  ;;  %v535_v2 = vmul.f32 1.442695, %v501_v57  ;;  %v551_v5 = vmul.f32 1.442695, %v509_v58 }
  0xaf   : > { %v1046_v0 = vpop.eup %1045  ;;  %v619_v1 = vadd.f32 1.0, %v1044_v61  ;;  %1053 = vpow2.f32 %v565_v60 }
  0xb0   : > { %v1048_v3 = vpop.eup %1047  ;;  %v659_v4 = vmul.f32 %v1046_v0, %v420_v21  ;;  %1055 = vrcp.f32 %v611_v62  ;;  %v464_v6 = vpop.f32.mrf.mxu2 }
  0xb1   : > { %v484_v7 = vpop.f32.mrf.mxu3  ;;  %v1050_v8 = vpop.eup %1049  ;;  %v667_v9 = vmul.f32 %v1048_v3, %v1374_v22  ;;  %1057 = vrcp.f32 %v619_v1  ;;  %v1414_v10 = vadd.f32 %v1370_v18, %v464_v6 }
  0xb2   : > { %v1417_v11 = vadd.f32 %v1370_v18, %v484_v7  ;;  %v426_v12 = vpop.f32.mrf.mxu0  ;;  %v446_v13 = vpop.f32.mrf.mxu1  ;;  %692 = vst.msk [vmem:[%s1419_s18] sm:$0xff] %vm691_vm1, %v659_v4  ;;  %v596_v15 = vadd.f32 1.0, %v1050_v8  ;;  %1059 = vpow2.f32 %v581_v63 }
  0xb3   : > { %v1052_v14 = vpop.eup %1051  ;;  %v1424_v16 = vadd.f32 %v1370_v18, %v426_v12  ;;  %v1427_v17 = vadd.f32 %v1370_v18, %v446_v13  ;;  %700 = vst.msk [vmem:[%s1419_s18 + $0x40] sm:$0xff] %vm691_vm1, %v667_v9  ;;  %1061 = vpow2.f32 %v535_v2  ;;  %v517_v20 = vsub.f32 0.0, %v1414_v10 }
  0xb4   : > { %v604_v19 = vadd.f32 1.0, %v1052_v14  ;;  %v525_v21 = vsub.f32 0.0, %v1417_v11  ;;  %1063 = vrcp.f32 %v596_v15 }
  0xb5   : > { %v502_v22 = vsub.f32 0.0, %v1424_v16  ;;  %v510_v23 = vsub.f32 0.0, %v1427_v17  ;;  %v1054_v24 = vpop.eup %1053  ;;  %v567_v25 = vmul.f32 1.442695, %v517_v20 }
  0xb6   : > { %1065 = vrcp.f32 %v604_v19  ;;  %v583_v26 = vmul.f32 1.442695, %v525_v21  ;;  %v1056_v27 = vpop.eup %1055  ;;  %v612_v28 = vadd.f32 1.0, %v1054_v24 }
  0xb7   : > { %1067 = vpow2.f32 %v551_v5  ;;  %v537_v31 = vmul.f32 1.442695, %v502_v22  ;;  %v1058_v32 = vpop.eup %1057  ;;  %v675_v35 = vmul.f32 %v1056_v27, %v1378_v29  ;;  %v553_v38 = vmul.f32 1.442695, %v510_v23 }
  0xb8   : > { %1069 = vpow2.f32 %v567_v25  ;;  %v1060_v36 = vpop.eup %1059  ;;  %v683_v37 = vmul.f32 %v1058_v32, %v1381_v30  ;;  %v466_v39 = vpop.f32.mrf.mxu2 }
  0xb9   : > { %1071 = vrcp.f32 %v612_v28  ;;  %v486_v40 = vpop.f32.mrf.mxu3  ;;  %v1062_v41 = vpop.eup %1061  ;;  %708 = vst.msk [vmem:[%s1419_s18 + $0x80] sm:$0xff] %vm691_vm1, %v675_v35  ;;  %v620_v42 = vadd.f32 1.0, %v1060_v36  ;;  %v1440_v43 = vadd.f32 %v1370_v18, %v466_v39 }
  0xba   : > { %1073 = vpow2.f32 %v583_v26  ;;  %v1443_v44 = vadd.f32 %v1370_v18, %v486_v40  ;;  %v429_v29 = vpop.f32.mrf.mxu0  ;;  %v449_v45 = vpop.f32.mrf.mxu1  ;;  %716 = vst.msk [vmem:[%s1419_s18 + $0xc0] sm:$0xff] %vm691_vm1, %v683_v37  ;;  %v597_v30 = vadd.f32 1.0, %v1062_v41 }
  0xbb   : > { %v1064_v46 = vpop.eup %1063  ;;  %1075 = vpow2.f32 %v537_v31  ;;  %v1448_v47 = vadd.f32 %v1370_v18, %v429_v29  ;;  %v1451_v48 = vadd.f32 %v1370_v18, %v449_v45  ;;  %v518_v55 = vsub.f32 0.0, %v1440_v43 }
  0xbc   : > { %v1066_v51 = vpop.eup %1065  ;;  %v660_v52 = vmul.f32 %v1064_v46, %v1384_v33  ;;  %1077 = vrcp.f32 %v620_v42  ;;  %v526_v56 = vsub.f32 0.0, %v1443_v44 }
  0xbd   : > { %v1068_v57 = vpop.eup %1067  ;;  %v668_v58 = vmul.f32 %v1066_v51, %v1387_v34  ;;  %1079 = vrcp.f32 %v597_v30  ;;  %v503_v59 = vsub.f32 0.0, %v1448_v47  ;;  %v511_v60 = vsub.f32 0.0, %v1451_v48 }
  0xbe   : > { %v1070_v61 = vpop.eup %1069  ;;  %693 = vst.msk [vmem:[%s1419_s18 + $0x8] sm:$0xff] %vm691_vm1, %v660_v52  ;;  %v605_v62 = vadd.f32 1.0, %v1068_v57  ;;  %1081 = vpow2.f32 %v553_v38  ;;  %v569_v63 = vmul.f32 1.442695, %v518_v55  ;;  %v585_v34 = vmul.f32 1.442695, %v526_v56 }
  0xbf   : > { %v1072_v33 = vpop.eup %1071  ;;  %701 = vst.msk [vmem:[%s1419_s18 + $0x48] sm:$0xff] %vm691_vm1, %v668_v58  ;;  %v613_v0 = vadd.f32 1.0, %v1070_v61  ;;  %v539_v5 = vmul.f32 1.442695, %v503_v59  ;;  %v555_v6 = vmul.f32 1.442695, %v511_v60 }
  0xc0   : > { %v1074_v1 = vpop.eup %1073  ;;  %v676_v2 = vmul.f32 %v1072_v33, %v1395_v49  ;;  %1083 = vrcp.f32 %v605_v62  ;;  %v469_v7 = vpop.f32.mrf.mxu2 }
  0xc1   : > { %v1076_v3 = vpop.eup %1075  ;;  %1085 = vrcp.f32 %v613_v0  ;;  %v621_v4 = vadd.f32 1.0, %v1074_v1  ;;  %v489_v8 = vpop.f32.mrf.mxu3  ;;  %v1467_v13 = vadd.f32 %v1370_v18, %v469_v7 }
  0xc2   : > { %v1078_v9 = vpop.eup %1077  ;;  %709 = vst.msk [vmem:[%s1419_s18 + $0x88] sm:$0xff] %vm691_vm1, %v676_v2  ;;  %v598_v12 = vadd.f32 1.0, %v1076_v3  ;;  %1087 = vpow2.f32 %v569_v63  ;;  %v1470_v49 = vadd.f32 %v1370_v18, %v489_v8  ;;  %v431_v14 = vpop.f32.mrf.mxu0 }
  0xc3   : > { %v451_v15 = vpop.f32.mrf.mxu1  ;;  %v1080_v19 = vpop.eup %1079  ;;  %v684_v20 = vmul.f32 %v1078_v9, %v1398_v50  ;;  %1089 = vrcp.f32 %v621_v4  ;;  %v1474_v21 = vadd.f32 %v1370_v18, %v431_v14  ;;  %v519_v25 = vsub.f32 0.0, %v1467_v13 }
  0xc4   : > { %v1477_v22 = vadd.f32 %v1370_v18, %v451_v15  ;;  %v1082_v23 = vpop.eup %1081  ;;  %v661_v24 = vmul.f32 %v1080_v19, %v1401_v53  ;;  %1091 = vrcp.f32 %v598_v12  ;;  %v527_v26 = vsub.f32 0.0, %v1470_v49 }
  0xc5   : > { %717 = vst.msk [vmem:[%s1419_s18 + $0xc8] sm:$0xff] %vm691_vm1, %v684_v20  ;;  %v606_v27 = vadd.f32 1.0, %v1082_v23  ;;  %1093 = vpow2.f32 %v585_v34  ;;  %v504_v50 = vsub.f32 0.0, %v1474_v21  ;;  %v571_v32 = vmul.f32 1.442695, %v519_v25 }
  0xc6   : > { %v512_v28 = vsub.f32 0.0, %v1477_v22  ;;  %v1084_v31 = vpop.eup %1083  ;;  %694 = vst.msk [vmem:[%s1419_s18 + $0x10] sm:$0xff] %vm691_vm1, %v661_v24  ;;  %1095 = vpow2.f32 %v539_v5  ;;  %v587_v53 = vmul.f32 1.442695, %v527_v26 }
  0xc7   : > { %v1086_v35 = vpop.eup %1085  ;;  %v669_v36 = vmul.f32 %v1084_v31, %v1404_v54  ;;  %1097 = vrcp.f32 %v606_v27  ;;  %v541_v39 = vmul.f32 1.442695, %v504_v50 }
  0xc8   : > { %v1088_v37 = vpop.eup %1087  ;;  %v677_v38 = vmul.f32 %v1086_v35, %v1414_v10  ;;  %1099 = vpow2.f32 %v555_v6  ;;  %v557_v42 = vmul.f32 1.442695, %v512_v28  ;;  %v471_v29 = vpop.f32.mrf.mxu2 }
  0xc9   : > { %v1090_v40 = vpop.eup %1089  ;;  %702 = vst.msk [vmem:[%s1419_s18 + $0x50] sm:$0xff] %vm691_vm1, %v669_v36  ;;  %v614_v41 = vadd.f32 1.0, %v1088_v37  ;;  %1101 = vpow2.f32 %v571_v32  ;;  %v491_v45 = vpop.f32.mrf.mxu3  ;;  %v1496_v30 = vadd.f32 %v1370_v18, %v471_v29 }
  0xca   : > { %v1092_v46 = vpop.eup %1091  ;;  %710 = vst.msk [vmem:[%s1419_s18 + $0x90] sm:$0xff] %vm691_vm1, %v677_v38  ;;  %v685_v54 = vmul.f32 %v1090_v40, %v1417_v11  ;;  %1103 = vpow2.f32 %v587_v53  ;;  %v1499_v10 = vadd.f32 %v1370_v18, %v491_v45  ;;  %v434_v51 = vpop.f32.mrf.mxu0 }
  0xcb   : > { %v454_v52 = vpop.f32.mrf.mxu1  ;;  %v1094_v55 = vpop.eup %1093  ;;  %v662_v56 = vmul.f32 %v1092_v46, %v1424_v16  ;;  %1105 = vrcp.f32 %v614_v41  ;;  %v1503_v57 = vadd.f32 %v1370_v18, %v434_v51  ;;  %v520_v60 = vsub.f32 0.0, %v1496_v30 }
  0xcc   : > { %v1506_v58 = vadd.f32 %v1370_v18, %v454_v52  ;;  %v1096_v11 = vpop.eup %1095  ;;  %718 = vst.msk [vmem:[%s1419_s18 + $0xd0] sm:$0xff] %vm691_vm1, %v685_v54  ;;  %v622_v59 = vadd.f32 1.0, %v1094_v55  ;;  %1107 = vpow2.f32 %v541_v39  ;;  %v528_v61 = vsub.f32 0.0, %v1499_v10 }
  0xcd   : > { %v1098_v62 = vpop.eup %1097  ;;  %695 = vst.msk [vmem:[%s1419_s18 + $0x18] sm:$0xff] %vm691_vm1, %v662_v56  ;;  %v599_v16 = vadd.f32 1.0, %v1096_v11  ;;  %1109 = vpow2.f32 %v557_v42  ;;  %v505_v63 = vsub.f32 0.0, %v1503_v57  ;;  %v573_v2 = vmul.f32 1.442695, %v520_v60 }
  0xce   : > { %v513_v33 = vsub.f32 0.0, %v1506_v58  ;;  %v1100_v0 = vpop.eup %1099  ;;  %v670_v1 = vmul.f32 %v1098_v62, %v1427_v17  ;;  %1111 = vrcp.f32 %v622_v59  ;;  %v589_v6 = vmul.f32 1.442695, %v528_v61 }
  0xcf   : > { %v1102_v34 = vpop.eup %1101  ;;  %1113 = vrcp.f32 %v599_v16  ;;  %v607_v3 = vadd.f32 1.0, %v1100_v0  ;;  %v543_v9 = vmul.f32 1.442695, %v505_v63 }
  0xd0   : > { %v1104_v4 = vpop.eup %1103  ;;  %703 = vst.msk [vmem:[%s1419_s18 + $0x58] sm:$0xff] %vm691_vm1, %v670_v1  ;;  %v615_v5 = vadd.f32 1.0, %v1102_v34  ;;  %1115 = vpow2.f32 %v573_v2  ;;  %v559_v12 = vmul.f32 1.442695, %v513_v33  ;;  %v474_v14 = vpop.f32.mrf.mxu2 }
  0xd1   : > { %v1106_v7 = vpop.eup %1105  ;;  %1117 = vrcp.f32 %v607_v3  ;;  %v623_v8 = vadd.f32 1.0, %v1104_v4  ;;  %v494_v15 = vpop.f32.mrf.mxu3  ;;  %v1521_v20 = vadd.f32 %v1370_v18, %v474_v14 }
  0xd2   : > { %v1108_v17 = vpop.eup %1107  ;;  %v678_v19 = vmul.f32 %v1106_v7, %v1440_v43  ;;  %1119 = vrcp.f32 %v615_v5  ;;  %v1524_v23 = vadd.f32 %v1370_v18, %v494_v15  ;;  %v436_v24 = vpop.f32.mrf.mxu0 }
  0xd3   : > { %v456_v25 = vpop.f32.mrf.mxu1  ;;  %v1110_v26 = vpop.eup %1109  ;;  %1121 = vrcp.f32 %v623_v8  ;;  %v600_v27 = vadd.f32 1.0, %v1108_v17  ;;  %v1527_v50 = vadd.f32 %v1370_v18, %v436_v24  ;;  %v521_v32 = vsub.f32 0.0, %v1521_v20 }
  0xd4   : > { %v1530_v28 = vadd.f32 %v1370_v18, %v456_v25  ;;  %v1112_v31 = vpop.eup %1111  ;;  %711 = vst.msk [vmem:[%s1419_s18 + $0x98] sm:$0xff] %vm691_vm1, %v678_v19  ;;  %v608_v43 = vadd.f32 1.0, %v1110_v26  ;;  %1123 = vpow2.f32 %v589_v6  ;;  %v529_v53 = vsub.f32 0.0, %v1524_v23 }
  0xd5   : > { %v1114_v35 = vpop.eup %1113  ;;  %v686_v36 = vmul.f32 %v1112_v31, %v1443_v44  ;;  %1125 = vrcp.f32 %v600_v27  ;;  %v506_v37 = vsub.f32 0.0, %v1527_v50  ;;  %v575_v41 = vmul.f32 1.442695, %v521_v32 }
  0xd6   : > { %v514_v38 = vsub.f32 0.0, %v1530_v28  ;;  %v1116_v39 = vpop.eup %1115  ;;  %v663_v40 = vmul.f32 %v1114_v35, %v1448_v47  ;;  %1127 = vrcp.f32 %v608_v43  ;;  %v591_v45 = vmul.f32 1.442695, %v529_v53 }
  0xd7   : > { %v1118_v42 = vpop.eup %1117  ;;  %719 = vst.msk [vmem:[%s1419_s18 + $0xd8] sm:$0xff] %vm691_vm1, %v686_v36  ;;  %v616_v29 = vadd.f32 1.0, %v1116_v39  ;;  %1129 = vpow2.f32 %v543_v9  ;;  %v545_v54 = vmul.f32 1.442695, %v506_v37 }
  0xd8   : > { %v1120_v46 = vpop.eup %1119  ;;  %696 = vst.msk [vmem:[%s1419_s18 + $0x20] sm:$0xff] %vm691_vm1, %v663_v40  ;;  %v671_v44 = vmul.f32 %v1118_v42, %v1451_v48  ;;  %1131 = vpow2.f32 %v559_v12  ;;  %v561_v52 = vmul.f32 1.442695, %v514_v38  ;;  %v476_v55 = vpop.f32.mrf.mxu2 }
  0xd9   : > { %v1122_v51 = vpop.eup %1121  ;;  %v679_v47 = vmul.f32 %v1120_v46, %v1467_v13  ;;  %1133 = vrcp.f32 %v616_v29  ;;  %v496_v56 = vpop.f32.mrf.mxu3  ;;  %v1550_v48 = vadd.f32 %v1370_v18, %v476_v55 }
  0xda   : > { %v1124_v11 = vpop.eup %1123  ;;  %704 = vst.msk [vmem:[%s1419_s18 + $0x60] sm:$0xff] %vm691_vm1, %v671_v44  ;;  %v687_v59 = vmul.f32 %v1122_v51, %v1470_v49  ;;  %1135 = vpow2.f32 %v575_v41  ;;  %v1553_v60 = vadd.f32 %v1370_v18, %v496_v56 }
  0xdb   : > { %v1126_v61 = vpop.eup %1125  ;;  %712 = vst.msk [vmem:[%s1419_s18 + $0xa0] sm:$0xff] %vm691_vm1, %v679_v47  ;;  %v624_v13 = vadd.f32 1.0, %v1124_v11  ;;  %1137 = vpow2.f32 %v591_v45  ;;  %v522_v49 = vsub.f32 0.0, %v1550_v48 }
  0xdc   : > { %v1128_v62 = vpop.eup %1127  ;;  %720 = vst.msk [vmem:[%s1419_s18 + $0xe0] sm:$0xff] %vm691_vm1, %v687_v59  ;;  %v664_v16 = vmul.f32 %v1126_v61, %v1474_v21  ;;  %1139 = vpow2.f32 %v545_v54  ;;  %v530_v2 = vsub.f32 0.0, %v1553_v60 }
  0xdd   : > { %v1130_v63 = vpop.eup %1129  ;;  %v672_v33 = vmul.f32 %v1128_v62, %v1477_v22  ;;  %1141 = vrcp.f32 %v624_v13  ;;  %v577_v1 = vmul.f32 1.442695, %v522_v49 }
  0xde   : > { %v1132_v18 = vpop.eup %1131  ;;  %697 = vst.msk [vmem:[%s1419_s18 + $0x28] sm:$0xff] %vm691_vm1, %v664_v16  ;;  %v601_v0 = vadd.f32 1.0, %v1130_v63  ;;  %1143 = vpow2.f32 %v561_v52  ;;  %v593_v8 = vmul.f32 1.442695, %v530_v2 }
  0xdf   : > { %v1134_v34 = vpop.eup %1133  ;;  %705 = vst.msk [vmem:[%s1419_s18 + $0x68] sm:$0xff] %vm691_vm1, %v672_v33  ;;  %v609_v21 = vadd.f32 1.0, %v1132_v18 }
  0xe0   : > { %v1136_v3 = vpop.eup %1135  ;;  %v680_v4 = vmul.f32 %v1134_v34, %v1496_v30  ;;  %1145 = vrcp.f32 %v601_v0 }
  0xe1   : > { %v1138_v5 = vpop.eup %1137  ;;  %1147 = vrcp.f32 %v609_v21  ;;  %v617_v22 = vadd.f32 1.0, %v1136_v3 }
  0xe2   : > { %v1140_v6 = vpop.eup %1139  ;;  %713 = vst.msk [vmem:[%s1419_s18 + $0xa8] sm:$0xff] %vm691_vm1, %v680_v4  ;;  %v625_v7 = vadd.f32 1.0, %v1138_v5  ;;  %1149 = vpow2.f32 %v577_v1 }
  0xe3   : > { %v1142_v9 = vpop.eup %1141  ;;  %1151 = vrcp.f32 %v617_v22  ;;  %v602_v12 = vadd.f32 1.0, %v1140_v6 }
  0xe4   : > { %v1144_v14 = vpop.eup %1143  ;;  %v688_v15 = vmul.f32 %v1142_v9, %v1499_v10  ;;  %1153 = vrcp.f32 %v625_v7 }
  0xe5   : > { %1155 = vrcp.f32 %v602_v12  ;;  %v610_v30 = vadd.f32 1.0, %v1144_v14 }
  0xe6   : > { %v1146_v17 = vpop.eup %1145  ;;  %721 = vst.msk [vmem:[%s1419_s18 + $0xe8] sm:$0xff] %vm691_vm1, %v688_v15  ;;  %1157 = vpow2.f32 %v593_v8 }
  0xe7   : > { %v1148_v19 = vpop.eup %1147  ;;  %v665_v24 = vmul.f32 %v1146_v17, %v1503_v57  ;;  %1159 = vrcp.f32 %v610_v30 }
  0xe8   : > { %v1150_v25 = vpop.eup %1149  ;;  %v673_v26 = vmul.f32 %v1148_v19, %v1506_v58 }
  0xe9   : > { %v1152_v27 = vpop.eup %1151  ;;  %698 = vst.msk [vmem:[%s1419_s18 + $0x30] sm:$0xff] %vm691_vm1, %v665_v24  ;;  %v618_v10 = vadd.f32 1.0, %v1150_v25 }
  0xea   : > { %v1154_v31 = vpop.eup %1153  ;;  %706 = vst.msk [vmem:[%s1419_s18 + $0x70] sm:$0xff] %vm691_vm1, %v673_v26  ;;  %v681_v43 = vmul.f32 %v1152_v27, %v1521_v20 }
  0xeb   : > { %v1156_v32 = vpop.eup %1155  ;;  %v689_v57 = vmul.f32 %v1154_v31, %v1524_v23  ;;  %1161 = vrcp.f32 %v618_v10 }
  0xec   : > { %v1158_v53 = vpop.eup %1157  ;;  %714 = vst.msk [vmem:[%s1419_s18 + $0xb0] sm:$0xff] %vm691_vm1, %v681_v43  ;;  %v666_v58 = vmul.f32 %v1156_v32, %v1527_v50 }
  0xed   : > { %v1160_v35 = vpop.eup %1159  ;;  %722 = vst.msk [vmem:[%s1419_s18 + $0xf0] sm:$0xff] %vm691_vm1, %v689_v57  ;;  %v626_v36 = vadd.f32 1.0, %v1158_v53 }
  0xee   : > { %699 = vst.msk [vmem:[%s1419_s18 + $0x38] sm:$0xff] %vm691_vm1, %v666_v58  ;;  %v674_v20 = vmul.f32 %v1160_v35, %v1530_v28 }
  0xef   : > { %1163 = vrcp.f32 %v626_v36 }
  0xf0   : > { %707 = vst.msk [vmem:[%s1419_s18 + $0x78] sm:$0xff] %vm691_vm1, %v674_v20 }
  0xf1   : > { %v1162_v23 = vpop.eup %1161 }
  0xf2   : > { %v682_v50 = vmul.f32 %v1162_v23, %v1550_v48 }
  0xf4   : > { %715 = vst.msk [vmem:[%s1419_s18 + $0xb8] sm:$0xff] %vm691_vm1, %v682_v50 }
  0xf5   : > { %v1164_v37 = vpop.eup %1163 }
  0xf6   : > { %v690_v28 = vmul.f32 %v1164_v37, %v1553_v60 }
  0xf8   : > { %723 = vst.msk [vmem:[%s1419_s18 + $0xf8] sm:$0xff] %vm691_vm1, %v690_v28 }
  0xf9   : > { %1192 = shalt.err (!%p1189_p5)
}
  0xfa   : > { %s1245_s9 = smov 128   ;;  %s1246_s10 = smov 8  }
  0xfb   : > { %979 = dma.vmem_to_hbm [thread:$0]  (%p1307_p4), %s742_s15, 4096, %s744_s27, %s725_s28, %s1245_s9, %s1245_s9, %s1246_s10  }
  0xfc PF: > { %p985_p6 = scmp.ge.s32.totalorder %s1243_s17, 2  ;;  %s758_s11 = sand.u32 1, %s1223_s12  }
  0xfd   : > { %s759_s18 = scalar_lea.sflag [#allocation3], %s758_s11 }
  0xfe   : > { %p982_p7 = pnand %p985_p6, %p1314_p8 }
 0x100   : > { %p983_p9 = pneg %p982_p7 }
 0x102   : > { %1218 = dma.done.wait (%p983_p9), %s759_s18, 4096  }
 0x103   : > { %1220 = vsyncadd (%p983_p9), %s759_s18, 4294963200  ;;  %s16_s17 = sadd.s32 1, %s1243_s17   ;;  %s1642_s12 = smov %s1227_s13 }
 0x104   : > { %p13_p10 = scmp.ge.s32.totalorder %s16_s17, 4   ;;  %s1643_s13 = smov %s1231_s14 }
 0x105   : > { %s1644_s14 = smov %s1320_s25  ;;  %s1645_s15 = smov %s1239_s16 }
 0x106   : > { %s1646_s16 = smov %s1648_s20  ;;  %15 = sbr.rel (!%p13_p10) target bundleno = 4 (0x4), region = 74 }
 0x10b   :  { %765 = vsyncpa [#allocation3], 1 }
 0x10c   :  { %767 = vsyncpa [#allocation3 + $0x1], 1 }

// kernel: run.5
= control target key start
LH: loop header
LB: loop body
LE: loop exit
PB: predicated region body
PF: predicated region fallthrough
CT: control target
= control target key end

     0   :  { %8 = vsyncpa [#allocation3], 0  ;;  %s1754_s0 = inlined_call_operand.vmem [shape: bf16[2,9,2,9,8], index: 0, kind: input, shape index: {}]   ;;  %s1755_s1 = inlined_call_operand.vmem [shape: bf16[36,32], index: 1, kind: input, shape index: {}]   ;;  %s1756_s2 = inlined_call_operand.vmem [shape: f32[1,32], index: 2, kind: input, shape index: {}]   ;;  %s1757_s3 = inlined_call_operand.hbm [shape: f32[2,8,8,32], index: 3, kind: output, shape index: {}]  }
   0x1   :  { %10 = vsyncpa [#allocation3 + $0x1], 0  ;;  %s1404_s12 = smov 0   ;;  %s1406_s13 = smov 0  }
   0x2   :  { %s1408_s14 = smov 0   ;;  %s1410_s15 = smov 0  }
   0x3   :  { %s1412_s16 = smov 0   ;;  %s1414_s17 = smov 0  }
   0x4 LB: > { %s1073_s18 = sadd.s32 4294967295, %s1376_s17   ;;  %s1074_s19 = sadd.s32 4294967294, %s1376_s17   ;;  %s1376_s17 = sphi %s1414_s17, %s16_s17   ;;  %s1372_s16 = sphi %s1412_s16, %s1766_s16   ;;  %s1368_s15 = sphi %s1410_s15, %s1765_s15   ;;  %s1364_s14 = sphi %s1408_s14, %s1764_s14   ;;  %s1360_s13 = sphi %s1406_s13, %s1763_s13   ;;  %s1356_s12 = sphi %s1404_s12, %s1762_s12  }
   0x5   : > { %s35_s20 = sadd.s32 1, %s1372_s16  ;;  %s124_s21 = sadd.s32 1, %s1364_s14 }
   0x6   : > { %p37_p0 = scmp.ge.s32.totalorder %s35_s20, 2  ;;  %p134_p1 = scmp.ne.s32.totalorder %s1364_s14, %s1360_s13 }
   0x7   : > { %p135_p2 = scmp.eq.s32.totalorder %s1073_s18, 1  ;;  %p140_p3 = scmp.ne.s32.totalorder %s1360_s13, %s1356_s12 }
   0x8   : > { %s1768_s20 = smov (%p37_p0, %s35_s20), 0  ;;  %p141_p5 = scmp.eq.s32.totalorder %s1074_s19, 1 }
   0x9   : > { %p1444_p4 = por %p135_p2, %p134_p1  ;;  %s117_s23 = ssub.s32 %s1372_s16, %s1768_s20 }
   0xa   : > { %p1079_p6 = scmp.ge.s32.totalorder %s1376_s17, 1  ;;  %p122_p7 = scmp.eq.s32.totalorder %s117_s23, 0 }
   0xb   : > { %p1451_p8 = por %p141_p5, %p140_p3  ;;  %p180_p9 = scmp.lt.s32.totalorder %s1376_s17, 3 }
   0xc   : > { %s1457_s25 = scalar_select %p122_p7, %s1364_s14, %s124_s21  }
   0xd   : > { %p181_p10 = pnand %p1079_p6, %p180_p9 }
   0xe   : > { %p211_p11 = scmp.lt.s32.totalorder (!%p181_p10), %s1368_s15, 1  ;;  %s1378_s4 = smov (!%p181_p10), 12  }
   0xf   : > { %184 = sbr.rel (%p181_p10) target bundleno = 373 (0x175), region = 32  ;;  %s1379_s5 = smov (!%p181_p10), 24  }
  0x10   : > { %s1380_s6 = smov (!%p181_p10), 8   ;;  %s1381_s7 = smov (!%p181_p10), 32  }
  0x11   : > { %s1382_s8 = smov (!%p181_p10), 20   ;;  %s1318_s21 = scalar_lea.hbm (!%p181_p10), %s1757_s3, 128 }
  0x14   : > { %s212_s26 = scalar_select %p211_p11, %s1368_s15, 1  ;;  %vm245_vm0 = vsmask.f32 3328  ;;  %vm246_vm1 = vsmask.f32 7440  ;;  %vm851_vm3 = vcmask 1041408  }
  0x15   : > { %vm1492_vm2 = vmor %vm245_vm0, %vm246_vm1  ;;  %v1192_v36 = vld [vmem:[%s1755_s1 + $0x8] sm:$0xff]  ;;  %vm763_vm4 = vcmask 64512   ;;  %vm772_vm5 = vcmask 97280   ;;  %vm781_vm6 = vcmask 130048   ;;  %vm786_vm7 = vcmask 162816  }
  0x16   : > { %s1203_s27 = smul.u32 144, %s212_s26  ;;  %vm795_vm8 = vcmask 195584   ;;  %vm804_vm9 = vcmask 228352   ;;  %vm809_vm10 = vcmask 261120   ;;  %vm842_vm11 = vcmask 293888  }
  0x18   : > { %s1464_s30 = scalar_lea.vmem %s1754_s0, %s1203_s27  ;;  %s208_s27 = sand.u32 1, %s1360_s13  }
  0x19   : > { %v1140_v0 = vld [vmem:[%s1464_s30 + $0x48] sm:$0xf]  ;;  %v1185_v1 = vld [vmem:[%s1464_s30 + $0x54] sm:$0xf0]  ;;  %v1156_v2 = vld [vmem:[%s1464_s30 + $0x50] sm:$0xf] }
  0x1a   : > { %v1141_v3 = vor.u32 %v1185_v1, %v1140_v0  ;;  %v1189_v4 = vld [vmem:[%s1464_s30 + $0x5c] sm:$0xf0]  ;;  %v1144_v5 = vld [vmem:[%s1464_s30 + $0x68] sm:$0xf]  ;;  %v1186_v6 = vld [vmem:[%s1464_s30 + $0x74] sm:$0xf0] }
  0x1b   : > { %v1157_v7 = vor.u32 %v1189_v4, %v1156_v2  ;;  %v233_v8 = vld [vmem:[%s1464_s30 + $0x40] sm:$0xf]  ;;  %v234_v9 = vld [vmem:[%s1464_s30 + $0x50] sm:$0xf]  ;;  %v241_v10 = vld [vmem:[%s1464_s30 + $0x44] sm:$0x1]  ;;  %v1145_v25 = vor.u32 %v1186_v6, %v1144_v5 }
  0x1c   : > { %687 = vrot.lane.b32.xlu1 %v1141_v3, %s1378_s4  ;;  %v242_v11 = vld [vmem:[%s1464_s30 + $0x54] sm:$0x1]  ;;  %v305_v12 = vshrl.u32 %v233_v8, 16  ;;  %v308_v13 = vshll.u32 %v233_v8, 16  ;;  %v314_v14 = vshll.u32 %v241_v10, 16  ;;  %v319_v15 = vshrl.u32 %v234_v9, 16 }
  0x1d   : > { %735 = vrot.lane.b32.xlu0 %v1157_v7, %s1379_s5  ;;  %v322_v16 = vshll.u32 %v234_v9, 16  ;;  %v328_v17 = vshll.u32 %v242_v11, 16  ;;  %v1479_v18 = vld [vmem:[%s1464_s30 + $0x70] sm:$0xf]  ;;  %v1482_v19 = vld [vmem:[%s1464_s30 + $0x7c] sm:$0xf0] }
  0x1e   : > { %v307_v20 = vrot.slane %v305_v12, 4  ;;  %v310_v21 = vrot.slane %v308_v13, 5  ;;  %v316_v22 = vrot.slane %v314_v14, 5  ;;  %v321_v23 = vrot.slane %v319_v15, 4  ;;  %v235_v24 = vld [vmem:[%s1464_s30 + $0x60] sm:$0xf] }
  0x1f   : > { %v324_v26 = vrot.slane %v322_v16, 5  ;;  %v330_v27 = vrot.slane %v328_v17, 5  ;;  %v1161_v28 = vor.u32 %v1482_v19, %v1479_v18  ;;  %v236_v29 = vld [vmem:[%s1464_s30 + $0x70] sm:$0xf]  ;;  %v243_v30 = vld [vmem:[%s1464_s30 + $0x64] sm:$0x1] }
  0x20   : > { %v311_v31 = vor.u32 %v310_v21, %v307_v20  ;;  %v244_v32 = vld [vmem:[%s1464_s30 + $0x74] sm:$0x1]  ;;  %v333_v33 = vshrl.u32 %v235_v24, 16  ;;  %v336_v34 = vshll.u32 %v235_v24, 16  ;;  %v342_v35 = vshll.u32 %v243_v30, 16  ;;  %s1080_s28 = sshll.u32 %s208_s27, 6 }
  0x21   : > { %v325_v37 = vor.u32 %v324_v26, %v321_v23  ;;  %v347_v38 = vshrl.u32 %v236_v29, 16  ;;  %v350_v39 = vshll.u32 %v236_v29, 16  ;;  %v356_v40 = vshll.u32 %v244_v32, 16  ;;  %v1102_v41 = vld [vmem:[%s1464_s30 + $0x50] sm:$0xf]  ;;  %s1692_s29 = scalar_lea.vmem [#allocation2], %s1080_s28 }
  0x22   : > { %v312_v42 = vrot.slane %v311_v31, 4  ;;  %v335_v43 = vrot.slane %v333_v33, 4  ;;  %v338_v44 = vrot.slane %v336_v34, 5  ;;  %v344_v45 = vrot.slane %v342_v35, 5  ;;  %v1110_v50 = vld [vmem:[%s1464_s30 + $0x54] sm:$0x1] }
  0x23   : > { %v326_v46 = vrot.slane %v325_v37, 4  ;;  %v349_v47 = vrot.slane %v347_v38, 4  ;;  %v352_v48 = vrot.slane %v350_v39, 5  ;;  %v358_v49 = vrot.slane %v356_v40, 5  ;;  %v1103_v53 = vld [vmem:[%s1464_s30 + $0x60] sm:$0xf] }
  0x24   : > { %689 = vrot.lane.b32.xlu1 %v1145_v25, %s1378_s4  ;;  %v317_v51 = vsel %vm1492_vm2, %v312_v42, %v316_v22  ;;  %v339_v52 = vor.u32 %v338_v44, %v335_v43  ;;  %v568_v54 = vshrl.u32 %v1102_v41, 16  ;;  %v571_v55 = vshll.u32 %v1102_v41, 16  ;;  %v1111_v59 = vld [vmem:[%s1464_s30 + $0x64] sm:$0x1]  ;;  %v1086_v5 = vld [vmem:[%s1464_s30 + $0x48] sm:$0xf] }
  0x25   : > { %v331_v56 = vsel %vm1492_vm2, %v326_v46, %v330_v27  ;;  %v647_v57 = vunpack.c.l.b16 %v317_v51  ;;  %v353_v58 = vor.u32 %v352_v48, %v349_v47  ;;  %v577_v60 = vshll.u32 %v1110_v50, 16  ;;  %v1087_v10 = vld [vmem:[%s1464_s30 + $0x58] sm:$0xf]  ;;  %v1094_v11 = vld [vmem:[%s1464_s30 + $0x4c] sm:$0x1] }
  0x26   : > { %v648_v61 = vunpack.c.l.b16 %v331_v56  ;;  %v340_v62 = vrot.slane %v339_v52, 4  ;;  %v570_v63 = vrot.slane %v568_v54, 4  ;;  %v573_v0 = vrot.slane %v571_v55, 5  ;;  %v1095_v21 = vld [vmem:[%s1464_s30 + $0x5c] sm:$0x1] }
  0x27   : > { %v354_v1 = vrot.slane %v353_v58, 4  ;;  %v579_v2 = vrot.slane %v577_v60, 5  ;;  %v582_v3 = vshrl.u32 %v1103_v53, 16  ;;  %v585_v4 = vshll.u32 %v1103_v53, 16  ;;  %v231_v27 = vld [vmem:[%s1464_s30 + $0x20] sm:$0xf] }
  0x28   : > { %v653_v6 = vpack.c.b16 %v648_v61, %v647_v57  ;;  %v345_v7 = vsel %vm1492_vm2, %v340_v62, %v344_v45  ;;  %v574_v8 = vor.u32 %v573_v0, %v570_v63  ;;  %v591_v9 = vshll.u32 %v1111_v59, 16  ;;  %v239_v33 = vld [vmem:[%s1464_s30 + $0x24] sm:$0x1]  ;;  %v232_v42 = vld [vmem:[%s1464_s30 + $0x30] sm:$0xf] }
  0x29   : > { %v359_v12 = vsel %vm1492_vm2, %v354_v1, %v358_v49  ;;  %v649_v13 = vunpack.c.l.b16 %v345_v7  ;;  %v584_v14 = vrot.slane %v582_v3, 4  ;;  %v587_v15 = vrot.slane %v585_v4, 5  ;;  %v240_v43 = vld [vmem:[%s1464_s30 + $0x34] sm:$0x1]  ;;  %v1527_v50 = vld [vmem:[%s1464_s30 + $0x28] sm:$0xf] }
  0x2a   : > { %659 = vrot.lane.b32.xlu0 %v653_v6, %s1380_s6  ;;  %v650_v16 = vunpack.c.l.b16 %v359_v12  ;;  %v575_v17 = vrot.slane %v574_v8, 4  ;;  %v593_v20 = vrot.slane %v591_v9, 5  ;;  %v436_v22 = vshrl.u32 %v1086_v5, 16  ;;  %v1184_v51 = vld [vmem:[%s1464_s30 + $0x34] sm:$0xf0] }
  0x2b   : > { %v588_v23 = vor.u32 %v587_v15, %v584_v14  ;;  %v439_v24 = vshll.u32 %v1086_v5, 16  ;;  %v445_v25 = vshll.u32 %v1094_v11, 16  ;;  %v450_v26 = vshrl.u32 %v1087_v10, 16  ;;  %v1088_v60 = vld [vmem:[%s1464_s30 + $0x68] sm:$0xf] }
  0x2c   : > { %737 = vrot.lane.b32.xlu1 %v1161_v28, %s1379_s5  ;;  %v654_v29 = vpack.c.b16 %v650_v16, %v649_v13  ;;  %v580_v30 = vsel %vm1492_vm2, %v575_v17, %v579_v2  ;;  %v438_v31 = vrot.slane %v436_v22, 4  ;;  %v453_v32 = vshll.u32 %v1087_v10, 16  ;;  %v1089_v1 = vld [vmem:[%s1464_s30 + $0x78] sm:$0xf]  ;;  %v1096_v2 = vld [vmem:[%s1464_s30 + $0x6c] sm:$0x1] }
  0x2d   : > { %v589_v34 = vrot.slane %v588_v23, 4  ;;  %v743_v35 = vunpack.c.l.b16 %v580_v30  ;;  %v441_v37 = vrot.slane %v439_v24, 5  ;;  %v447_v38 = vrot.slane %v445_v25, 5  ;;  %v1097_v7 = vld [vmem:[%s1464_s30 + $0x7c] sm:$0x1] }
  0x2e   : > { %v452_v39 = vrot.slane %v450_v26, 4  ;;  %v455_v40 = vrot.slane %v453_v32, 5  ;;  %v459_v41 = vshll.u32 %v1095_v21, 16  ;;  %v277_v18 = vshrl.u32 %v231_v27, 16  ;;  %v1542_v8 = vld [vmem:[%s1464_s30 + $0x8] sm:$0xf] }
  0x2f   : > { %v594_v19 = vsel %vm1492_vm2, %v589_v34, %v593_v20  ;;  %v442_v28 = vor.u32 %v441_v37, %v438_v31  ;;  %v280_v44 = vshll.u32 %v231_v27, 16  ;;  %v286_v45 = vshll.u32 %v239_v33, 16  ;;  %v1545_v13 = vld [vmem:[%s1464_s30 + $0x14] sm:$0xf0]  ;;  %v1548_v20 = vld [vmem:[%s1464_s30 + $0x10] sm:$0xf] }
  0x30   : > { %v744_v46 = vunpack.c.l.b16 %v594_v19  ;;  %v456_v47 = vor.u32 %v455_v40, %v452_v39  ;;  %v461_v48 = vrot.slane %v459_v41, 5  ;;  %v279_v49 = vrot.slane %v277_v18, 4  ;;  %v1553_v25 = vld [vmem:[%s1464_s30 + $0x1c] sm:$0xf0]  ;;  %v230_v37 = vld [vmem:[%s1464_s30 + $0x10] sm:$0xf] }
  0x31   : > { %v443_v52 = vrot.slane %v442_v28, 4  ;;  %v282_v53 = vrot.slane %v280_v44, 5  ;;  %v288_v54 = vrot.slane %v286_v45, 5  ;;  %v291_v55 = vshrl.u32 %v232_v42, 16  ;;  %v229_v26 = vld [vmem:[%s1464_s30] sm:$0xf] }
  0x32   : > { %661 = vrot.lane.b32.xlu0 %v654_v29, %s1380_s6  ;;  %v749_v56 = vpack.c.b16 %v744_v46, %v743_v35  ;;  %v457_v57 = vrot.slane %v456_v47, 4  ;;  %v294_v58 = vshll.u32 %v232_v42, 16  ;;  %v300_v59 = vshll.u32 %v240_v43, 16  ;;  %v238_v44 = vld [vmem:[%s1464_s30 + $0x14] sm:$0x1] }
  0x33   : > { %v448_v61 = vsel %vm1492_vm2, %v443_v52, %v447_v38  ;;  %v283_v62 = vor.u32 %v282_v53, %v279_v49  ;;  %v293_v63 = vrot.slane %v291_v55, 4  ;;  %v1137_v0 = vor.u32 %v1184_v51, %v1527_v50  ;;  %v237_v38 = vld [vmem:[%s1464_s30 + $0x4] sm:$0x1]  ;;  %v1084_v49 = vld [vmem:[%s1464_s30 + $0x28] sm:$0xf] }
  0x34   : > { %755 = vrot.lane.b32.xlu1 %v749_v56, %s1381_s7  ;;  %v462_v3 = vsel %vm1492_vm2, %v457_v57, %v461_v48  ;;  %v695_v4 = vunpack.c.l.b16 %v448_v61  ;;  %v296_v5 = vrot.slane %v294_v58, 5  ;;  %v302_v6 = vrot.slane %v300_v59, 5  ;;  %v1085_v59 = vld [vmem:[%s1464_s30 + $0x38] sm:$0xf] }
  0x35   : > { %v696_v9 = vunpack.c.l.b16 %v462_v3  ;;  %v284_v10 = vrot.slane %v283_v62, 4  ;;  %v464_v11 = vshrl.u32 %v1088_v60, 16  ;;  %v467_v12 = vshll.u32 %v1088_v60, 16 }
  0x36   : > { %v297_v14 = vor.u32 %v296_v5, %v293_v63  ;;  %v473_v15 = vshll.u32 %v1096_v2, 16  ;;  %v478_v16 = vshrl.u32 %v1089_v1, 16  ;;  %v481_v17 = vshll.u32 %v1089_v1, 16  ;;  %v1093_v2 = vld [vmem:[%s1464_s30 + $0x3c] sm:$0x1] }
  0x37   : > { %v701_v21 = vpack.c.b16 %v696_v9, %v695_v4  ;;  %v289_v22 = vsel %vm1492_vm2, %v284_v10, %v288_v54  ;;  %v466_v23 = vrot.slane %v464_v11, 4  ;;  %v469_v24 = vrot.slane %v467_v12, 5  ;;  %v1092_v54 = vld [vmem:[%s1464_s30 + $0x2c] sm:$0x1]  ;;  %v1100_v10 = vld [vmem:[%s1464_s30 + $0x30] sm:$0xf] }
  0x38   : > { %v298_v27 = vrot.slane %v297_v14, 4  ;;  %v645_v29 = vunpack.c.l.b16 %v289_v22  ;;  %v475_v30 = vrot.slane %v473_v15, 5  ;;  %v480_v31 = vrot.slane %v478_v16, 4  ;;  %v1101_v16 = vld [vmem:[%s1464_s30 + $0x40] sm:$0xf] }
  0x39   : > { %707 = vrot.lane.b32.xlu2 %v701_v21, %s1382_s8  ;;  %v470_v32 = vor.u32 %v469_v24, %v466_v23  ;;  %v483_v33 = vrot.slane %v481_v17, 5  ;;  %v487_v34 = vshll.u32 %v1097_v7, 16  ;;  %v1133_v35 = vor.u32 %v1545_v13, %v1542_v8  ;;  %v1108_v17 = vld [vmem:[%s1464_s30 + $0x34] sm:$0x1] }
  0x3a   : > { %v303_v39 = vsel %vm1492_vm2, %v298_v27, %v302_v6  ;;  %v1149_v40 = vor.u32 %v1553_v25, %v1548_v20  ;;  %v249_v41 = vshrl.u32 %v229_v26, 16  ;;  %v252_v42 = vshll.u32 %v229_v26, 16 }
  0x3b   : > { %v646_v18 = vunpack.c.l.b16 %v303_v39  ;;  %v471_v19 = vrot.slane %v470_v32, 4  ;;  %v484_v28 = vor.u32 %v483_v33, %v480_v31  ;;  %v489_v43 = vrot.slane %v487_v34, 5  ;;  %v1109_v31 = vld [vmem:[%s1464_s30 + $0x44] sm:$0x1] }
  0x3c   : > { %685 = vrot.lane.b32.xlu1 %v1137_v0, %s1378_s4  ;;  %v251_v45 = vrot.slane %v249_v41, 4  ;;  %v254_v46 = vrot.slane %v252_v42, 5  ;;  %v258_v47 = vshll.u32 %v237_v38, 16  ;;  %v263_v48 = vshrl.u32 %v230_v37, 16  ;;  %v1104_v41 = vld [vmem:[%s1464_s30 + $0x70] sm:$0xf] }
  0x3d   : > { %v652_v50 = vpack.c.b16 %v646_v18, %v645_v29  ;;  %v476_v51 = vsel %vm1492_vm2, %v471_v19, %v475_v30  ;;  %v485_v52 = vrot.slane %v484_v28, 4  ;;  %v266_v53 = vshll.u32 %v230_v37, 16  ;;  %v1112_v28 = vld [vmem:[%s1464_s30 + $0x74] sm:$0x1] }
  0x3e   : > { %v697_v55 = vunpack.c.l.b16 %v476_v51  ;;  %v255_v56 = vor.u32 %v254_v46, %v251_v45  ;;  %v260_v57 = vrot.slane %v258_v47, 5  ;;  %v265_v58 = vrot.slane %v263_v48, 4  ;;  %v1105_v47 = vld [vmem:[%s1464_s30 + $0x80] sm:$0xf] }
  0x3f   : > { %657 = vrot.lane.b32.xlu0 %v652_v50, %s1380_s6  ;;  %v490_v60 = vsel %vm1492_vm2, %v485_v52, %v489_v43  ;;  %v268_v61 = vrot.slane %v266_v53, 5  ;;  %v272_v62 = vshll.u32 %v238_v44, 16  ;;  %v408_v63 = vshrl.u32 %v1084_v49, 16 }
  0x40   : > { %v698_v0 = vunpack.c.l.b16 %v490_v60  ;;  %v256_v1 = vrot.slane %v255_v56, 4  ;;  %v411_v3 = vshll.u32 %v1084_v49, 16  ;;  %v417_v4 = vshll.u32 %v1092_v54, 16 }
  0x41   : > { %v269_v5 = vor.u32 %v268_v61, %v265_v58  ;;  %v274_v6 = vrot.slane %v272_v62, 5  ;;  %v410_v7 = vrot.slane %v408_v63, 4  ;;  %v422_v9 = vshrl.u32 %v1085_v59, 16  ;;  %v1098_v62 = vld [vmem:[%s1464_s30 + $0x10] sm:$0xf] }
  0x42   : > { %v702_v11 = vpack.c.b16 %v698_v0, %v697_v55  ;;  %v261_v12 = vsel %vm1492_vm2, %v256_v1, %v260_v57  ;;  %v413_v14 = vrot.slane %v411_v3, 5  ;;  %v419_v15 = vrot.slane %v417_v4, 5  ;;  %v1099_v63 = vld [vmem:[%s1464_s30 + $0x20] sm:$0xf]  ;;  %v1106_v4 = vld [vmem:[%s1464_s30 + $0x14] sm:$0x1] }
  0x43   : > { %v270_v20 = vrot.slane %v269_v5, 4  ;;  %v643_v21 = vunpack.c.l.b16 %v261_v12  ;;  %v424_v22 = vrot.slane %v422_v9, 4  ;;  %v425_v23 = vshll.u32 %v1085_v59, 16 }
  0x44   : > { %709 = vrot.lane.b32.xlu2 %v702_v11, %s1382_s8  ;;  %731 = vrot.lane.b32.xlu1 %v1149_v40, %s1379_s5  ;;  %v414_v24 = vor.u32 %v413_v14, %v410_v7  ;;  %v431_v25 = vshll.u32 %v1093_v2, 16  ;;  %v540_v26 = vshrl.u32 %v1100_v10, 16  ;;  %v543_v27 = vshll.u32 %v1100_v10, 16 }
  0x45   : > { %v275_v29 = vsel %vm1492_vm2, %v270_v20, %v274_v6  ;;  %v427_v30 = vrot.slane %v425_v23, 5  ;;  %v549_v32 = vshll.u32 %v1108_v17, 16  ;;  %v554_v33 = vshrl.u32 %v1101_v16, 16  ;;  %v1107_v17 = vld [vmem:[%s1464_s30 + $0x24] sm:$0x1] }
  0x46   : > { %v644_v34 = vunpack.c.l.b16 %v275_v29  ;;  %v415_v37 = vrot.slane %v414_v24, 4  ;;  %v433_v38 = vrot.slane %v431_v25, 5  ;;  %v542_v39 = vrot.slane %v540_v26, 4  ;;  %v1082_v26 = vld [vmem:[%s1464_s30 + $0x8] sm:$0xf] }
  0x47   : > { %683 = vrot.lane.b32.xlu0 %v1133_v35, %s1378_s4  ;;  %v428_v40 = vor.u32 %v427_v30, %v424_v22  ;;  %v545_v42 = vrot.slane %v543_v27, 5  ;;  %v551_v18 = vrot.slane %v549_v32, 5  ;;  %v556_v19 = vrot.slane %v554_v33, 4  ;;  %v1113_v35 = vld [vmem:[%s1464_s30 + $0x84] sm:$0x1] }
  0x48   : > { %v651_v43 = vpack.c.b16 %v644_v34, %v643_v21  ;;  %v420_v44 = vsel %vm1492_vm2, %v415_v37, %v419_v15  ;;  %v557_v45 = vshll.u32 %v1101_v16, 16  ;;  %v563_v46 = vshll.u32 %v1109_v31, 16  ;;  %v1083_v27 = vld [vmem:[%s1464_s30 + $0x18] sm:$0xf]  ;;  %v1090_v33 = vld [vmem:[%s1464_s30 + $0xc] sm:$0x1] }
  0x49   : > { %v429_v48 = vrot.slane %v428_v40, 4  ;;  %v693_v49 = vunpack.c.l.b16 %v420_v44  ;;  %v546_v50 = vor.u32 %v545_v42, %v542_v39  ;;  %v596_v51 = vshrl.u32 %v1104_v41, 16 }
  0x4a   : > { %v559_v8 = vrot.slane %v557_v45, 5  ;;  %v565_v13 = vrot.slane %v563_v46, 5  ;;  %v599_v52 = vshll.u32 %v1104_v41, 16  ;;  %v605_v53 = vshll.u32 %v1112_v28, 16 }
  0x4b   : > { %v434_v54 = vsel %vm1492_vm2, %v429_v48, %v433_v38  ;;  %v547_v55 = vrot.slane %v546_v50, 4  ;;  %v598_v56 = vrot.slane %v596_v51, 4  ;;  %v610_v57 = vshrl.u32 %v1105_v47, 16  ;;  %v1091_v48 = vld [vmem:[%s1464_s30 + $0x1c] sm:$0x1] }
  0x4c   : > { %655 = vrot.lane.b32.xlu2 %v651_v43, %s1380_s6  ;;  %v694_v58 = vunpack.c.l.b16 %v434_v54  ;;  %v560_v59 = vor.u32 %v559_v8, %v556_v19  ;;  %v601_v60 = vrot.slane %v599_v52, 5  ;;  %v607_v61 = vrot.slane %v605_v53, 5 }
  0x4d   : > { %v552_v0 = vsel %vm1492_vm2, %v547_v55, %v551_v18  ;;  %v612_v1 = vrot.slane %v610_v57, 4  ;;  %v613_v2 = vshll.u32 %v1105_v47, 16  ;;  %v619_v3 = vshll.u32 %v1113_v35, 16 }
  0x4e   : > { %v700_v5 = vpack.c.b16 %v694_v58, %v693_v49  ;;  %v561_v6 = vrot.slane %v560_v59, 4  ;;  %v741_v7 = vunpack.c.l.b16 %v552_v0  ;;  %v602_v9 = vor.u32 %v601_v60, %v598_v56 }
  0x4f   : > { %v615_v10 = vrot.slane %v613_v2, 5  ;;  %v621_v11 = vrot.slane %v619_v3, 5  ;;  %v512_v12 = vshrl.u32 %v1098_v62, 16  ;;  %v515_v14 = vshll.u32 %v1098_v62, 16 }
  0x50   : > { %705 = vrot.lane.b32.xlu0 %v700_v5, %s1382_s8  ;;  %v566_v15 = vsel %vm1492_vm2, %v561_v6, %v565_v13  ;;  %v603_v16 = vrot.slane %v602_v9, 4  ;;  %v521_v20 = vshll.u32 %v1106_v4, 16  ;;  %v526_v21 = vshrl.u32 %v1099_v63, 16  ;;  %v1152_v6 = vld [vmem:[%s1464_s30 + $0x30] sm:$0xf] }
  0x51   : > { %v742_v22 = vunpack.c.l.b16 %v566_v15  ;;  %v616_v23 = vor.u32 %v615_v10, %v612_v1  ;;  %v514_v24 = vrot.slane %v512_v12, 4  ;;  %v517_v25 = vrot.slane %v515_v14, 5  ;;  %v822_v10 = vld [vmem:[%s1755_s1 + $0x10] sm:$0x3]  ;;  %v1191_v15 = vld [vmem:[%s1755_s1] sm:$0xff] }
  0x52   : > { %v608_v29 = vsel %vm1492_vm2, %v603_v16, %v607_v61  ;;  %v523_v30 = vrot.slane %v521_v20, 5  ;;  %v528_v31 = vrot.slane %v526_v21, 4  ;;  %v529_v32 = vshll.u32 %v1099_v63, 16 }
  0x53   : > { %v748_v34 = vpack.c.b16 %v742_v22, %v741_v7  ;;  %v617_v37 = vrot.slane %v616_v23, 4  ;;  %v745_v38 = vunpack.c.l.b16 %v608_v29  ;;  %v518_v39 = vor.u32 %v517_v25, %v514_v24  ;;  %v1188_v7 = vld [vmem:[%s1464_s30 + $0x3c] sm:$0xf0]  ;;  %v1181_v23 = vld [vmem:[%s1464_s30 + $0x4c] sm:$0xf0] }
  0x54   : > { %v531_v41 = vrot.slane %v529_v32, 5  ;;  %v535_v40 = vshll.u32 %v1107_v17, 16  ;;  %v380_v42 = vshrl.u32 %v1082_v26, 16  ;;  %v383_v18 = vshll.u32 %v1082_v26, 16  ;;  %v1124_v22 = vld [vmem:[%s1464_s30 + $0x40] sm:$0xf] }
  0x55   : > { %753 = vrot.lane.b32.xlu1 %v748_v34, %s1381_s7  ;;  %v622_v19 = vsel %vm1492_vm2, %v617_v37, %v621_v11  ;;  %v519_v28 = vrot.slane %v518_v39, 4  ;;  %v389_v43 = vshll.u32 %v1090_v33, 16  ;;  %v394_v44 = vshrl.u32 %v1083_v27, 16 }
  0x56   : > { %v746_v45 = vunpack.c.l.b16 %v622_v19  ;;  %v532_v46 = vor.u32 %v531_v41, %v528_v31  ;;  %v537_v47 = vrot.slane %v535_v40, 5  ;;  %v382_v49 = vrot.slane %v380_v42, 4  ;;  %v1182_v31 = vld [vmem:[%s1464_s30 + $0x6c] sm:$0xf0] }
  0x57   : > { %v524_v50 = vsel %vm1492_vm2, %v519_v28, %v523_v30  ;;  %v385_v51 = vrot.slane %v383_v18, 5  ;;  %v396_v35 = vrot.slane %v394_v44, 4  ;;  %v397_v52 = vshll.u32 %v1083_v27, 16  ;;  %v1128_v30 = vld [vmem:[%s1464_s30 + $0x60] sm:$0xf] }
  0x58   : > { %v750_v8 = vpack.c.b16 %v746_v45, %v745_v38  ;;  %v533_v13 = vrot.slane %v532_v46, 4  ;;  %v739_v53 = vunpack.c.l.b16 %v524_v50  ;;  %v391_v55 = vrot.slane %v389_v43, 5 }
  0x59   : > { %v386_v54 = vor.u32 %v385_v51, %v382_v49  ;;  %v403_v56 = vshll.u32 %v1091_v48, 16  ;;  %v399_v58 = vrot.slane %v397_v52, 5  ;;  %v1153_v9 = vor.u32 %v1188_v7, %v1152_v6  ;;  %v1120_v51 = vld [vmem:[%s1464_s30 + $0x20] sm:$0xf] }
  0x5a   : > { %757 = vrot.lane.b32.xlu2 %v750_v8, %s1381_s7  ;;  %v538_v57 = vsel %vm1492_vm2, %v533_v13, %v537_v47  ;;  %v836_v11 = vunpack.c.l.b16 %v822_v10  ;;  %v1125_v24 = vor.u32 %v1181_v23, %v1124_v22  ;;  %v1129_v37 = vor.u32 %v1182_v31, %v1128_v30  ;;  %v1180_v8 = vld [vmem:[%s1464_s30 + $0x2c] sm:$0xf0] }
  0x5b   : > { %v740_v59 = vunpack.c.l.b16 %v538_v57  ;;  %v387_v60 = vrot.slane %v386_v54, 4  ;;  %v400_v61 = vor.u32 %v399_v58, %v396_v35  ;;  %v405_v62 = vrot.slane %v403_v56, 5  ;;  %v1179_v54 = vld [vmem:[%s1464_s30 + $0xc] sm:$0xf0] }
  0x5c   : > { %v839_v12 = vpack.c.b16 %v836_v11, %v836_v11  ;;  %v1121_v35 = vor.u32 %v1180_v8, %v1120_v51 }
  0x5d   : > { %v747_v63 = vpack.c.b16 %v740_v59, %v739_v53  ;;  %v392_v0 = vsel %vm1492_vm2, %v387_v60, %v391_v55  ;;  %v401_v1 = vrot.slane %v400_v61, 4  ;;  %v1116_v53 = vld [vmem:[%s1464_s30] sm:$0xf]  ;;  %s1193_s30 = sshll.u32 %s1368_s15, 6  ;;  %s941_s15 = scalar_lea.sflag [#allocation3], %s208_s27 }
  0x5e   : > { %v691_v2 = vunpack.c.l.b16 %v392_v0  ;;  %v853_v14 = vsel %vm851_vm3, %v839_v12, 0  ;;  %v1117_v58 = vor.u32 %v1179_v54, %v1116_v53  ;;  %v1683_v12 = vld [vmem:[%s1756_s2] ss:$0 sm:$0xff] }
  0x5f   : > { %751 = vrot.lane.b32.xlu0 %v747_v63, %s1381_s7  ;;  %v406_v3 = vsel %vm1492_vm2, %v401_v1, %v405_v62  ;;  %1195 = vmatpush.bf16.msra.mxu2 %v853_v14  ;;  %s955_s7 = scalar_lea.hbm %s1757_s3, %s1193_s30 }
  0x60   : > { %v692_v4 = vunpack.c.l.b16 %v406_v3  ;;  %1196 = vmatpush.bf16.msra.mxu3 %v853_v14  ;;  %1194 = vmatpush.bf16.msra.mxu1 %v853_v14  ;;  %s958_s9 = sshll.u32 %s955_s7, 4  ;;  %s959_s9 = int_to_ptr.hbm [resolvable:$true] %s958_s9 }
  0x61   : > { %860 = vmatpush.bf16.msra.mxu0 %v853_v14  ;;  %s1312_s10 = sshra.s32 %s959_s9, 4  ;;  %s1313_s10 = int_to_ptr.hbm [resolvable:$true] %s1312_s10 }
  0x62   : > { %v699_v5 = vpack.c.b16 %v692_v4, %v691_v2  ;;  %s1314_s11 = scalar_lea.hbm %s1313_s10, 64  ;;  %p1319_p1 = scmp.lt.s32.totalorder %s1313_s10, %s1757_s3 }
  0x63   : > { %1198 = vmatpush.bf16.msra.mxu2 %v1192_v36  ;;  %p1315_p12 = scmp.ne.s32.totalorder %s1313_s10, %s1314_s11  ;;  %p1320_p2 = scmp.lt.s32.totalorder %s1318_s21, %s1314_s11 }
  0x64   : > { %703 = vrot.lane.b32.xlu2 %v699_v5, %s1382_s8  ;;  %1199 = vmatpush.bf16.msra.mxu3 %v1192_v36  ;;  %s956_s8 = sshll.u32 %s1692_s29, 4  ;;  %s957_s8 = int_to_ptr.vmem [resolvable:$true] %s956_s8 }
  0x65   : > { %1197 = vmatpush.bf16.msra.mxu1 %v1192_v36  ;;  %861 = vmatpush.bf16.msra.mxu0 %v1192_v36  ;;  %p1316_p13 = pnand %p1315_p12, %p1444_p4  ;;  %p1321_p3 = por %p1320_p2, %p1319_p1 }
  0x67   : > { %1201 = vmatpush.bf16.msra.mxu2 %v1191_v15  ;;  %p1317_p0 = pneg %p1316_p13 }
  0x68   : > { %1202 = vmatpush.bf16.msra.mxu3 %v1191_v15 }
  0x69   : > { %1200 = vmatpush.bf16.msra.mxu1 %v1191_v15  ;;  %862 = vmatpush.bf16.msra.mxu0 %v1191_v15  ;;  %p1322_p5 = pnand %p1321_p3, %p1317_p0 }
  0x6c   : > { %733 = vrot.lane.b32.xlu2 %v1153_v9, %s1379_s5 }
  0x8e   : > { %v688_v16 = vpop.permute.xlu1 %687 }
  0x8f   : > { %v736_v17 = vpop.permute.xlu0 %735 }
  0x93   : > { %v708_v20 = vpop.permute.xlu2 %707 }
  0x96   : > { %v690_v21 = vpop.permute.xlu1 %689 }
  0x9c   : > { %v660_v25 = vpop.permute.xlu0 %659 }
  0x9d   : > { %v769_v26 = vsel %vm763_vm4, %v1125_v24, %v660_v25 }
  0x9e   : > { %v778_v27 = vsel %vm772_vm5, %v769_v26, %v688_v16  ;;  %v738_v29 = vpop.permute.xlu1 %737  ;;  %v710_v33 = vpop.permute.xlu2 %709 }
  0x9f   : > { %v784_v32 = vsel %vm781_vm6, %v778_v27, %v688_v16 }
  0xa0   : > { %v792_v34 = vsel %vm786_vm7, %v784_v32, %v708_v20 }
  0xa1   : > { %v801_v38 = vsel %vm795_vm8, %v792_v34, %v736_v17 }
  0xa2   : > { %v807_v18 = vsel %vm804_vm9, %v801_v38, %v736_v17 }
  0xa4   : > { %v662_v39 = vpop.permute.xlu0 %661 }
  0xa5   : > { %v771_v41 = vsel %vm763_vm4, %v1129_v37, %v662_v39 }
  0xa6   : > { %v780_v40 = vsel %vm772_vm5, %v771_v41, %v690_v21  ;;  %v756_v42 = vpop.permute.xlu1 %755  ;;  %v656_v43 = vpop.permute.xlu2 %655 }
  0xa7   : > { %v815_v19 = vsel %vm809_vm10, %v807_v18, %v756_v42  ;;  %v785_v28 = vsel %vm781_vm6, %v780_v40, %v690_v21  ;;  %v765_v62 = vsel %vm763_vm4, %v1117_v58, %v656_v43 }
  0xa8   : > { %1172 = vmatmul.msk.bf16.vlgmr.msra.gmra.mxu2 %vm842_vm11, %v815_v19  ;;  %v794_v44 = vsel %vm786_vm7, %v785_v28, %v710_v33 }
  0xa9   : > { %v803_v45 = vsel %vm795_vm8, %v794_v44, %v738_v29 }
  0xaa   : > { %v808_v47 = vsel %vm804_vm9, %v803_v45, %v738_v29 }
  0xae   : > { %v686_v48 = vpop.permute.xlu1 %685 }
  0xb1   : > { %v658_v46 = vpop.permute.xlu0 %657 }
  0xb2   : > { %v767_v56 = vsel %vm763_vm4, %v1121_v35, %v658_v46 }
  0xb3   : > { %v776_v57 = vsel %vm772_vm5, %v767_v56, %v686_v48 }
  0xb4   : > { %v758_v49 = vpop.permute.xlu2 %757  ;;  %v783_v60 = vsel %vm781_vm6, %v776_v57, %v686_v48 }
  0xb5   : > { %v817_v50 = vsel %vm809_vm10, %v808_v47, %v758_v49 }
  0xb6   : > { %1173 = vmatmul.msk.bf16.vlgmr.msra.gmra.mxu3 %vm842_vm11, %v817_v50  ;;  %v732_v52 = vpop.permute.xlu1 %731 }
  0xb9   : > { %v684_v13 = vpop.permute.xlu0 %683 }
  0xba   : > { %v774_v63 = vsel %vm772_vm5, %v765_v62, %v684_v13 }
  0xbb   : > { %v782_v4 = vsel %vm781_vm6, %v774_v63, %v684_v13 }
  0xbe   : > { %v704_v55 = vpop.permute.xlu2 %703 }
  0xbf   : > { %v788_v6 = vsel %vm786_vm7, %v782_v4, %v704_v55 }
  0xc0   : > { %v797_v7 = vsel %vm795_vm8, %v788_v6, %v732_v52 }
  0xc1   : > { %v805_v9 = vsel %vm804_vm9, %v797_v7, %v732_v52 }
  0xc2   : > { %v706_v59 = vpop.permute.xlu0 %705 }
  0xc3   : > { %v790_v61 = vsel %vm786_vm7, %v783_v60, %v706_v59 }
  0xc6   : > { %v734_v0 = vpop.permute.xlu2 %733 }
  0xc7   : > { %v754_v1 = vpop.permute.xlu1 %753  ;;  %v799_v2 = vsel %vm795_vm8, %v790_v61, %v734_v0 }
  0xc8   : > { %v806_v3 = vsel %vm804_vm9, %v799_v2, %v734_v0 }
  0xc9   : > { %v813_v5 = vsel %vm809_vm10, %v806_v3, %v754_v1 }
  0xca   : > { %1171 = vmatmul.msk.bf16.vlgmr.msra.gmra.mxu1 %vm842_vm11, %v813_v5 }
  0xd1   : > { %v752_v10 = vpop.permute.xlu0 %751 }
  0xd2   : > { %v811_v11 = vsel %vm809_vm10, %v805_v9, %v752_v10 }
  0xd3   : > { %1170 = vmatmul.msk.bf16.vlgmr.msra.gmra.mxu0 %vm842_vm11, %v811_v11 }
 0x12b   : > { %v874_v14 = vpop.f32.mrf.mxu2 }
 0x12c   : > { %v875_v36 = vadd.f32 %v1683_v12, %v874_v14 }
 0x12e   : > { %v888_v15 = vsub.f32 0.0, %v875_v36 }
 0x130   : > { %v900_v16 = vmul.f32 1.442695, %v888_v15 }
 0x132   : > { %1266 = vpow2.f32 %v900_v16 }
 0x133   : > { %v876_v17 = vpop.f32.mrf.mxu2 }
 0x134   : > { %v877_v20 = vadd.f32 %v1683_v12, %v876_v17 }
 0x136   : > { %v889_v21 = vsub.f32 0.0, %v877_v20 }
 0x138   : > { %v1267_v22 = vpop.eup %1266  ;;  %v902_v23 = vmul.f32 1.442695, %v889_v21 }
 0x139   : > { %v912_v24 = vadd.f32 1.0, %v1267_v22  ;;  %v879_v25 = vpop.f32.mrf.mxu3 }
 0x13a   : > { %v880_v26 = vadd.f32 %v1683_v12, %v879_v25  ;;  %1268 = vpow2.f32 %v902_v23 }
 0x13b   : > { %1270 = vrcp.f32 %v912_v24 }
 0x13c   : > { %v890_v27 = vsub.f32 0.0, %v880_v26 }
 0x13e   : > { %v904_v29 = vmul.f32 1.442695, %v890_v27 }
 0x140   : > { %v1269_v30 = vpop.eup %1268  ;;  %1272 = vpow2.f32 %v904_v29 }
 0x141   : > { %v1271_v31 = vpop.eup %1270  ;;  %v913_v32 = vadd.f32 1.0, %v1269_v30  ;;  %v881_v33 = vpop.f32.mrf.mxu3 }
 0x142   : > { %v928_v34 = vmul.f32 %v1271_v31, %v875_v36  ;;  %v882_v37 = vadd.f32 %v1683_v12, %v881_v33 }
 0x143   : > { %1274 = vrcp.f32 %v913_v32 }
 0x144   : > { %936 = vst.msk [vmem:[%s1692_s29 + $0x20] sm:$0xff] %vm809_vm10, %v928_v34  ;;  %v891_v38 = vsub.f32 0.0, %v882_v37 }
 0x146   : > { %v1273_v39 = vpop.eup %1272  ;;  %v906_v41 = vmul.f32 1.442695, %v891_v38 }
 0x147   : > { %v914_v40 = vadd.f32 1.0, %v1273_v39  ;;  %v869_v42 = vpop.f32.mrf.mxu1 }
 0x148   : > { %1276 = vpow2.f32 %v906_v41  ;;  %v870_v19 = vadd.f32 %v1683_v12, %v869_v42 }
 0x149   : > { %v1275_v18 = vpop.eup %1274  ;;  %1278 = vrcp.f32 %v914_v40 }
 0x14a   : > { %v929_v28 = vmul.f32 %v1275_v18, %v877_v20  ;;  %v886_v43 = vsub.f32 0.0, %v870_v19 }
 0x14c   : > { %937 = vst.msk [vmem:[%s1692_s29 + $0x28] sm:$0xff] %vm809_vm10, %v929_v28  ;;  %v896_v44 = vmul.f32 1.442695, %v886_v43 }
 0x14e   : > { %v1277_v45 = vpop.eup %1276  ;;  %1280 = vpow2.f32 %v896_v44 }
 0x14f   : > { %v1279_v46 = vpop.eup %1278  ;;  %v915_v47 = vadd.f32 1.0, %v1277_v45  ;;  %v871_v50 = vpop.f32.mrf.mxu1 }
 0x150   : > { %v930_v48 = vmul.f32 %v1279_v46, %v880_v26  ;;  %v864_v49 = vpop.f32.mrf.mxu0  ;;  %v872_v8 = vadd.f32 %v1683_v12, %v871_v50 }
 0x151   : > { %1282 = vrcp.f32 %v915_v47  ;;  %v865_v51 = vadd.f32 %v1683_v12, %v864_v49 }
 0x152   : > { %938 = vst.msk [vmem:[%s1692_s29 + $0x30] sm:$0xff] %vm809_vm10, %v930_v48  ;;  %v887_v35 = vsub.f32 0.0, %v872_v8 }
 0x153   : > { %v884_v13 = vsub.f32 0.0, %v865_v51 }
 0x154   : > { %v1281_v52 = vpop.eup %1280  ;;  %v898_v54 = vmul.f32 1.442695, %v887_v35 }
 0x155   : > { %v892_v53 = vmul.f32 1.442695, %v884_v13  ;;  %v910_v55 = vadd.f32 1.0, %v1281_v52 }
 0x157   : > { %v1283_v56 = vpop.eup %1282  ;;  %1284 = vpow2.f32 %v892_v53 }
 0x158   : > { %v931_v57 = vmul.f32 %v1283_v56, %v882_v37  ;;  %1286 = vrcp.f32 %v910_v55  ;;  %v866_v58 = vpop.f32.mrf.mxu0 }
 0x159   : > { %1288 = vpow2.f32 %v898_v54  ;;  %v867_v59 = vadd.f32 %v1683_v12, %v866_v58 }
 0x15a   : > { %939 = vst.msk [vmem:[%s1692_s29 + $0x38] sm:$0xff] %vm809_vm10, %v931_v57 }
 0x15b   : > { %v885_v60 = vsub.f32 0.0, %v867_v59 }
 0x15d   : > { %v1285_v61 = vpop.eup %1284  ;;  %v894_v62 = vmul.f32 1.442695, %v885_v60 }
 0x15e   : > { %v1287_v63 = vpop.eup %1286  ;;  %v908_v0 = vadd.f32 1.0, %v1285_v61 }
 0x15f   : > { %v1289_v1 = vpop.eup %1288  ;;  %v926_v2 = vmul.f32 %v1287_v63, %v870_v19  ;;  %1290 = vpow2.f32 %v894_v62 }
 0x160   : > { %1292 = vrcp.f32 %v908_v0  ;;  %v911_v3 = vadd.f32 1.0, %v1289_v1 }
 0x161   : > { %934 = vst.msk [vmem:[%s1692_s29 + $0x10] sm:$0xff] %vm809_vm10, %v926_v2 }
 0x162   : > { %1294 = vrcp.f32 %v911_v3 }
 0x165   : > { %v1291_v4 = vpop.eup %1290 }
 0x166   : > { %v1293_v5 = vpop.eup %1292  ;;  %v909_v6 = vadd.f32 1.0, %v1291_v4 }
 0x167   : > { %v924_v7 = vmul.f32 %v1293_v5, %v865_v51 }
 0x168   : > { %v1295_v9 = vpop.eup %1294  ;;  %1296 = vrcp.f32 %v909_v6 }
 0x169   : > { %932 = vst.msk [vmem:[%s1692_s29] sm:$0xff] %vm809_vm10, %v924_v7  ;;  %v927_v10 = vmul.f32 %v1295_v9, %v872_v8 }
 0x16b   : > { %935 = vst.msk [vmem:[%s1692_s29 + $0x18] sm:$0xff] %vm809_vm10, %v927_v10 }
 0x16e   : > { %v1297_v11 = vpop.eup %1296 }
 0x16f   : > { %v925_v12 = vmul.f32 %v1297_v11, %v867_v59 }
 0x171   : > { %933 = vst.msk [vmem:[%s1692_s29 + $0x8] sm:$0xff] %vm809_vm10, %v925_v12 }
 0x172   : > { %1325 = shalt.err (!%p1322_p5)
}
 0x173   : > { %s1383_s27 = smov 128  }
 0x174   : > { %1204 = dma.vmem_to_hbm [thread:$0]  (%p1444_p4), %s957_s8, 1024, %s959_s9, %s941_s15, %s1383_s27, %s1383_s27, %s1380_s6  }
 0x175 PF: > { %p1210_p6 = scmp.ge.s32.totalorder %s1376_s17, 2  ;;  %s973_s28 = sand.u32 1, %s1356_s12  }
 0x176   : > { %s974_s29 = scalar_lea.sflag [#allocation3], %s973_s28 }
 0x177   : > { %p1207_p7 = pnand %p1210_p6, %p1451_p8 }
 0x179   : > { %p1208_p9 = pneg %p1207_p7 }
 0x17b   : > { %1351 = dma.done.wait (%p1208_p9), %s974_s29, 1024  }
 0x17c   : > { %1353 = vsyncadd (%p1208_p9), %s974_s29, 4294966272  ;;  %s16_s17 = sadd.s32 1, %s1376_s17   ;;  %s1762_s12 = smov %s1360_s13 }
 0x17d   : > { %p13_p10 = scmp.ge.s32.totalorder %s16_s17, 4   ;;  %s1763_s13 = smov %s1364_s14 }
 0x17e   : > { %s1764_s14 = smov %s1457_s25  ;;  %s1765_s15 = smov %s1372_s16 }
 0x17f   : > { %s1766_s16 = smov %s1768_s20  ;;  %15 = sbr.rel (!%p13_p10) target bundleno = 4 (0x4), region = 76 }
 0x184   :  { %980 = vsyncpa [#allocation3], 1 }
 0x185   :  { %982 = vsyncpa [#allocation3 + $0x1], 1 }

// kernel: run.3
= control target key start
LH: loop header
LB: loop body
LE: loop exit
PB: predicated region body
PF: predicated region fallthrough
CT: control target
= control target key end

     0   :  { %s4290_s12 = smov 0   ;;  %s4292_s13 = smov 0   ;;  %s6189_s0 = inlined_call_operand.vmem [shape: bf16[2,18,1,18,4], index: 0, kind: input, shape index: {}]   ;;  %s6190_s1 = inlined_call_operand.vmem [shape: bf16[36,32], index: 1, kind: input, shape index: {}]   ;;  %s6191_s2 = inlined_call_operand.vmem [shape: f32[1,32], index: 2, kind: input, shape index: {}]   ;;  %s6192_s3 = inlined_call_operand.vmem [shape: f32[2,16,16,32], index: 3, kind: output, shape index: {}]  }
   0x1   :  { %s4294_s14 = smov 0  }
   0x2 LB: > { %s32_s15 = sadd.s32 1, %s4256_s13  ;;  %p3618_p0 = scmp.ge.s32.totalorder %s4260_s14, 1  ;;  %s4260_s14 = sphi %s4294_s14, %s13_s14   ;;  %s4256_s13 = sphi %s4292_s13, %s6198_s13   ;;  %s4252_s12 = sphi %s4290_s12, %s6197_s12  }
   0x3   : > { %p34_p1 = scmp.ge.s32.totalorder %s32_s15, 2  ;;  %p177_p2 = scmp.lt.s32.totalorder %s4260_s14, 3 }
   0x5   : > { %s6200_s15 = smov (%p34_p1, %s32_s15), 0  ;;  %p178_p3 = pnand %p3618_p0, %p177_p2 }
   0x6   : > { %p216_p4 = scmp.lt.s32.totalorder (!%p178_p3), %s4252_s12, 1  ;;  %s4262_s20 = smov (!%p178_p3), 4  }
   0x7   : > { %181 = sbr.rel (%p178_p3) target bundleno = 677 (0x2a5), region = 32  ;;  %s4263_s21 = smov (!%p178_p3), 8  }
   0x8   : > { %s4264_s22 = smov (!%p178_p3), 12   ;;  %s4265_s23 = smov (!%p178_p3), 16  }
   0x9   : > { %s4266_s24 = smov (!%p178_p3), 20   ;;  %s4267_s25 = smov (!%p178_p3), 28  }
   0xa   : > { %s4268_s26 = smov (!%p178_p3), 24   ;;  %s4269_s27 = smov (!%p178_p3), 32  }
   0xc   : > { %s6202_s12 = smov (!%p216_p4, %s4252_s12), 1  ;;  %vm295_vm0 = vsmask.f32 3328  ;;  %vm296_vm1 = vsmask.f32 7440  ;;  %vm746_vm3 = vcmask 1042432  }
   0xd   : > { %s4076_s16 = smul.u32 216, %s6202_s12  ;;  %vm4342_vm2 = vmor %vm295_vm0, %vm296_vm1  ;;  %vm747_vm4 = vcmask 1046532   ;;  %vm2821_vm6 = vcmask 31744   ;;  %vm2870_vm7 = vcmask 64512   ;;  %vm2903_vm8 = vcmask 97280   ;;  %s4016_s9 = sshll.u32 %s6202_s12, 8 }
   0xe   : > { %vm4544_vm5 = vmor %vm746_vm3, %vm747_vm4  ;;  %vm3158_vm9 = vcmask 1041408   ;;  %vm2936_vm10 = vcmask 130048   ;;  %vm2969_vm11 = vcmask 162816   ;;  %vm3002_vm12 = vcmask 195584  }
   0xf   : > { %s4314_s19 = scalar_lea.vmem %s6189_s0, %s4076_s16  ;;  %vm3035_vm13 = vcmask 228352   ;;  %vm3068_vm14 = vcmask 261120   ;;  %vm3125_vm15 = vcmask 293888   ;;  %s6054_s16 = scalar_lea.vmem %s6192_s3, %s4016_s9 }
  0x10   : > { %v255_v0 = vld [vmem:[%s4314_s19 + $0x30] sm:$0xf]  ;;  %v4318_v1 = vld [vmem:[%s4314_s19 + $0x34] sm:$0xf]  ;;  %v4321_v2 = vld [vmem:[%s4314_s19 + $0x38] sm:$0x1] }
  0x11   : > { %v395_v3 = vshrl.u32 %v255_v0, 16  ;;  %v398_v4 = vshll.u32 %v255_v0, 16  ;;  %v404_v5 = vshll.u32 %v4318_v1, 16  ;;  %v408_v6 = vshrl.u32 %v4318_v1, 16  ;;  %v251_v7 = vld [vmem:[%s4314_s19 + $0x18] sm:$0xf] }
  0x12   : > { %v414_v8 = vshll.u32 %v4321_v2, 16  ;;  %v4328_v9 = vld [vmem:[%s4314_s19 + $0x1c] sm:$0xf]  ;;  %v4331_v10 = vld [vmem:[%s4314_s19 + $0x20] sm:$0x1]  ;;  %v347_v11 = vshrl.u32 %v251_v7, 16 }
  0x13   : > { %v397_v12 = vrot.slane %v395_v3, 4  ;;  %v400_v13 = vrot.slane %v398_v4, 5  ;;  %v406_v14 = vrot.slane %v404_v5, 5  ;;  %v410_v15 = vrot.slane %v408_v6, 4  ;;  %v247_v16 = vld [vmem:[%s4314_s19] sm:$0xf] }
  0x14   : > { %v416_v17 = vrot.slane %v414_v8, 5  ;;  %v349_v18 = vrot.slane %v347_v11, 4  ;;  %v350_v19 = vshll.u32 %v251_v7, 16  ;;  %v356_v20 = vshll.u32 %v4328_v9, 16  ;;  %v4338_v25 = vld [vmem:[%s4314_s19 + $0x4] sm:$0xf] }
  0x15   : > { %v401_v21 = vor.u32 %v400_v13, %v397_v12  ;;  %v411_v22 = vor.u32 %v410_v15, %v406_v14  ;;  %v360_v23 = vshrl.u32 %v4328_v9, 16  ;;  %v366_v24 = vshll.u32 %v4331_v10, 16  ;;  %v4347_v36 = vld [vmem:[%s4314_s19 + $0x8] sm:$0x1]  ;;  %v257_v44 = vld [vmem:[%s4314_s19 + $0x3c] sm:$0xf] }
  0x16   : > { %v352_v27 = vrot.slane %v350_v19, 5  ;;  %v358_v28 = vrot.slane %v356_v20, 5  ;;  %v299_v29 = vshrl.u32 %v247_v16, 16  ;;  %v302_v30 = vshll.u32 %v247_v16, 16  ;;  %v4360_v56 = vld [vmem:[%s4314_s19 + $0x40] sm:$0xf] }
  0x17   : > { %v402_v31 = vrot.slane %v401_v21, 4  ;;  %v412_v32 = vrot.slane %v411_v22, 4  ;;  %v362_v33 = vrot.slane %v360_v23, 4  ;;  %v368_v34 = vrot.slane %v366_v24, 5  ;;  %v4365_v62 = vld [vmem:[%s4314_s19 + $0x44] sm:$0x1] }
  0x18   : > { %v353_v35 = vor.u32 %v352_v27, %v349_v18  ;;  %v301_v37 = vrot.slane %v299_v29, 4  ;;  %v304_v38 = vrot.slane %v302_v30, 5  ;;  %v308_v39 = vshll.u32 %v4338_v25, 16  ;;  %v253_v63 = vld [vmem:[%s4314_s19 + $0x24] sm:$0xf] }
  0x19   : > { %v407_v40 = vsel %vm4342_vm2, %v402_v31, %v406_v14  ;;  %v417_v41 = vsel %vm4342_vm2, %v412_v32, %v416_v17  ;;  %v363_v42 = vor.u32 %v362_v33, %v358_v28  ;;  %v312_v43 = vshrl.u32 %v4338_v25, 16  ;;  %v4374_v12 = vld [vmem:[%s4314_s19 + $0x28] sm:$0xf]  ;;  %v4378_v16 = vld [vmem:[%s4314_s19 + $0x2c] sm:$0x1] }
  0x1a   : > { %v2157_v45 = vunpack.c.l.b16 %v407_v40  ;;  %v2158_v46 = vunpack.c.l.b16 %v417_v41  ;;  %v354_v47 = vrot.slane %v353_v35, 4  ;;  %v305_v48 = vor.u32 %v304_v38, %v301_v37  ;;  %v249_v22 = vld [vmem:[%s4314_s19 + $0xc] sm:$0xf]  ;;  %v4388_v37 = vld [vmem:[%s4314_s19 + $0x10] sm:$0xf] }
  0x1b   : > { %v364_v49 = vrot.slane %v363_v42, 4  ;;  %v310_v50 = vrot.slane %v308_v39, 5  ;;  %v314_v51 = vrot.slane %v312_v43, 4  ;;  %v318_v52 = vshll.u32 %v4347_v36, 16  ;;  %v4391_v43 = vld [vmem:[%s4314_s19 + $0x14] sm:$0x1] }
  0x1c   : > { %v2185_v53 = vpack.c.b16 %v2158_v46, %v2157_v45  ;;  %v359_v54 = vsel %vm4342_vm2, %v354_v47, %v358_v28  ;;  %v306_v55 = vrot.slane %v305_v48, 4  ;;  %v419_v57 = vshrl.u32 %v257_v44, 16  ;;  %v263_v48 = vld [vmem:[%s4314_s19 + $0x60] sm:$0xf] }
  0x1d   : > { %v369_v58 = vsel %vm4342_vm2, %v364_v49, %v368_v34  ;;  %v2153_v59 = vunpack.c.l.b16 %v359_v54  ;;  %v315_v60 = vor.u32 %v314_v51, %v310_v50  ;;  %v320_v61 = vrot.slane %v318_v52, 5 }
  0x1e   : > { %2205 = vrot.lane.b32.xlu2 %v2185_v53, %s4262_s20  ;;  %v2154_v0 = vunpack.c.l.b16 %v369_v58  ;;  %v311_v3 = vsel %vm4342_vm2, %v306_v55, %v310_v50  ;;  %v421_v4 = vrot.slane %v419_v57, 4  ;;  %v422_v5 = vshll.u32 %v257_v44, 16 }
  0x1f   : > { %v316_v6 = vrot.slane %v315_v60, 4  ;;  %v2149_v7 = vunpack.c.l.b16 %v311_v3  ;;  %v428_v8 = vshll.u32 %v4360_v56, 16  ;;  %v432_v11 = vshrl.u32 %v4360_v56, 16 }
  0x20   : > { %v2183_v13 = vpack.c.b16 %v2154_v0, %v2153_v59  ;;  %v424_v14 = vrot.slane %v422_v5, 5  ;;  %v438_v15 = vshll.u32 %v4365_v62, 16  ;;  %v371_v17 = vshrl.u32 %v253_v63, 16 }
  0x21   : > { %v321_v18 = vsel %vm4342_vm2, %v316_v6, %v320_v61  ;;  %v430_v19 = vrot.slane %v428_v8, 5  ;;  %v434_v20 = vrot.slane %v432_v11, 4  ;;  %v374_v21 = vshll.u32 %v253_v63, 16  ;;  %v4405_v61 = vld [vmem:[%s4314_s19 + $0x64] sm:$0xf] }
  0x22   : > { %2201 = vrot.lane.b32.xlu1 %v2183_v13, %s4262_s20  ;;  %v2150_v23 = vunpack.c.l.b16 %v321_v18  ;;  %v425_v24 = vor.u32 %v424_v14, %v421_v4  ;;  %v440_v27 = vrot.slane %v438_v15, 5  ;;  %v373_v28 = vrot.slane %v371_v17, 4  ;;  %v4408_v6 = vld [vmem:[%s4314_s19 + $0x68] sm:$0x1] }
  0x23   : > { %v435_v29 = vor.u32 %v434_v20, %v430_v19  ;;  %v376_v30 = vrot.slane %v374_v21, 5  ;;  %v380_v31 = vshll.u32 %v4374_v12, 16  ;;  %v384_v32 = vshrl.u32 %v4374_v12, 16 }
  0x24   : > { %v2181_v33 = vpack.c.b16 %v2150_v23, %v2149_v7  ;;  %v426_v34 = vrot.slane %v425_v24, 4  ;;  %v390_v35 = vshll.u32 %v4378_v16, 16  ;;  %v323_v38 = vshrl.u32 %v249_v22, 16  ;;  %v261_v7 = vld [vmem:[%s4314_s19 + $0x54] sm:$0xf] }
  0x25   : > { %v436_v39 = vrot.slane %v435_v29, 4  ;;  %v377_v40 = vor.u32 %v376_v30, %v373_v28  ;;  %v382_v41 = vrot.slane %v380_v31, 5  ;;  %v386_v42 = vrot.slane %v384_v32, 4  ;;  %v4418_v23 = vld [vmem:[%s4314_s19 + $0x58] sm:$0xf] }
  0x26   : > { %2197 = vrot.lane.b32.xlu0 %v2181_v33, %s4262_s20  ;;  %v431_v44 = vsel %vm4342_vm2, %v426_v34, %v430_v19  ;;  %v392_v45 = vrot.slane %v390_v35, 5  ;;  %v325_v46 = vrot.slane %v323_v38, 4  ;;  %v326_v47 = vshll.u32 %v249_v22, 16  ;;  %v4423_v31 = vld [vmem:[%s4314_s19 + $0x5c] sm:$0x1] }
  0x27   : > { %v441_v49 = vsel %vm4342_vm2, %v436_v39, %v440_v27  ;;  %v2159_v50 = vunpack.c.l.b16 %v431_v44  ;;  %v378_v51 = vrot.slane %v377_v40, 4  ;;  %v387_v52 = vor.u32 %v386_v42, %v382_v41  ;;  %v259_v42 = vld [vmem:[%s4314_s19 + $0x48] sm:$0xf] }
  0x28   : > { %v2160_v53 = vunpack.c.l.b16 %v441_v49  ;;  %v328_v54 = vrot.slane %v326_v47, 5  ;;  %v332_v55 = vshll.u32 %v4388_v37, 16  ;;  %v336_v57 = vshrl.u32 %v4388_v37, 16 }
  0x29   : > { %v383_v58 = vsel %vm4342_vm2, %v378_v51, %v382_v41  ;;  %v388_v59 = vrot.slane %v387_v52, 4  ;;  %v342_v60 = vshll.u32 %v4391_v43, 16  ;;  %v491_v63 = vshrl.u32 %v263_v48, 16 }
  0x2a   : > { %v2186_v0 = vpack.c.b16 %v2160_v53, %v2159_v50  ;;  %v2155_v3 = vunpack.c.l.b16 %v383_v58  ;;  %v329_v4 = vor.u32 %v328_v54, %v325_v46  ;;  %v334_v5 = vrot.slane %v332_v55, 5  ;;  %v4433_v55 = vld [vmem:[%s4314_s19 + $0x4c] sm:$0xf] }
  0x2b   : > { %v393_v8 = vsel %vm4342_vm2, %v388_v59, %v392_v45  ;;  %v338_v11 = vrot.slane %v336_v57, 4  ;;  %v344_v13 = vrot.slane %v342_v60, 5  ;;  %v493_v14 = vrot.slane %v491_v63, 4  ;;  %v4438_v63 = vld [vmem:[%s4314_s19 + $0x50] sm:$0x1] }
  0x2c   : > { %2207 = vrot.lane.b32.xlu2 %v2186_v0, %s4262_s20  ;;  %v2156_v15 = vunpack.c.l.b16 %v393_v8  ;;  %v330_v17 = vrot.slane %v329_v4, 4  ;;  %v494_v18 = vshll.u32 %v263_v48, 16  ;;  %v500_v19 = vshll.u32 %v4405_v61, 16 }
  0x2d   : > { %v339_v20 = vor.u32 %v338_v11, %v334_v5  ;;  %v504_v21 = vshrl.u32 %v4405_v61, 16  ;;  %v510_v22 = vshll.u32 %v4408_v6, 16  ;;  %v467_v24 = vshrl.u32 %v261_v7, 16 }
  0x2e   : > { %v2184_v27 = vpack.c.b16 %v2156_v15, %v2155_v3  ;;  %v335_v28 = vsel %vm4342_vm2, %v330_v17, %v334_v5  ;;  %v496_v29 = vrot.slane %v494_v18, 5  ;;  %v502_v30 = vrot.slane %v500_v19, 5  ;;  %v269_v3 = vld [vmem:[%s4314_s19 + $0x84] sm:$0xf] }
  0x2f   : > { %v340_v32 = vrot.slane %v339_v20, 4  ;;  %v2151_v33 = vunpack.c.l.b16 %v335_v28  ;;  %v506_v34 = vrot.slane %v504_v21, 4  ;;  %v512_v35 = vrot.slane %v510_v22, 5  ;;  %v4450_v28 = vld [vmem:[%s4314_s19 + $0x88] sm:$0xf] }
  0x30   : > { %2203 = vrot.lane.b32.xlu1 %v2184_v27, %s4262_s20  ;;  %v497_v38 = vor.u32 %v496_v29, %v493_v14  ;;  %v469_v39 = vrot.slane %v467_v24, 4  ;;  %v470_v40 = vshll.u32 %v261_v7, 16  ;;  %v476_v41 = vshll.u32 %v4418_v23, 16  ;;  %v4453_v29 = vld [vmem:[%s4314_s19 + $0x8c] sm:$0x1] }
  0x31   : > { %v345_v44 = vsel %vm4342_vm2, %v340_v32, %v344_v13  ;;  %v507_v45 = vor.u32 %v506_v34, %v502_v30  ;;  %v480_v46 = vshrl.u32 %v4418_v23, 16  ;;  %v486_v47 = vshll.u32 %v4423_v31, 16 }
  0x32   : > { %v2152_v48 = vunpack.c.l.b16 %v345_v44  ;;  %v498_v49 = vrot.slane %v497_v38, 4  ;;  %v472_v50 = vrot.slane %v470_v40, 5  ;;  %v478_v51 = vrot.slane %v476_v41, 5 }
  0x33   : > { %v508_v52 = vrot.slane %v507_v45, 4  ;;  %v482_v53 = vrot.slane %v480_v46, 4  ;;  %v488_v54 = vrot.slane %v486_v47, 5  ;;  %v443_v57 = vshrl.u32 %v259_v42, 16 }
  0x34   : > { %v2182_v58 = vpack.c.b16 %v2152_v48, %v2151_v33  ;;  %v503_v59 = vsel %vm4342_vm2, %v498_v49, %v502_v30  ;;  %v473_v60 = vor.u32 %v472_v50, %v469_v39  ;;  %v446_v0 = vshll.u32 %v259_v42, 16  ;;  %v4465_v50 = vld [vmem:[%s4314_s19 + $0x7c] sm:$0xf] }
  0x35   : > { %v513_v4 = vsel %vm4342_vm2, %v508_v52, %v512_v35  ;;  %v2165_v5 = vunpack.c.l.b16 %v503_v59  ;;  %v483_v7 = vor.u32 %v482_v53, %v478_v51  ;;  %v445_v8 = vrot.slane %v443_v57, 4  ;;  %v267_v35 = vld [vmem:[%s4314_s19 + $0x78] sm:$0xf] }
  0x36   : > { %2199 = vrot.lane.b32.xlu0 %v2182_v58, %s4262_s20  ;;  %v2166_v11 = vunpack.c.l.b16 %v513_v4  ;;  %v474_v13 = vrot.slane %v473_v60, 4  ;;  %v448_v14 = vrot.slane %v446_v0, 5  ;;  %v452_v15 = vshll.u32 %v4433_v55, 16  ;;  %v4468_v58 = vld [vmem:[%s4314_s19 + $0x80] sm:$0x1] }
  0x37   : > { %v484_v17 = vrot.slane %v483_v7, 4  ;;  %v456_v18 = vshrl.u32 %v4433_v55, 16  ;;  %v462_v19 = vshll.u32 %v4438_v63, 16  ;;  %v563_v20 = vshrl.u32 %v269_v3, 16  ;;  %v265_v4 = vld [vmem:[%s4314_s19 + $0x6c] sm:$0xf] }
  0x38   : > { %v2189_v21 = vpack.c.b16 %v2166_v11, %v2165_v5  ;;  %v479_v22 = vsel %vm4342_vm2, %v474_v13, %v478_v51  ;;  %v449_v24 = vor.u32 %v448_v14, %v445_v8  ;;  %v454_v27 = vrot.slane %v452_v15, 5 }
  0x39   : > { %v489_v30 = vsel %vm4342_vm2, %v484_v17, %v488_v54  ;;  %v2163_v32 = vunpack.c.l.b16 %v479_v22  ;;  %v458_v33 = vrot.slane %v456_v18, 4  ;;  %v464_v34 = vrot.slane %v462_v19, 5 }
  0x3a   : > { %2213 = vrot.lane.b32.xlu2 %v2189_v21, %s4262_s20  ;;  %v2164_v38 = vunpack.c.l.b16 %v489_v30  ;;  %v450_v39 = vrot.slane %v449_v24, 4  ;;  %v565_v40 = vrot.slane %v563_v20, 4  ;;  %v566_v41 = vshll.u32 %v269_v3, 16  ;;  %v4478_v21 = vld [vmem:[%s4314_s19 + $0x70] sm:$0xf] }
  0x3b   : > { %v459_v42 = vor.u32 %v458_v33, %v454_v27  ;;  %v572_v44 = vshll.u32 %v4450_v28, 16  ;;  %v576_v45 = vshrl.u32 %v4450_v28, 16  ;;  %v582_v46 = vshll.u32 %v4453_v29, 16  ;;  %v4483_v33 = vld [vmem:[%s4314_s19 + $0x74] sm:$0x1] }
  0x3c   : > { %v2188_v47 = vpack.c.b16 %v2164_v38, %v2163_v32  ;;  %v455_v48 = vsel %vm4342_vm2, %v450_v39, %v454_v27  ;;  %v568_v49 = vrot.slane %v566_v41, 5  ;;  %v539_v51 = vshrl.u32 %v267_v35, 16 }
  0x3d   : > { %v460_v52 = vrot.slane %v459_v42, 4  ;;  %v2161_v53 = vunpack.c.l.b16 %v455_v48  ;;  %v574_v54 = vrot.slane %v572_v44, 5  ;;  %v578_v57 = vrot.slane %v576_v45, 4 }
  0x3e   : > { %2211 = vrot.lane.b32.xlu1 %v2188_v47, %s4262_s20  ;;  %v569_v59 = vor.u32 %v568_v49, %v565_v40  ;;  %v584_v60 = vrot.slane %v582_v46, 5  ;;  %v541_v0 = vrot.slane %v539_v51, 4  ;;  %v542_v3 = vshll.u32 %v267_v35, 16 }
  0x3f   : > { %v465_v5 = vsel %vm4342_vm2, %v460_v52, %v464_v34  ;;  %v579_v7 = vor.u32 %v578_v57, %v574_v54  ;;  %v548_v8 = vshll.u32 %v4465_v50, 16  ;;  %v552_v11 = vshrl.u32 %v4465_v50, 16  ;;  %v275_v34 = vld [vmem:[%s4314_s19 + $0xa8] sm:$0xf]  ;;  %v4495_v57 = vld [vmem:[%s4314_s19 + $0xac] sm:$0xf] }
  0x40   : > { %v2162_v13 = vunpack.c.l.b16 %v465_v5  ;;  %v570_v14 = vrot.slane %v569_v59, 4  ;;  %v544_v15 = vrot.slane %v542_v3, 5  ;;  %v558_v17 = vshll.u32 %v4468_v58, 16  ;;  %v4498_v59 = vld [vmem:[%s4314_s19 + $0xb0] sm:$0x1] }
  0x41   : > { %v580_v18 = vrot.slane %v579_v7, 4  ;;  %v550_v19 = vrot.slane %v548_v8, 5  ;;  %v554_v20 = vrot.slane %v552_v11, 4  ;;  %v515_v22 = vshrl.u32 %v265_v4, 16  ;;  %v273_v5 = vld [vmem:[%s4314_s19 + $0x9c] sm:$0xf] }
  0x42   : > { %v2187_v24 = vpack.c.b16 %v2162_v13, %v2161_v53  ;;  %v575_v27 = vsel %vm4342_vm2, %v570_v14, %v574_v54  ;;  %v545_v30 = vor.u32 %v544_v15, %v541_v0  ;;  %v560_v32 = vrot.slane %v558_v17, 5 }
  0x43   : > { %v585_v35 = vsel %vm4342_vm2, %v580_v18, %v584_v60  ;;  %v2171_v38 = vunpack.c.l.b16 %v575_v27  ;;  %v555_v39 = vor.u32 %v554_v20, %v550_v19  ;;  %v517_v40 = vrot.slane %v515_v22, 4 }
  0x44   : > { %2209 = vrot.lane.b32.xlu0 %v2187_v24, %s4262_s20  ;;  %v2172_v41 = vunpack.c.l.b16 %v585_v35  ;;  %v546_v42 = vrot.slane %v545_v30, 4  ;;  %v518_v44 = vshll.u32 %v265_v4, 16  ;;  %v524_v45 = vshll.u32 %v4478_v21, 16  ;;  %v4508_v24 = vld [vmem:[%s4314_s19 + $0xa0] sm:$0xf] }
  0x45   : > { %v556_v46 = vrot.slane %v555_v39, 4  ;;  %v528_v47 = vshrl.u32 %v4478_v21, 16  ;;  %v534_v48 = vshll.u32 %v4483_v33, 16  ;;  %v635_v49 = vshrl.u32 %v275_v34, 16 }
  0x46   : > { %v2192_v51 = vpack.c.b16 %v2172_v41, %v2171_v38  ;;  %v551_v52 = vsel %vm4342_vm2, %v546_v42, %v550_v19  ;;  %v520_v53 = vrot.slane %v518_v44, 5  ;;  %v526_v54 = vrot.slane %v524_v45, 5  ;;  %v271_v44 = vld [vmem:[%s4314_s19 + $0x90] sm:$0xf] }
  0x47   : > { %v561_v60 = vsel %vm4342_vm2, %v556_v46, %v560_v32  ;;  %v2169_v0 = vunpack.c.l.b16 %v551_v52  ;;  %v530_v3 = vrot.slane %v528_v47, 4  ;;  %v536_v4 = vrot.slane %v534_v48, 5 }
  0x48   : > { %2219 = vrot.lane.b32.xlu2 %v2192_v51, %s4262_s20  ;;  %v2170_v7 = vunpack.c.l.b16 %v561_v60  ;;  %v521_v8 = vor.u32 %v520_v53, %v517_v40  ;;  %v637_v11 = vrot.slane %v635_v49, 4  ;;  %v638_v13 = vshll.u32 %v275_v34, 16  ;;  %v4514_v40 = vld [vmem:[%s4314_s19 + $0xa4] sm:$0x1] }
  0x49   : > { %v531_v14 = vor.u32 %v530_v3, %v526_v54  ;;  %v644_v15 = vshll.u32 %v4495_v57, 16  ;;  %v648_v17 = vshrl.u32 %v4495_v57, 16  ;;  %v654_v18 = vshll.u32 %v4498_v59, 16 }
  0x4a   : > { %v2191_v19 = vpack.c.b16 %v2170_v7, %v2169_v0  ;;  %v522_v20 = vrot.slane %v521_v8, 4  ;;  %v640_v22 = vrot.slane %v638_v13, 5  ;;  %v611_v27 = vshrl.u32 %v273_v5, 16  ;;  %v4528_v13 = vld [vmem:[%s4314_s19 + $0x98] sm:$0x1] }
  0x4b   : > { %v532_v30 = vrot.slane %v531_v14, 4  ;;  %v646_v32 = vrot.slane %v644_v15, 5  ;;  %v650_v35 = vrot.slane %v648_v17, 4  ;;  %v656_v38 = vrot.slane %v654_v18, 5 }
  0x4c   : > { %2217 = vrot.lane.b32.xlu1 %v2191_v19, %s4262_s20  ;;  %v527_v34 = vsel %vm4342_vm2, %v522_v20, %v526_v54  ;;  %v641_v39 = vor.u32 %v640_v22, %v637_v11  ;;  %v613_v41 = vrot.slane %v611_v27, 4  ;;  %v614_v42 = vshll.u32 %v273_v5, 16  ;;  %v4525_v11 = vld [vmem:[%s4314_s19 + $0x94] sm:$0xf] }
  0x4d   : > { %v537_v45 = vsel %vm4342_vm2, %v532_v30, %v536_v4  ;;  %v2167_v46 = vunpack.c.l.b16 %v527_v34  ;;  %v651_v47 = vor.u32 %v650_v35, %v646_v32  ;;  %v620_v48 = vshll.u32 %v4508_v24, 16  ;;  %v683_v34 = vld [vmem:[%s4314_s19 + $0xc] sm:$0xe] }
  0x4e   : > { %v2168_v49 = vunpack.c.l.b16 %v537_v45  ;;  %v642_v51 = vrot.slane %v641_v39, 4  ;;  %v616_v52 = vrot.slane %v614_v42, 5  ;;  %v624_v53 = vshrl.u32 %v4508_v24, 16 }
  0x4f   : > { %v652_v54 = vrot.slane %v651_v47, 4  ;;  %v622_v60 = vrot.slane %v620_v48, 5  ;;  %v630_v0 = vshll.u32 %v4514_v40, 16  ;;  %v587_v3 = vshrl.u32 %v271_v44, 16 }
  0x50   : > { %v2190_v5 = vpack.c.b16 %v2168_v49, %v2167_v46  ;;  %v647_v4 = vsel %vm4342_vm2, %v642_v51, %v646_v32  ;;  %v617_v7 = vor.u32 %v616_v52, %v613_v41  ;;  %v626_v8 = vrot.slane %v624_v53, 4  ;;  %v682_v49 = vld [vmem:[%s4314_s19] sm:$0xe] }
  0x51   : > { %v657_v14 = vsel %vm4342_vm2, %v652_v54, %v656_v38  ;;  %v2177_v15 = vunpack.c.l.b16 %v647_v4  ;;  %v632_v17 = vrot.slane %v630_v0, 5  ;;  %v589_v18 = vrot.slane %v587_v3, 4 }
  0x52   : > { %2215 = vrot.lane.b32.xlu0 %v2190_v5, %s4262_s20  ;;  %v2178_v19 = vunpack.c.l.b16 %v657_v14  ;;  %v618_v20 = vrot.slane %v617_v7, 4  ;;  %v627_v22 = vor.u32 %v626_v8, %v622_v60  ;;  %v590_v27 = vshll.u32 %v271_v44, 16 }
  0x53   : > { %v596_v30 = vshll.u32 %v4525_v11, 16  ;;  %v600_v32 = vshrl.u32 %v4525_v11, 16  ;;  %v606_v35 = vshll.u32 %v4528_v13, 16  ;;  %v3623_v52 = vrot.slane %v683_v34, 9 }
  0x54   : > { %v2195_v39 = vpack.c.b16 %v2178_v19, %v2177_v15  ;;  %v623_v38 = vsel %vm4342_vm2, %v618_v20, %v622_v60  ;;  %v628_v41 = vrot.slane %v627_v22, 4  ;;  %v592_v42 = vrot.slane %v590_v27, 5  ;;  %v277_v19 = vld [vmem:[%s4314_s19 + $0xb4] sm:$0xf] }
  0x55   : > { %v2175_v45 = vunpack.c.l.b16 %v623_v38  ;;  %v598_v46 = vrot.slane %v596_v30, 5  ;;  %v602_v47 = vrot.slane %v600_v32, 4  ;;  %v608_v48 = vrot.slane %v606_v35, 5  ;;  %v4568_v35 = vld [vmem:[%s4314_s19 + $0xbc] sm:$0x1] }
  0x56   : > { %2225 = vrot.lane.b32.xlu2 %v2195_v39, %s4262_s20  ;;  %v633_v44 = vsel %vm4342_vm2, %v628_v41, %v632_v17  ;;  %v593_v51 = vor.u32 %v592_v42, %v589_v18  ;;  %v758_v0 = vrot.slane %v4388_v37, 5  ;;  %v761_v3 = vrot.slane %v4391_v43, 5 }
  0x57   : > { %v2176_v53 = vunpack.c.l.b16 %v633_v44  ;;  %v603_v54 = vor.u32 %v602_v47, %v598_v46  ;;  %v3622_v4 = vrot.slane %v682_v49, 9  ;;  %v751_v7 = vrot.slane %v4338_v25, 5  ;;  %v4560_v25 = vld [vmem:[%s4314_s19 + $0xb8] sm:$0xf] }
  0x58   : > { %v594_v5 = vrot.slane %v593_v51, 4  ;;  %v754_v8 = vrot.slane %v4347_v36, 5  ;;  %v759_v17 = vsel %vm4544_vm5, %v3623_v52, %v758_v0  ;;  %v760_v18 = vrot.slane %v758_v0, 4 }
  0x59   : > { %v2194_v14 = vpack.c.b16 %v2176_v53, %v2175_v45  ;;  %v604_v15 = vrot.slane %v603_v54, 4  ;;  %v2231_v37 = vunpack.c.l.b16 %v759_v17  ;;  %v752_v43 = vsel %vm4544_vm5, %v3622_v4, %v751_v7  ;;  %v685_v53 = vld [vmem:[%s4314_s19 + $0x24] sm:$0xe]  ;;  %v684_v4 = vld [vmem:[%s4314_s19 + $0x18] sm:$0xe] }
  0x5a   : > { %v599_v20 = vsel %vm4342_vm2, %v594_v5, %v598_v46  ;;  %v753_v22 = vrot.slane %v751_v7, 4  ;;  %v762_v30 = vsel %vm4544_vm5, %v760_v18, %v761_v3  ;;  %v2229_v32 = vunpack.c.l.b16 %v752_v43 }
  0x5b   : > { %2223 = vrot.lane.b32.xlu1 %v2194_v14, %s4262_s20  ;;  %v609_v36 = vsel %vm4342_vm2, %v604_v15, %v608_v48  ;;  %v2173_v27 = vunpack.c.l.b16 %v599_v20  ;;  %v2232_v39 = vunpack.c.l.b16 %v762_v30  ;;  %v659_v41 = vshrl.u32 %v277_v19, 16  ;;  %v686_v48 = vld [vmem:[%s4314_s19 + $0x30] sm:$0xe] }
  0x5c   : > { %v2174_v34 = vunpack.c.l.b16 %v609_v36  ;;  %v755_v38 = vsel %vm4544_vm5, %v753_v22, %v754_v8  ;;  %v662_v45 = vshll.u32 %v277_v19, 16  ;;  %v668_v46 = vshll.u32 %v4560_v25, 16 }
  0x5d   : > { %v2230_v42 = vunpack.c.l.b16 %v755_v38  ;;  %v672_v47 = vshrl.u32 %v4560_v25, 16  ;;  %v2262_v44 = vpack.c.b16 %v2232_v39, %v2231_v37  ;;  %v661_v51 = vrot.slane %v659_v41, 4 }
  0x5e   : > { %v2193_v49 = vpack.c.b16 %v2174_v34, %v2173_v27  ;;  %v678_v52 = vshll.u32 %v4568_v35, 16  ;;  %v664_v0 = vrot.slane %v662_v45, 5  ;;  %v670_v3 = vrot.slane %v668_v46, 5  ;;  %v689_v45 = vld [vmem:[%s4314_s19 + $0x54] sm:$0xe] }
  0x5f   : > { %v2261_v54 = vpack.c.b16 %v2230_v42, %v2229_v32  ;;  %v674_v5 = vrot.slane %v672_v47, 4  ;;  %2279 = vrot.lane.b32.xlu2 %v2262_v44, %s4263_s21  ;;  %v3626_v8 = vrot.slane %v686_v48, 9  ;;  %v779_v14 = vrot.slane %v4318_v1, 5 }
  0x60   : > { %2221 = vrot.lane.b32.xlu0 %v2193_v49, %s4262_s20  ;;  %v680_v7 = vrot.slane %v678_v52, 5  ;;  %v782_v15 = vrot.slane %v4321_v2, 5  ;;  %v665_v17 = vor.u32 %v664_v0, %v661_v51  ;;  %v3625_v19 = vrot.slane %v685_v53, 9 }
  0x61   : > { %v675_v18 = vor.u32 %v674_v5, %v670_v3  ;;  %v772_v20 = vrot.slane %v4374_v12, 5  ;;  %v780_v37 = vsel %vm4544_vm5, %v3626_v8, %v779_v14  ;;  %v781_v43 = vrot.slane %v779_v14, 4  ;;  %v687_v5 = vld [vmem:[%s4314_s19 + $0x3c] sm:$0xe] }
  0x62   : > { %v775_v22 = vrot.slane %v4378_v16, 5  ;;  %v3624_v36 = vrot.slane %v684_v4, 9  ;;  %v666_v27 = vrot.slane %v665_v17, 4  ;;  %v2237_v1 = vunpack.c.l.b16 %v780_v37 }
  0x63   : > { %2277 = vrot.lane.b32.xlu1 %v2261_v54, %s4263_s21  ;;  %v676_v30 = vrot.slane %v675_v18, 4  ;;  %v773_v2 = vsel %vm4544_vm5, %v3625_v19, %v772_v20  ;;  %v783_v12 = vsel %vm4544_vm5, %v781_v43, %v782_v15  ;;  %v774_v32 = vrot.slane %v772_v20, 4  ;;  %v692_v18 = vld [vmem:[%s4314_s19 + $0x78] sm:$0xe] }
  0x64   : > { %v2235_v34 = vunpack.c.l.b16 %v773_v2  ;;  %v765_v39 = vrot.slane %v4328_v9, 5  ;;  %v671_v16 = vsel %vm4342_vm2, %v666_v27, %v670_v3  ;;  %v2238_v41 = vunpack.c.l.b16 %v783_v12  ;;  %v688_v9 = vld [vmem:[%s4314_s19 + $0x48] sm:$0xe] }
  0x65   : > { %v681_v38 = vsel %vm4342_vm2, %v676_v30, %v680_v7  ;;  %v768_v42 = vrot.slane %v4331_v10, 5  ;;  %v2179_v46 = vunpack.c.l.b16 %v671_v16  ;;  %v776_v48 = vsel %vm4544_vm5, %v774_v32, %v775_v22  ;;  %v691_v30 = vld [vmem:[%s4314_s19 + $0x6c] sm:$0xe] }
  0x66   : > { %v2180_v47 = vunpack.c.l.b16 %v681_v38  ;;  %v766_v49 = vsel %vm4544_vm5, %v3624_v36, %v765_v39  ;;  %v2265_v44 = vpack.c.b16 %v2238_v41, %v2237_v1  ;;  %v2236_v51 = vunpack.c.l.b16 %v776_v48 }
  0x67   : > { %v767_v52 = vrot.slane %v765_v39, 4  ;;  %v2233_v53 = vunpack.c.l.b16 %v766_v49  ;;  %v3629_v0 = vrot.slane %v689_v45, 9  ;;  %v800_v3 = vrot.slane %v4418_v23, 5 }
  0x68   : > { %v2196_v54 = vpack.c.b16 %v2180_v47, %v2179_v46  ;;  %v803_v10 = vrot.slane %v4423_v31, 5  ;;  %2285 = vrot.lane.b32.xlu2 %v2265_v44, %s4263_s21  ;;  %v2264_v4 = vpack.c.b16 %v2236_v51, %v2235_v34  ;;  %v3628_v8 = vrot.slane %v688_v9, 9 }
  0x69   : > { %v769_v7 = vsel %vm4544_vm5, %v767_v52, %v768_v42  ;;  %v793_v14 = vrot.slane %v4433_v55, 5  ;;  %v801_v17 = vsel %vm4544_vm5, %v3629_v0, %v800_v3  ;;  %v802_v23 = vrot.slane %v800_v3, 4  ;;  %v690_v42 = vld [vmem:[%s4314_s19 + $0x60] sm:$0xe]  ;;  %v694_v3 = vld [vmem:[%s4314_s19 + $0x90] sm:$0xe] }
  0x6a   : > { %2227 = vrot.lane.b32.xlu0 %v2196_v54, %s4262_s20  ;;  %v2234_v15 = vunpack.c.l.b16 %v769_v7  ;;  %v796_v31 = vrot.slane %v4438_v63, 5  ;;  %v2243_v19 = vunpack.c.l.b16 %v801_v17  ;;  %v3627_v43 = vrot.slane %v687_v5, 9 }
  0x6b   : > { %2283 = vrot.lane.b32.xlu1 %v2264_v4, %s4263_s21  ;;  %v794_v20 = vsel %vm4544_vm5, %v3628_v8, %v793_v14  ;;  %v795_v37 = vrot.slane %v793_v14, 4  ;;  %v804_v22 = vsel %vm4544_vm5, %v802_v23, %v803_v10  ;;  %v786_v27 = vrot.slane %v4360_v56, 5 }
  0x6c   : > { %v2263_v55 = vpack.c.b16 %v2234_v15, %v2233_v53  ;;  %v2241_v36 = vunpack.c.l.b16 %v794_v20  ;;  %v2244_v1 = vunpack.c.l.b16 %v804_v22  ;;  %v789_v2 = vrot.slane %v4365_v62, 5  ;;  %v693_v15 = vld [vmem:[%s4314_s19 + $0x84] sm:$0xe] }
  0x6d   : > { %v797_v63 = vsel %vm4544_vm5, %v795_v37, %v796_v31  ;;  %v3632_v12 = vrot.slane %v692_v18, 9  ;;  %v787_v34 = vsel %vm4544_vm5, %v3627_v43, %v786_v27  ;;  %v788_v39 = vrot.slane %v786_v27, 4 }
  0x6e   : > { %v2242_v32 = vunpack.c.l.b16 %v797_v63  ;;  %v821_v16 = vrot.slane %v4465_v50, 5  ;;  %v2268_v38 = vpack.c.b16 %v2244_v1, %v2243_v19  ;;  %v824_v41 = vrot.slane %v4468_v58, 5  ;;  %v695_v58 = vld [vmem:[%s4314_s19 + $0x9c] sm:$0xe] }
  0x6f   : > { %v3631_v56 = vrot.slane %v691_v30, 9  ;;  %v790_v46 = vsel %vm4544_vm5, %v788_v39, %v789_v2  ;;  %v2239_v48 = vunpack.c.l.b16 %v787_v34  ;;  %v814_v50 = vrot.slane %v4478_v21, 5 }
  0x70   : > { %v2267_v45 = vpack.c.b16 %v2242_v32, %v2241_v36  ;;  %v822_v62 = vsel %vm4544_vm5, %v3632_v12, %v821_v16  ;;  %v823_v47 = vrot.slane %v821_v16, 4  ;;  %2291 = vrot.lane.b32.xlu2 %v2268_v38, %s4263_s21  ;;  %v817_v9 = vrot.slane %v4483_v33, 5  ;;  %v697_v36 = vld [vmem:[%s4314_s19 + $0xb4] sm:$0xe] }
  0x71   : > { %v2249_v49 = vunpack.c.l.b16 %v822_v62  ;;  %v2240_v44 = vunpack.c.l.b16 %v790_v46  ;;  %v3630_v52 = vrot.slane %v690_v42, 9  ;;  %v807_v53 = vrot.slane %v4405_v61, 5 }
  0x72   : > { %2281 = vrot.lane.b32.xlu0 %v2263_v55, %s4263_s21  ;;  %v825_v51 = vsel %vm4544_vm5, %v823_v47, %v824_v41  ;;  %v815_v0 = vsel %vm4544_vm5, %v3631_v56, %v814_v50  ;;  %v816_v21 = vrot.slane %v814_v50, 4  ;;  %v810_v33 = vrot.slane %v4408_v6, 5 }
  0x73   : > { %2289 = vrot.lane.b32.xlu1 %v2267_v45, %s4263_s21  ;;  %v2250_v54 = vunpack.c.l.b16 %v825_v51  ;;  %v2247_v10 = vunpack.c.l.b16 %v815_v0  ;;  %v809_v5 = vrot.slane %v807_v53, 4  ;;  %v3635_v4 = vrot.slane %v695_v58, 9 }
  0x74   : > { %v818_v8 = vsel %vm4544_vm5, %v816_v21, %v817_v9  ;;  %v808_v61 = vsel %vm4544_vm5, %v3630_v52, %v807_v53  ;;  %v842_v14 = vrot.slane %v4508_v24, 5  ;;  %v2266_v17 = vpack.c.b16 %v2240_v44, %v2239_v48  ;;  %v696_v48 = vld [vmem:[%s4314_s19 + $0xa8] sm:$0xe]  ;;  %v3654_v52 = vld [vmem:[%s4314_s19 + $0x6c] sm:$0xf] }
  0x75   : > { %v2271_v7 = vpack.c.b16 %v2250_v54, %v2249_v49  ;;  %v2248_v23 = vunpack.c.l.b16 %v818_v8  ;;  %v845_v31 = vrot.slane %v4514_v40, 5  ;;  %v3634_v6 = vrot.slane %v694_v3, 9  ;;  %v4690_v53 = vld [vmem:[%s4314_s19 + $0x70] sm:$0xf] }
  0x76   : > { %v811_v18 = vsel %vm4544_vm5, %v809_v5, %v810_v33  ;;  %v843_v19 = vsel %vm4544_vm5, %v3635_v4, %v842_v14  ;;  %v844_v20 = vrot.slane %v842_v14, 4  ;;  %v835_v37 = vrot.slane %v4525_v11, 5  ;;  %v4033_v54 = vld [vmem:[%s4314_s19 + $0xc] sm:$0xff]  ;;  %v4700_v14 = vld [vmem:[%s4314_s19 + $0x74] sm:$0x1] }
  0x77   : > { %v2270_v43 = vpack.c.b16 %v2248_v23, %v2247_v10  ;;  %v2245_v55 = vunpack.c.l.b16 %v808_v61  ;;  %v838_v22 = vrot.slane %v4528_v13, 5  ;;  %v3633_v24 = vrot.slane %v693_v15, 9 }
  0x78   : > { %2297 = vrot.lane.b32.xlu2 %v2271_v7, %s4263_s21  ;;  %v846_v40 = vsel %vm4544_vm5, %v844_v20, %v845_v31  ;;  %v2255_v27 = vunpack.c.l.b16 %v843_v19  ;;  %v836_v30 = vsel %vm4544_vm5, %v3634_v6, %v835_v37  ;;  %v837_v1 = vrot.slane %v835_v37, 4  ;;  %v2206_v61 = vpop.permute.xlu2 %2205  ;;  %v4707_v19 = vld [vmem:[%s4314_s19 + $0xa0] sm:$0xf]  ;;  %v3662_v20 = vld [vmem:[%s4314_s19 + $0x9c] sm:$0xf] }
  0x79   : > { %v2246_v63 = vunpack.c.l.b16 %v811_v18  ;;  %v2256_v11 = vunpack.c.l.b16 %v846_v40  ;;  %v828_v2 = vrot.slane %v4450_v28, 5  ;;  %v831_v13 = vrot.slane %v4453_v29, 5 }
  0x7a   : > { %2287 = vrot.lane.b32.xlu0 %v2266_v17, %s4263_s21  ;;  %v839_v12 = vsel %vm4544_vm5, %v837_v1, %v838_v22  ;;  %v2253_v32 = vunpack.c.l.b16 %v836_v30  ;;  %v3637_v34 = vrot.slane %v697_v36, 9  ;;  %v856_v39 = vrot.slane %v4560_v25, 5 }
  0x7b   : > { %2295 = vrot.lane.b32.xlu1 %v2270_v43, %s4263_s21  ;;  %v2254_v16 = vunpack.c.l.b16 %v839_v12  ;;  %v829_v38 = vsel %vm4544_vm5, %v3633_v24, %v828_v2  ;;  %v830_v41 = vrot.slane %v828_v2, 4  ;;  %v859_v56 = vrot.slane %v4568_v35, 5  ;;  %v4036_v43 = vld [vmem:[%s4314_s19 + $0x30] sm:$0xff] }
  0x7c   : > { %v2274_v28 = vpack.c.b16 %v2256_v11, %v2255_v27  ;;  %v2251_v42 = vunpack.c.l.b16 %v829_v38  ;;  %v858_v29 = vrot.slane %v856_v39, 4  ;;  %v2269_v45 = vpack.c.b16 %v2246_v63, %v2245_v55  ;;  %v4035_v27 = vld [vmem:[%s4314_s19 + $0x24] sm:$0xff]  ;;  %v4039_v38 = vld [vmem:[%s4314_s19 + $0x54] sm:$0xff] }
  0x7d   : > { %v832_v46 = vsel %vm4544_vm5, %v830_v41, %v831_v13  ;;  %v849_v62 = vrot.slane %v4495_v57, 5  ;;  %v2273_v47 = vpack.c.b16 %v2254_v16, %v2253_v32  ;;  %v857_v49 = vsel %vm4544_vm5, %v3637_v34, %v856_v39  ;;  %v4021_v16 = vld [vmem:[%s4314_s19 + $0x30] sm:$0xff]  ;;  %v3682_v41 = vld [vmem:[%s4314_s19 + $0xa4] sm:$0x1] }
  0x7e   : > { %v2252_v25 = vunpack.c.l.b16 %v832_v46  ;;  %v860_v35 = vsel %vm4544_vm5, %v858_v29, %v859_v56  ;;  %v3636_v9 = vrot.slane %v696_v48, 9  ;;  %v852_v57 = vrot.slane %v4498_v59, 5  ;;  %v4735_v46 = vld [vmem:[%s4314_s19 + $0x7c] sm:$0xf] }
  0x7f   : > { %v851_v58 = vrot.slane %v849_v62, 4  ;;  %v2259_v44 = vunpack.c.l.b16 %v857_v49  ;;  %v2260_v51 = vunpack.c.l.b16 %v860_v35  ;;  %v1106_v0 = vshrl.u32 %v3654_v52, 16  ;;  %v4038_v49 = vld [vmem:[%s4314_s19 + $0x48] sm:$0xff] }
  0x80   : > { %2303 = vrot.lane.b32.xlu2 %v2274_v28, %s4263_s21  ;;  %v2272_v50 = vpack.c.b16 %v2252_v25, %v2251_v42  ;;  %v1109_v21 = vshll.u32 %v3654_v52, 16  ;;  %v1115_v33 = vshll.u32 %v4690_v53, 16  ;;  %v850_v3 = vsel %vm4544_vm5, %v3636_v9, %v849_v62  ;;  %v4022_v28 = vld [vmem:[%s4314_s19 + $0x3c] sm:$0xff] }
  0x81   : > { %v853_v10 = vsel %vm4544_vm5, %v851_v58, %v852_v57  ;;  %v1119_v59 = vshrl.u32 %v4690_v53, 16  ;;  %v2276_v5 = vpack.c.b16 %v2260_v51, %v2259_v44  ;;  %v1108_v4 = vrot.slane %v1106_v0, 4  ;;  %v4034_v62 = vld [vmem:[%s4314_s19 + $0x18] sm:$0xff]  ;;  %v4744_v51 = vld [vmem:[%s4314_s19 + $0x80] sm:$0x1] }
  0x82   : > { %2293 = vrot.lane.b32.xlu0 %v2269_v45, %s4263_s21  ;;  %v1111_v7 = vrot.slane %v1109_v21, 5  ;;  %v1117_v8 = vrot.slane %v1115_v33, 5  ;;  %v2257_v17 = vunpack.c.l.b16 %v850_v3  ;;  %v2258_v23 = vunpack.c.l.b16 %v853_v10  ;;  %v3734_v45 = vld [vmem:[%s4314_s19 + $0x78] sm:$0xf] }
  0x83   : > { %2301 = vrot.lane.b32.xlu1 %v2273_v47, %s4263_s21  ;;  %v1121_v15 = vrot.slane %v1119_v59, 4  ;;  %v1125_v18 = vshll.u32 %v4700_v14, 16  ;;  %v1202_v36 = vshrl.u32 %v3662_v20, 16  ;;  %v1205_v40 = vshll.u32 %v3662_v20, 16  ;;  %v3698_v47 = vld [vmem:[%s4314_s19 + $0x9c] sm:$0xe] }
  0x84   : > { %v1112_v31 = vor.u32 %v1111_v7, %v1108_v4  ;;  %v2275_v37 = vpack.c.b16 %v2258_v23, %v2257_v17  ;;  %v1211_v30 = vshll.u32 %v4707_v19, 16  ;;  %v1215_v1 = vshrl.u32 %v4707_v19, 16  ;;  %v3742_v20 = vld [vmem:[%s4314_s19 + $0xa8] sm:$0xf] }
  0x85   : > { %v1122_v6 = vor.u32 %v1121_v15, %v1117_v8  ;;  %v1127_v24 = vrot.slane %v1125_v18, 5  ;;  %v1204_v13 = vrot.slane %v1202_v36, 4  ;;  %v1207_v12 = vrot.slane %v1205_v40, 5  ;;  %v4037_v36 = vld [vmem:[%s4314_s19 + $0x3c] sm:$0xff] }
  0x86   : > { %v1113_v55 = vrot.slane %v1112_v31, 4  ;;  %v2208_v63 = vpop.permute.xlu2 %2207  ;;  %v1447_v32 = vrot.slane %v4707_v19, 5  ;;  %v4722_v34 = vrot.slane %v1211_v30, 5  ;;  %v1217_v39 = vrot.slane %v1215_v1, 4  ;;  %v4769_v19 = vld [vmem:[%s4314_s19 + $0xac] sm:$0xf] }
  0x87   : > { %v1123_v22 = vrot.slane %v1122_v6, 4  ;;  %v1419_v56 = vrot.slane %v4690_v53, 5  ;;  %v1450_v25 = vrot.slane %v3682_v41, 5  ;;  %v1208_v48 = vor.u32 %v1207_v12, %v1204_v13 }
  0x88   : > { %2373 = vrot.lane.b32.xlu2 %v4033_v54, %s4264_s22  ;;  %v1118_v11 = vsel %vm4342_vm2, %v1113_v55, %v1117_v8  ;;  %v1449_v35 = vrot.slane %v1447_v32, 4  ;;  %v1422_v9 = vrot.slane %v4700_v14, 5  ;;  %v1218_v58 = vor.u32 %v1217_v39, %v4722_v34  ;;  %v4019_v39 = vld [vmem:[%s4314_s19 + $0x18] sm:$0xff] }
  0x89   : > { %v1128_v2 = vsel %vm4342_vm2, %v1123_v22, %v1127_v24  ;;  %v4729_v42 = vunpack.c.l.b16 %v1118_v11  ;;  %v1221_v57 = vshll.u32 %v3682_v41, 16  ;;  %v1421_v44 = vrot.slane %v1419_v56, 4 }
  0x8a   : > { %2299 = vrot.lane.b32.xlu0 %v2272_v50, %s4263_s21  ;;  %v4731_v29 = vunpack.c.l.b16 %v1128_v2  ;;  %v3694_v50 = vld [vmem:[%s4314_s19 + $0x6c] sm:$0xe]  ;;  %v1718_v52 = vshrl.u32 %v3734_v45, 16  ;;  %v1721_v53 = vshll.u32 %v3734_v45, 16  ;;  %v1727_v54 = vshll.u32 %v4735_v46, 16 }
  0x8b   : > { %2307 = vrot.lane.b32.xlu1 %v2276_v5, %s4263_s21  ;;  %v4748_v0 = vsel %vm2821_vm6, %v4021_v16, %v2206_v61  ;;  %v4752_v21 = vsel %vm2821_vm6, %v4022_v28, %v2208_v63  ;;  %v3714_v3 = vrot.slane %v3698_v47, 9  ;;  %v3710_v10 = vrot.slane %v3694_v50, 9  ;;  %v4041_v63 = vld [vmem:[%s4314_s19 + $0x6c] sm:$0xff] }
  0x8c   : > { %v2445_v33 = vpack.c.b16 %v4731_v29, %v4729_v42  ;;  %v1209_v59 = vrot.slane %v1208_v48, 4  ;;  %v1720_v5 = vrot.slane %v1718_v52, 4  ;;  %v1723_v4 = vrot.slane %v1721_v53, 5  ;;  %v3774_v52 = vld [vmem:[%s4314_s19 + $0x78] sm:$0xe] }
  0x8d   : > { %v1219_v8 = vrot.slane %v1218_v58, 4  ;;  %v1729_v61 = vrot.slane %v1727_v54, 5  ;;  %v1731_v14 = vshrl.u32 %v4735_v46, 16  ;;  %v1737_v15 = vshll.u32 %v4744_v51, 16 }
  0x8e   : > { %v1451_v23 = vsel %vm4544_vm5, %v1449_v35, %v1450_v25  ;;  %v4766_v31 = vsel %vm4544_vm5, %v1421_v44, %v1422_v9  ;;  %v1223_v6 = vrot.slane %v1221_v57, 5  ;;  %v1724_v18 = vor.u32 %v1723_v4, %v1720_v5  ;;  %v4028_v9 = vld [vmem:[%s4314_s19 + $0x84] sm:$0xff] }
  0x8f   : > { %v1733_v55 = vrot.slane %v1731_v14, 4  ;;  %v1814_v22 = vshrl.u32 %v3742_v20, 16  ;;  %v1817_v24 = vshll.u32 %v3742_v20, 16  ;;  %v1420_v40 = vsel %vm4544_vm5, %v3710_v10, %v1419_v56  ;;  %v4020_v10 = vld [vmem:[%s4314_s19 + $0x24] sm:$0xff] }
  0x90   : > { %2379 = vrot.lane.b32.xlu2 %v4036_v43, %s4264_s22  ;;  %v1448_v43 = vsel %vm4544_vm5, %v3714_v3, %v1447_v32  ;;  %v1823_v30 = vshll.u32 %v4769_v19, 16  ;;  %v1827_v1 = vshrl.u32 %v4769_v19, 16  ;;  %v1739_v2 = vrot.slane %v1737_v15, 5  ;;  %v4017_v32 = vld [vmem:[%s4314_s19] sm:$0xff] }
  0x91   : > { %v1734_v11 = vor.u32 %v1733_v55, %v1729_v61  ;;  %v1816_v13 = vrot.slane %v1814_v22, 4  ;;  %v1819_v12 = vrot.slane %v1817_v24, 5  ;;  %v2509_v16 = vunpack.c.l.b16 %v1448_v43 }
  0x92   : > { %2305 = vrot.lane.b32.xlu0 %v2275_v37, %s4263_s21  ;;  %v4042_v37 = vld [vmem:[%s4314_s19 + $0x78] sm:$0xff]  ;;  %v1214_v41 = vsel %vm4342_vm2, %v1209_v59, %v4722_v34  ;;  %v1224_v56 = vsel %vm4342_vm2, %v1219_v8, %v1223_v6  ;;  %v2502_v45 = vunpack.c.l.b16 %v4766_v31  ;;  %v4790_v47 = vrot.slane %v1823_v30, 5  ;;  %v3762_v59 = vld [vmem:[%s4314_s19 + $0xb0] sm:$0x1] }
  0x93   : > { %2377 = vrot.lane.b32.xlu1 %v4035_v27, %s4264_s22  ;;  %v1725_v27 = vrot.slane %v1724_v18, 4  ;;  %v1829_v25 = vrot.slane %v1827_v1, 4  ;;  %v2501_v48 = vunpack.c.l.b16 %v1420_v40  ;;  %v2059_v35 = vrot.slane %v4769_v19, 5 }
  0x94   : > { %v2202_v7 = vpop.permute.xlu1 %2201  ;;  %v4760_v17 = vpop.permute.xlu2 %2213  ;;  %v2031_v50 = vrot.slane %v4735_v46, 5  ;;  %v4800_v58 = vunpack.c.l.b16 %v1214_v41  ;;  %v4802_v57 = vunpack.c.l.b16 %v1224_v56  ;;  %v1820_v53 = vor.u32 %v1819_v12, %v1816_v13  ;;  %v4867_v41 = vld [vmem:[%s4314_s19 + $0x44] sm:$0x1] }
  0x95   : > { %v1730_v34 = vsel %vm4342_vm2, %v1725_v27, %v1729_v61  ;;  %v4808_v54 = vsel %vm2821_vm6, %v4019_v39, %v2202_v7  ;;  %v2062_v14 = vrot.slane %v3762_v59, 5  ;;  %v1830_v15 = vor.u32 %v1829_v25, %v4790_v47  ;;  %v3646_v7 = vld [vmem:[%s4314_s19 + $0x3c] sm:$0xf]  ;;  %v4859_v39 = vld [vmem:[%s4314_s19 + $0x14] sm:$0x1] }
  0x96   : > { %v4817_v8 = vunpack.c.l.b16 %v1730_v34  ;;  %v2061_v6 = vrot.slane %v2059_v35, 4  ;;  %v3790_v18 = vrot.slane %v3774_v52, 9  ;;  %v2033_v19 = vrot.slane %v2031_v50, 4  ;;  %v3638_v34 = vld [vmem:[%s4314_s19 + $0xc] sm:$0xf] }
  0x97   : > { %v2034_v20 = vrot.slane %v4744_v51, 5  ;;  %v4829_v55 = vpack.c.b16 %v2502_v45, %v2501_v48  ;;  %v2449_v22 = vpack.c.b16 %v4802_v57, %v4800_v58  ;;  %v1821_v24 = vrot.slane %v1820_v53, 4  ;;  %v4839_v51 = vld [vmem:[%s4314_s19 + $0x10] sm:$0xf] }
  0x98   : > { %2385 = vrot.lane.b32.xlu2 %v4039_v38, %s4264_s22  ;;  %v2510_v38 = vunpack.c.l.b16 %v1451_v23  ;;  %v2198_v28 = vpop.permute.xlu0 %2197  ;;  %v4040_v23 = vld [vmem:[%s4314_s19 + $0x60] sm:$0xff]  ;;  %v1833_v27 = vshll.u32 %v3762_v59, 16  ;;  %v1010_v30 = vshrl.u32 %v3646_v7, 16  ;;  %v1013_v13 = vshll.u32 %v3646_v7, 16 }
  0x99   : > { %v4811_v3 = vsel %vm2821_vm6, %v4017_v32, %v2198_v28  ;;  %v2063_v12 = vsel %vm4544_vm5, %v2061_v6, %v2062_v14  ;;  %v2032_v42 = vsel %vm4544_vm5, %v3790_v18, %v2031_v50  ;;  %v2035_v29 = vsel %vm4544_vm5, %v2033_v19, %v2034_v20  ;;  %v3686_v32 = vld [vmem:[%s4314_s19 + $0xc] sm:$0xe] }
  0x9a   : > { %2375 = vrot.lane.b32.xlu0 %v4034_v62, %s4264_s22  ;;  %v1735_v62 = vrot.slane %v1734_v11, 4  ;;  %v4813_v46 = vpack.c.b16 %v2510_v38, %v2509_v16  ;;  %v1363_v11 = vrot.slane %v4839_v51, 5  ;;  %v1826_v16 = vsel %vm4342_vm2, %v1821_v24, %v4790_v47 }
  0x9b   : > { %2383 = vrot.lane.b32.xlu1 %v4038_v49, %s4264_s22  ;;  %v3778_v49 = vld [vmem:[%s4314_s19 + $0xa8] sm:$0xe]  ;;  %v3702_v38 = vrot.slane %v3686_v32, 9  ;;  %v1012_v56 = vrot.slane %v1010_v30, 4  ;;  %v1015_v28 = vrot.slane %v1013_v13, 5  ;;  %v2766_v50 = vunpack.c.l.b16 %v2063_v12 }
  0x9c   : > { %v1740_v44 = vsel %vm4342_vm2, %v1735_v62, %v1739_v2  ;;  %v3794_v5 = vrot.slane %v3778_v49, 9  ;;  %v4849_v2 = vld [vmem:[%s4314_s19 + $0x40] sm:$0xf]  ;;  %v1365_v45 = vrot.slane %v1363_v11, 4  ;;  %v1366_v62 = vrot.slane %v4859_v39, 5  ;;  %v4018_v49 = vld [vmem:[%s4314_s19 + $0xc] sm:$0xff] }
  0x9d   : > { %v4819_v61 = vunpack.c.l.b16 %v1740_v44  ;;  %v1019_v25 = vshll.u32 %v4849_v2, 16  ;;  %v1023_v48 = vshrl.u32 %v4849_v2, 16  ;;  %v4043_v44 = vld [vmem:[%s4314_s19 + $0x84] sm:$0xff]  ;;  %v1016_v53 = vor.u32 %v1015_v28, %v1012_v56 }
  0x9e   : > { %v2060_v40 = vsel %vm4544_vm5, %v3794_v5, %v2059_v35  ;;  %v1029_v5 = vshll.u32 %v4867_v41, 16  ;;  %v4878_v14 = vunpack.c.l.b16 %v1826_v16  ;;  %v914_v7 = vshrl.u32 %v3638_v34, 16  ;;  %v3726_v56 = vld [vmem:[%s4314_s19 + $0x48] sm:$0xf] }
  0x9f   : > { %v2701_v1 = vpack.c.b16 %v4819_v61, %v4817_v8  ;;  %v2765_v35 = vunpack.c.l.b16 %v2060_v40  ;;  %v1025_v59 = vrot.slane %v1023_v48, 4  ;;  %v917_v18 = vshll.u32 %v3638_v34, 16  ;;  %v4061_v48 = vld [vmem:[%s4314_s19 + $0xa8] sm:$0xff] }
  0xa0   : > { %2391 = vrot.lane.b32.xlu2 %v4042_v37, %s4264_s22  ;;  %v4045_v37 = vld [vmem:[%s4314_s19 + $0x9c] sm:$0xff]  ;;  %v923_v19 = vshll.u32 %v4839_v51, 16  ;;  %v916_v40 = vrot.slane %v914_v7, 4  ;;  %v933_v32 = vshll.u32 %v4859_v39, 16  ;;  %v4023_v8 = vld [vmem:[%s4314_s19 + $0x48] sm:$0xff] }
  0xa2   : > { %2381 = vrot.lane.b32.xlu0 %v4037_v36, %s4264_s22  ;;  %v2204_v4 = vpop.permute.xlu1 %2203  ;;  %v2220_v31 = vpop.permute.xlu2 %2219 }
  0xa3   : > { %2389 = vrot.lane.b32.xlu1 %v4041_v63, %s4264_s22  ;;  %v4827_v43 = vsel %vm2821_vm6, %v4028_v9, %v2220_v31  ;;  %v4834_v36 = vsel %vm2821_vm6, %v4020_v10, %v2204_v4  ;;  %v1831_v63 = vrot.slane %v1830_v15, 4  ;;  %v2757_v9 = vunpack.c.l.b16 %v2032_v42 }
  0xa4   : > { %v1021_v10 = vrot.slane %v1019_v25, 5  ;;  %v2758_v4 = vunpack.c.l.b16 %v2035_v29  ;;  %v1364_v15 = vsel %vm4544_vm5, %v3702_v38, %v1363_v11  ;;  %v1367_v31 = vsel %vm4544_vm5, %v1365_v45, %v1366_v62  ;;  %v3690_v29 = vld [vmem:[%s4314_s19 + $0x3c] sm:$0xe] }
  0xa5   : > { %v919_v11 = vrot.slane %v917_v18, 5  ;;  %v2485_v13 = vunpack.c.l.b16 %v1364_v15  ;;  %v2486_v12 = vunpack.c.l.b16 %v1367_v31  ;;  %v927_v42 = vshrl.u32 %v4839_v51, 16 }
  0xa6   : > { %v1026_v6 = vor.u32 %v1025_v59, %v1021_v10  ;;  %v3706_v16 = vrot.slane %v3690_v29, 9  ;;  %v1391_v38 = vrot.slane %v4849_v2, 5  ;;  %v4904_v28 = vpack.c.b16 %v2758_v4, %v2757_v9  ;;  %v4031_v9 = vld [vmem:[%s4314_s19 + $0xa8] sm:$0xff]  ;;  %v4024_v59 = vld [vmem:[%s4314_s19 + $0x54] sm:$0xff] }
  0xa7   : > { %v929_v45 = vrot.slane %v927_v42, 4  ;;  %v1394_v62 = vrot.slane %v4867_v41, 5  ;;  %v1622_v2 = vshrl.u32 %v3726_v56, 16  ;;  %v4914_v34 = vpack.c.b16 %v2486_v12, %v2485_v13  ;;  %v4920_v41 = vld [vmem:[%s4314_s19 + $0x4c] sm:$0xf] }
  0xa8   : > { %2469 = vrot.lane.b32.xlu2 %v2445_v33, %s4265_s23  ;;  %v1835_v33 = vrot.slane %v1833_v27, 5  ;;  %v2200_v52 = vpop.permute.xlu0 %2199  ;;  %v1017_v27 = vrot.slane %v1016_v53, 4  ;;  %v1027_v30 = vrot.slane %v1026_v6, 4  ;;  %v1393_v25 = vrot.slane %v1391_v38, 4  ;;  %v4939_v6 = vld [vmem:[%s4314_s19 + $0x50] sm:$0x1] }
  0xa9   : > { %v2827_v20 = vsel %vm2821_vm6, %v4018_v49, %v2200_v52  ;;  %v4926_v52 = vld [vmem:[%s4314_s19 + $0x1c] sm:$0xf]  ;;  %v1624_v53 = vrot.slane %v1622_v2, 4  ;;  %v3750_v12 = vld [vmem:[%s4314_s19 + $0x20] sm:$0x1] }
  0xaa   : > { %2387 = vrot.lane.b32.xlu0 %v4040_v23, %s4264_s22  ;;  %v1836_v47 = vsel %vm4342_vm2, %v1831_v63, %v1835_v33  ;;  %v1031_v63 = vrot.slane %v1029_v5, 5  ;;  %v920_v33 = vor.u32 %v919_v11, %v916_v40  ;;  %v1022_v51 = vsel %vm4342_vm2, %v1017_v27, %v1021_v10 }
  0xab   : > { %2397 = vrot.lane.b32.xlu1 %v4045_v37, %s4264_s22  ;;  %v4890_v37 = vpack.c.b16 %v2766_v50, %v2765_v35  ;;  %v4892_v24 = vunpack.c.l.b16 %v1836_v47  ;;  %v1392_v50 = vsel %vm4544_vm5, %v3706_v16, %v1391_v38  ;;  %v935_v47 = vrot.slane %v933_v32, 5  ;;  %v4057_v38 = vld [vmem:[%s4314_s19 + $0x78] sm:$0xff] }
  0xac   : > { %v1032_v39 = vsel %vm4342_vm2, %v1027_v30, %v1031_v63  ;;  %v921_v49 = vrot.slane %v920_v33, 4  ;;  %v1625_v10 = vshll.u32 %v3726_v56, 16  ;;  %v4933_v4 = vunpack.c.l.b16 %v1022_v51 }
  0xad   : > { %v4935_v15 = vunpack.c.l.b16 %v1032_v39  ;;  %v1975_v31 = vrot.slane %v4926_v52, 5  ;;  %v2493_v61 = vunpack.c.l.b16 %v1392_v50  ;;  %v1631_v40 = vshll.u32 %v4920_v41, 16 }
  0xae   : > { %v1635_v27 = vshrl.u32 %v4920_v41, 16  ;;  %v1978_v33 = vrot.slane %v3750_v12, 5  ;;  %v1641_v16 = vshll.u32 %v4939_v6, 16  ;;  %v1535_v50 = vshll.u32 %v4926_v52, 16 }
  0xaf   : > { %v1977_v42 = vrot.slane %v1975_v31, 4 }
  0xb0   : > { %v4882_v23 = vpop.permute.xlu2 %2225  ;;  %2557 = vrot.lane.b32.xlu2 %v4813_v46, %s4266_s24  ;;  %v4897_v46 = vrot.slane %v923_v19, 5  ;;  %v2212_v5 = vpop.permute.xlu1 %2211  ;;  %v1627_v19 = vrot.slane %v1625_v10, 5  ;;  %v1637_v32 = vrot.slane %v1635_v27, 4  ;;  %v1539_v10 = vshrl.u32 %v4926_v52, 16 }
  0xb1   : > { %v4958_v11 = vsel %vm2821_vm6, %v4031_v9, %v4882_v23  ;;  %v4969_v56 = vsel %vm2821_vm6, %v4024_v59, %v2212_v5  ;;  %v3656_v9 = vld [vmem:[%s4314_s19 + $0x78] sm:$0xf] }
  0xb2   : > { %2393 = vrot.lane.b32.xlu0 %v4043_v44, %s4264_s22  ;;  %v930_v35 = vor.u32 %v929_v45, %v4897_v46  ;;  %v1395_v44 = vsel %vm4544_vm5, %v1393_v25, %v1394_v62  ;;  %v926_v57 = vsel %vm4342_vm2, %v921_v49, %v4897_v46  ;;  %v1628_v29 = vor.u32 %v1627_v19, %v1624_v53  ;;  %v3718_v46 = vld [vmem:[%s4314_s19 + $0x18] sm:$0xf] }
  0xb3   : > { %2549 = vrot.lane.b32.xlu1 %v4829_v55, %s4266_s24  ;;  %v2705_v55 = vpack.c.b16 %v4892_v24, %v4878_v14  ;;  %v2441_v45 = vpack.c.b16 %v4935_v15, %v4933_v4  ;;  %v4976_v62 = vunpack.c.l.b16 %v926_v57  ;;  %v1526_v49 = vshrl.u32 %v3718_v46, 16  ;;  %v5009_v57 = vld [vmem:[%s4314_s19 + $0x80] sm:$0x1]  ;;  %v3683_v15 = vld [vmem:[%s4314_s19 + $0xb0] sm:$0x1] }
  0xb4   : > { %v931_v7 = vrot.slane %v930_v35, 4  ;;  %v1529_v35 = vshll.u32 %v3718_v46, 16  ;;  %v1643_v53 = vrot.slane %v1641_v16, 5  ;;  %v1130_v19 = vshrl.u32 %v3656_v9, 16  ;;  %v4027_v16 = vld [vmem:[%s4314_s19 + $0x78] sm:$0xff] }
  0xb5   : > { %v1528_v59 = vrot.slane %v1526_v49, 4  ;;  %v1133_v52 = vshll.u32 %v3656_v9, 16  ;;  %v2006_v24 = vrot.slane %v4939_v6, 5 }
  0xb6   : > { %v2210_v58 = vpop.permute.xlu0 %2209  ;;  %v936_v13 = vsel %vm4342_vm2, %v931_v7, %v935_v47  ;;  %v1979_v47 = vsel %vm4544_vm5, %v1977_v42, %v1978_v33  ;;  %v1531_v5 = vrot.slane %v1529_v35, 5  ;;  %v1537_v7 = vrot.slane %v1535_v50, 5 }
  0xb7   : > { %v4972_v23 = vsel %vm2821_vm6, %v4023_v8, %v2210_v58  ;;  %v4978_v51 = vunpack.c.l.b16 %v936_v13  ;;  %v2742_v27 = vunpack.c.l.b16 %v1979_v47  ;;  %v1135_v42 = vrot.slane %v1133_v52, 5  ;;  %v4053_v52 = vld [vmem:[%s4314_s19 + $0x48] sm:$0xff] }
  0xb8   : > { %2725 = vrot.lane.b32.xlu2 %v2701_v1, %s4267_s25  ;;  %v3766_v1 = vld [vmem:[%s4314_s19 + $0x18] sm:$0xe]  ;;  %v2003_v50 = vrot.slane %v4920_v41, 5  ;;  %v4026_v41 = vld [vmem:[%s4314_s19 + $0x6c] sm:$0xff] }
  0xb9   : > { %v2280_v18 = vpop.permute.xlu2 %2279  ;;  %v3782_v63 = vrot.slane %v3766_v1, 9  ;;  %v4999_v1 = vld [vmem:[%s4314_s19 + $0x7c] sm:$0xf]  ;;  %v2437_v9 = vpack.c.b16 %v4978_v51, %v4976_v62  ;;  %v3699_v51 = vld [vmem:[%s4314_s19 + $0xa8] sm:$0xe] }
  0xba   : > { %2477 = vrot.lane.b32.xlu0 %v2449_v22, %s4265_s23  ;;  %v4951_v30 = vsel %vm2870_vm7, %v2827_v20, %v2280_v18  ;;  %v2494_v22 = vunpack.c.l.b16 %v1395_v44  ;;  %v4963_v20 = vrot.slane %v1631_v40, 5  ;;  %v2005_v62 = vrot.slane %v2003_v50, 4 }
  0xbb   : > { %2653 = vrot.lane.b32.xlu1 %v4061_v48, %s4268_s26  ;;  %v4984_v25 = vsel %vm4544_vm5, %v3782_v63, %v1975_v31  ;;  %v1629_v48 = vrot.slane %v1628_v29, 4  ;;  %v1545_v31 = vshll.u32 %v3750_v12, 16  ;;  %v1132_v12 = vrot.slane %v1130_v19, 4 }
  0xbc   : > { %v4980_v39 = vpack.c.b16 %v2494_v22, %v2493_v61  ;;  %v1638_v2 = vor.u32 %v1637_v32, %v4963_v20  ;;  %v2741_v8 = vunpack.c.l.b16 %v4984_v25  ;;  %v1541_v61 = vrot.slane %v1539_v10, 4  ;;  %v3770_v22 = vld [vmem:[%s4314_s19 + $0x48] sm:$0xe] }
  0xbd   : > { %v1634_v58 = vsel %vm4342_vm2, %v1629_v48, %v4963_v20  ;;  %v1547_v13 = vrot.slane %v1545_v31, 5  ;;  %v1143_v32 = vshrl.u32 %v4999_v1, 16  ;;  %v1136_v20 = vor.u32 %v1135_v42, %v1132_v12  ;;  %v4049_v42 = vld [vmem:[%s4314_s19 + $0x18] sm:$0xff] }
  0xbe   : > { %v1639_v44 = vrot.slane %v1638_v2, 4  ;;  %v2218_v18 = vpop.permute.xlu1 %2217  ;;  %v1542_v63 = vor.u32 %v1541_v61, %v1537_v7  ;;  %v3786_v25 = vrot.slane %v3770_v22, 9  ;;  %v5025_v47 = vunpack.c.l.b16 %v1634_v58  ;;  %v3695_v22 = vld [vmem:[%s4314_s19 + $0x78] sm:$0xe] }
  0xbf   : > { %v1145_v35 = vrot.slane %v1143_v32, 4  ;;  %v1137_v10 = vrot.slane %v1136_v20, 4  ;;  %v5042_v31 = vpack.c.b16 %v2742_v27, %v2741_v8  ;;  %v2007_v6 = vsel %vm4544_vm5, %v2005_v62, %v2006_v24 }
  0xc0   : > { %2813 = vrot.lane.b32.xlu2 %v4890_v37, %s4269_s27  ;;  %v1644_v29 = vsel %vm4342_vm2, %v1639_v44, %v1643_v53  ;;  %v1543_v46 = vrot.slane %v1542_v63, 4  ;;  %v2004_v4 = vsel %vm4544_vm5, %v3786_v25, %v2003_v50  ;;  %v3715_v27 = vrot.slane %v3699_v51, 9 }
  0xc1   : > { %v5027_v44 = vunpack.c.l.b16 %v1644_v29  ;;  %v2749_v29 = vunpack.c.l.b16 %v2004_v4  ;;  %v1426_v32 = vrot.slane %v4999_v1, 5  ;;  %v3711_v20 = vrot.slane %v3695_v22, 9 }
  0xc2   : > { %2645 = vrot.lane.b32.xlu0 %v4057_v38, %s4268_s26  ;;  %v2286_v37 = vpop.permute.xlu2 %2285  ;;  %v1149_v38 = vshll.u32 %v5009_v57, 16  ;;  %v1548_v53 = vsel %vm4342_vm2, %v1543_v46, %v1547_v13  ;;  %v1429_v50 = vrot.slane %v5009_v57, 5 }
  0xc3   : > { %2805 = vrot.lane.b32.xlu1 %v4904_v28, %s4269_s27  ;;  %v5003_v40 = vsel %vm2870_vm7, %v4748_v0, %v2286_v37  ;;  %v1532_v28 = vor.u32 %v1531_v5, %v1528_v59  ;;  %v1139_v0 = vshll.u32 %v4999_v1, 16  ;;  %v2854_v5 = vsel %vm2821_vm6, %v4027_v16, %v2218_v18  ;;  %v4030_v37 = vld [vmem:[%s4314_s19 + $0x9c] sm:$0xff] }
  0xc4   : > { %v2216_v2 = vpop.permute.xlu0 %2215  ;;  %v1151_v59 = vrot.slane %v1149_v38, 5  ;;  %v5053_v18 = vunpack.c.l.b16 %v1548_v53  ;;  %v2697_v63 = vpack.c.b16 %v5027_v44, %v5025_v47  ;;  %v5107_v57 = vsel %vm4544_vm5, %v3711_v20, %v1426_v32 }
  0xc5   : > { %v1533_v33 = vrot.slane %v1532_v28, 4  ;;  %v1141_v49 = vrot.slane %v1139_v0, 5  ;;  %v1457_v28 = vrot.slane %v3683_v15, 5 }
  0xc7   : > { %v1538_v48 = vsel %vm4342_vm2, %v1533_v33, %v1537_v7  ;;  %v1142_v13 = vsel %vm4342_vm2, %v1137_v10, %v1141_v49  ;;  %v2750_v33 = vunpack.c.l.b16 %v2007_v6  ;;  %v3736_v10 = vld [vmem:[%s4314_s19 + $0x84] sm:$0xf] }
  0xc8   : > { %2533 = vrot.lane.b32.xlu2 %v4914_v34, %s4266_s24  ;;  %v1146_v34 = vor.u32 %v1145_v35, %v1141_v49  ;;  %v5044_v14 = vunpack.c.l.b16 %v1538_v48  ;;  %v1428_v35 = vrot.slane %v1426_v32, 4  ;;  %v1742_v6 = vshrl.u32 %v3736_v10, 16 }
  0xca   : > { %2733 = vrot.lane.b32.xlu0 %v2705_v55, %s4267_s25  ;;  %v2292_v7 = vpop.permute.xlu2 %2291  ;;  %v3665_v55 = vld [vmem:[%s4314_s19 + $0xac] sm:$0xf]  ;;  %v1147_v19 = vrot.slane %v1146_v34, 4  ;;  %v2693_v16 = vpack.c.b16 %v5053_v18, %v5044_v14 }
  0xcb   : > { %2461 = vrot.lane.b32.xlu1 %v2441_v45, %s4265_s23  ;;  %v5051_v61 = vsel %vm2870_vm7, %v4969_v56, %v2292_v7  ;;  %v3664_v45 = vld [vmem:[%s4314_s19 + $0xa8] sm:$0xf]  ;;  %v1454_v58 = vrot.slane %v3665_v55, 5  ;;  %v5064_v56 = vsel %vm2821_vm6, %v4026_v41, %v2216_v2  ;;  %v5084_v2 = vunpack.c.l.b16 %v1142_v13 }
  0xcc   : > { %v1152_v12 = vsel %vm4342_vm2, %v1147_v19, %v1151_v59  ;;  %v1226_v38 = vshrl.u32 %v3664_v45, 16  ;;  %v1229_v41 = vshll.u32 %v3664_v45, 16  ;;  %v5098_v59 = vpack.c.b16 %v2750_v33, %v2749_v29  ;;  %v5110_v19 = vld [vmem:[%s4314_s19 + $0x88] sm:$0xf] }
  0xcd   : > { %v2224_v8 = vpop.permute.xlu1 %2223  ;;  %v1456_v0 = vrot.slane %v1454_v58, 4  ;;  %v5078_v46 = vsel %vm4544_vm5, %v3715_v27, %v1454_v58  ;;  %v5086_v48 = vunpack.c.l.b16 %v1152_v12  ;;  %v1235_v51 = vshll.u32 %v3665_v55, 16  ;;  %v5119_v58 = vld [vmem:[%s4314_s19 + $0x8c] sm:$0x1] }
  0xce   : > { %v5081_v25 = vsel %vm2821_vm6, %v4030_v37, %v2224_v8  ;;  %v1228_v53 = vrot.slane %v1226_v38, 4  ;;  %v2511_v62 = vunpack.c.l.b16 %v5078_v46  ;;  %v1239_v7 = vshrl.u32 %v3665_v55, 16 }
  0xcf   : > { %v5090_v1 = vsel %vm4544_vm5, %v1456_v0, %v1457_v28  ;;  %v1231_v37 = vrot.slane %v1229_v41, 5  ;;  %v1237_v45 = vrot.slane %v1235_v51, 5  ;;  %v1745_v28 = vshll.u32 %v3736_v10, 16  ;;  %v5125_v0 = vld [vmem:[%s4314_s19 + $0xb8] sm:$0xf]  ;;  %v4029_v10 = vld [vmem:[%s4314_s19 + $0x90] sm:$0xff] }
  0xd0   : > { %2637 = vrot.lane.b32.xlu2 %v4053_v52, %s4268_s26  ;;  %v2512_v24 = vunpack.c.l.b16 %v5090_v1  ;;  %v1241_v8 = vrot.slane %v1239_v7, 4  ;;  %v1245_v52 = vshll.u32 %v3683_v15, 16  ;;  %v1744_v12 = vrot.slane %v1742_v6, 4 }
  0xd1   : > { %v1232_v27 = vor.u32 %v1231_v37, %v1228_v53  ;;  %v2503_v29 = vunpack.c.l.b16 %v5107_v57  ;;  %v1747_v33 = vrot.slane %v1745_v28, 5  ;;  %v1761_v38 = vshll.u32 %v5119_v58, 16  ;;  %v4032_v37 = vld [vmem:[%s4314_s19 + $0xb4] sm:$0xff] }
  0xd2   : > { %2453 = vrot.lane.b32.xlu0 %v2437_v9, %s4265_s23  ;;  %v5093_v49 = vpop.permute.xlu0 %2221  ;;  %v2298_v34 = vpop.permute.xlu2 %2297  ;;  %v1242_v22 = vor.u32 %v1241_v8, %v1237_v45  ;;  %v1247_v13 = vrot.slane %v1245_v52, 5  ;;  %v2066_v1 = vrot.slane %v5125_v0, 5  ;;  %v3775_v52 = vld [vmem:[%s4314_s19 + $0x84] sm:$0xe] }
  0xd3   : > { %2629 = vrot.lane.b32.xlu1 %v4049_v42, %s4268_s26  ;;  %v5102_v9 = vsel %vm2870_vm7, %v2854_v5, %v2298_v34  ;;  %v1430_v5 = vsel %vm4544_vm5, %v1428_v35, %v1429_v50  ;;  %v1751_v42 = vshll.u32 %v5110_v19, 16  ;;  %v1233_v15 = vrot.slane %v1232_v27, 4 }
  0xd4   : > { %v1243_v32 = vrot.slane %v1242_v22, 4  ;;  %v2504_v35 = vunpack.c.l.b16 %v1430_v5  ;;  %v1748_v53 = vor.u32 %v1747_v33, %v1744_v12  ;;  %v2068_v57 = vrot.slane %v2066_v1, 4 }
  0xd5   : > { %v2278_v4 = vpop.permute.xlu1 %2277  ;;  %v1753_v20 = vrot.slane %v1751_v42, 5  ;;  %v1238_v50 = vsel %vm4342_vm2, %v1233_v15, %v1237_v45  ;;  %v2446_v5 = vpack.c.b16 %v5086_v48, %v5084_v2  ;;  %v1763_v27 = vrot.slane %v1761_v38, 5  ;;  %v3744_v15 = vld [vmem:[%s4314_s19 + $0xb4] sm:$0xf]  ;;  %v4046_v48 = vld [vmem:[%s4314_s19 + $0xa8] sm:$0xff] }
  0xd6   : > { %v5114_v55 = vsel %vm2870_vm7, %v4811_v3, %v2278_v4  ;;  %v1755_v3 = vshrl.u32 %v5110_v19, 16  ;;  %v1248_v51 = vsel %vm4342_vm2, %v1243_v32, %v1247_v13  ;;  %v1749_v47 = vrot.slane %v1748_v53, 4  ;;  %v3687_v53 = vld [vmem:[%s4314_s19 + $0x18] sm:$0xe] }
  0xd7   : > { %v5150_v8 = vunpack.c.l.b16 %v1248_v51  ;;  %v2038_v22 = vrot.slane %v5110_v19, 5  ;;  %v5170_v2 = vsel %vm2821_vm6, %v4029_v10, %v5093_v49  ;;  %v2530_v19 = vpack.c.b16 %v2512_v24, %v2511_v62 }
  0xd8   : > { %2789 = vrot.lane.b32.xlu2 %v5042_v31, %s4269_s27  ;;  %v1757_v41 = vrot.slane %v1755_v3, 4  ;;  %v3779_v31 = vld [vmem:[%s4314_s19 + $0xb4] sm:$0xe]  ;;  %v2526_v33 = vpack.c.b16 %v2504_v35, %v2503_v29  ;;  %v1838_v62 = vshrl.u32 %v3744_v15, 16  ;;  %v1841_v24 = vshll.u32 %v3744_v15, 16 }
  0xd9   : > { %v3795_v7 = vrot.slane %v3779_v31, 9  ;;  %v2040_v29 = vrot.slane %v2038_v22, 4  ;;  %v1847_v35 = vshll.u32 %v5125_v0, 16 }
  0xda   : > { %2541 = vrot.lane.b32.xlu0 %v4980_v39, %s4266_s24  ;;  %v2304_v34 = vpop.permute.xlu2 %2303  ;;  %v5143_v39 = vunpack.c.l.b16 %v1238_v50  ;;  %v1758_v44 = vor.u32 %v1757_v41, %v1753_v20  ;;  %v1851_v50 = vshrl.u32 %v5125_v0, 16  ;;  %v1840_v18 = vrot.slane %v1838_v62, 4 }
  0xdb   : > { %2717 = vrot.lane.b32.xlu1 %v2697_v63, %s4267_s25  ;;  %v5148_v45 = vsel %vm2870_vm7, %v5081_v25, %v2304_v34  ;;  %v3763_v63 = vld [vmem:[%s4314_s19 + $0xbc] sm:$0x1]  ;;  %v1754_v25 = vsel %vm4342_vm2, %v1749_v47, %v1753_v20  ;;  %v5165_v42 = vsel %vm4544_vm5, %v3795_v7, %v2066_v1  ;;  %v2041_v1 = vrot.slane %v5119_v58, 5  ;;  %v3648_v7 = vld [vmem:[%s4314_s19 + $0x48] sm:$0xf] }
  0xdc   : > { %v2228_v4 = vpop.permute.xlu0 %2227  ;;  %v2069_v28 = vrot.slane %v3763_v63, 5  ;;  %v1759_v12 = vrot.slane %v1758_v44, 4  ;;  %v2450_v32 = vpack.c.b16 %v5150_v8, %v5143_v39  ;;  %v5180_v20 = vunpack.c.l.b16 %v1754_v25  ;;  %v3641_v44 = vld [vmem:[%s4314_s19 + $0x1c] sm:$0xf] }
  0xdd   : > { %v2284_v6 = vpop.permute.xlu1 %2283  ;;  %v5176_v3 = vsel %vm2821_vm6, %v4032_v37, %v2228_v4  ;;  %v2767_v49 = vunpack.c.l.b16 %v5165_v42  ;;  %v1849_v0 = vrot.slane %v1847_v35, 5  ;;  %v1853_v34 = vrot.slane %v1851_v50, 4 }
  0xde   : > { %v5159_v13 = vsel %vm2870_vm7, %v4834_v36, %v2284_v6  ;;  %v3791_v36 = vrot.slane %v3775_v52, 9  ;;  %v5184_v38 = vsel %vm4544_vm5, %v2068_v57, %v2069_v28  ;;  %v1764_v46 = vsel %vm4342_vm2, %v1759_v12, %v1763_v27  ;;  %v5215_v6 = vld [vmem:[%s4314_s19 + $0x4c] sm:$0xf] }
  0xdf   : > { %v2768_v31 = vunpack.c.l.b16 %v5184_v38  ;;  %v1857_v51 = vshll.u32 %v3763_v63, 16  ;;  %v2680_v4 = vunpack.c.l.b16 %v1764_v46  ;;  %v3703_v52 = vrot.slane %v3687_v53, 9  ;;  %v3640_v46 = vld [vmem:[%s4314_s19 + $0x18] sm:$0xf] }
  0xe0   : > { %2471 = vrot.lane.b32.xlu2 %v2446_v5, %s4265_s23  ;;  %v5202_v14 = vsel %vm4544_vm5, %v3791_v36, %v2038_v22  ;;  %v5223_v63 = vsel %vm4544_vm5, %v2040_v29, %v2041_v1  ;;  %v1370_v5 = vrot.slane %v3641_v44, 5  ;;  %v1034_v22 = vshrl.u32 %v3648_v7, 16  ;;  %v5235_v29 = vld [vmem:[%s4314_s19 + $0x50] sm:$0x1] }
  0xe1   : > { %v1859_v28 = vrot.slane %v1857_v51, 5  ;;  %v1037_v25 = vshll.u32 %v3648_v7, 16  ;;  %v2759_v12 = vunpack.c.l.b16 %v5202_v14  ;;  %v2702_v50 = vpack.c.b16 %v2680_v4, %v5180_v20 }
  0xe2   : > { %2709 = vrot.lane.b32.xlu0 %v2693_v16, %s4267_s25  ;;  %v2374_v41 = vpop.permute.xlu2 %2373  ;;  %v1843_v16 = vrot.slane %v1841_v24, 5  ;;  %v5229_v36 = vsel %vm4544_vm5, %v3703_v52, %v1370_v5  ;;  %v1372_v62 = vrot.slane %v1370_v5, 4  ;;  %v1036_v1 = vrot.slane %v1034_v22, 4  ;;  %v3691_v5 = vld [vmem:[%s4314_s19 + $0x48] sm:$0xe] }
  0xe3   : > { %2399 = vrot.lane.b32.xlu1 %v4046_v48, %s4264_s22  ;;  %v5206_v58 = vsel %vm2903_vm8, %v5114_v55, %v2374_v41  ;;  %v3671_v48 = vld [vmem:[%s4314_s19 + $0x20] sm:$0x1]  ;;  %v1039_v35 = vrot.slane %v1037_v25, 5  ;;  %v2760_v53 = vunpack.c.l.b16 %v5223_v63  ;;  %v938_v7 = vshrl.u32 %v3640_v46, 16  ;;  %v4062_v25 = vld [vmem:[%s4314_s19 + $0xb4] sm:$0xff] }
  0xe4   : > { %v2282_v10 = vpop.permute.xlu0 %2281  ;;  %v1844_v47 = vor.u32 %v1843_v16, %v1840_v18  ;;  %v1373_v24 = vrot.slane %v3671_v48, 5  ;;  %v2487_v18 = vunpack.c.l.b16 %v5229_v36 }
  0xe5   : > { %v5211_v57 = vsel %vm2870_vm7, %v4808_v54, %v2282_v10  ;;  %v2290_v37 = vpop.permute.xlu1 %2289  ;;  %v1854_v54 = vor.u32 %v1853_v34, %v1849_v0  ;;  %v1040_v10 = vor.u32 %v1039_v35, %v1036_v1  ;;  %v940_v22 = vrot.slane %v938_v7, 4 }
  0xe6   : > { %v5219_v55 = vsel %vm2870_vm7, %v4972_v23, %v2290_v37  ;;  %v1845_v27 = vrot.slane %v1844_v47, 4  ;;  %v1043_v23 = vshll.u32 %v5215_v6, 16  ;;  %v941_v37 = vshll.u32 %v3640_v46, 16 }
  0xe7   : > { %v1855_v15 = vrot.slane %v1854_v54, 4  ;;  %v1374_v52 = vsel %vm4544_vm5, %v1372_v62, %v1373_v24  ;;  %v1041_v54 = vrot.slane %v1040_v10, 4  ;;  %v951_v46 = vshrl.u32 %v3641_v44, 16 }
  0xe8   : > { %2559 = vrot.lane.b32.xlu2 %v2530_v19, %s4266_s24  ;;  %v1850_v41 = vsel %vm4342_vm2, %v1845_v27, %v1849_v0  ;;  %v1045_v34 = vrot.slane %v1043_v23, 5  ;;  %v1053_v0 = vshll.u32 %v5235_v29, 16  ;;  %v947_v23 = vshll.u32 %v3641_v44, 16 }
  0xe9   : > { %v1860_v16 = vsel %vm4342_vm2, %v1855_v15, %v1859_v28  ;;  %v5257_v47 = vunpack.c.l.b16 %v1850_v41  ;;  %v943_v15 = vrot.slane %v941_v37, 5  ;;  %v957_v24 = vshll.u32 %v3671_v48, 16  ;;  %v3767_v48 = vld [vmem:[%s4314_s19 + $0x24] sm:$0xe] }
  0xea   : > { %2797 = vrot.lane.b32.xlu0 %v5098_v59, %s4269_s27  ;;  %v2380_v19 = vpop.permute.xlu2 %2379  ;;  %v1047_v59 = vshrl.u32 %v5215_v6, 16  ;;  %v5266_v27 = vunpack.c.l.b16 %v1860_v16  ;;  %v1055_v62 = vrot.slane %v1053_v0, 5  ;;  %v3707_v35 = vrot.slane %v3691_v5, 9 }
  0xeb   : > { %2551 = vrot.lane.b32.xlu1 %v2526_v33, %s4266_s24  ;;  %v5250_v51 = vsel %vm2903_vm8, %v5159_v13, %v2380_v19  ;;  %v949_v41 = vrot.slane %v947_v23, 5  ;;  %v953_v19 = vrot.slane %v951_v46, 4  ;;  %v1398_v16 = vrot.slane %v5215_v6, 5 }
  0xec   : > { %v2288_v20 = vpop.permute.xlu0 %2287  ;;  %v1049_v28 = vrot.slane %v1047_v59, 4  ;;  %v2488_v10 = vunpack.c.l.b16 %v1374_v52  ;;  %v1401_v44 = vrot.slane %v5235_v29, 5  ;;  %v959_v0 = vrot.slane %v957_v24, 5 }
  0xed   : > { %v5255_v33 = vsel %vm2870_vm7, %v4752_v21, %v2288_v20  ;;  %v2296_v4 = vpop.permute.xlu1 %2295  ;;  %v1046_v21 = vsel %vm4342_vm2, %v1041_v54, %v1045_v34  ;;  %v954_v6 = vor.u32 %v953_v19, %v949_v41  ;;  %v1400_v7 = vrot.slane %v1398_v16, 4 }
  0xee   : > { %v5264_v13 = vsel %vm2870_vm7, %v5064_v56, %v2296_v4  ;;  %v1050_v1 = vor.u32 %v1049_v28, %v1045_v34  ;;  %v944_v56 = vor.u32 %v943_v15, %v940_v22  ;;  %v5277_v20 = vunpack.c.l.b16 %v1046_v21  ;;  %v5303_v28 = vld [vmem:[%s4314_s19 + $0x28] sm:$0xf]  ;;  %v3728_v22 = vld [vmem:[%s4314_s19 + $0x54] sm:$0xf] }
  0xef   : > { %v3783_v29 = vrot.slane %v3767_v48, 9  ;;  %v2786_v52 = vpack.c.b16 %v2768_v31, %v2767_v49  ;;  %v955_v5 = vrot.slane %v954_v6, 4  ;;  %v2782_v42 = vpack.c.b16 %v2760_v53, %v2759_v12  ;;  %v5321_v31 = vld [vmem:[%s4314_s19 + $0x58] sm:$0xf]  ;;  %v5331_v12 = vld [vmem:[%s4314_s19 + $0x5c] sm:$0x1] }
  0xf0   : > { %2727 = vrot.lane.b32.xlu2 %v2702_v50, %s4267_s25  ;;  %v1051_v59 = vrot.slane %v1050_v1, 4  ;;  %v945_v34 = vrot.slane %v944_v56, 4  ;;  %v5317_v38 = vsel %vm4544_vm5, %v1400_v7, %v1401_v44  ;;  %v1982_v49 = vrot.slane %v5303_v28, 5 }
  0xf1   : > { %v2706_v15 = vpack.c.b16 %v5266_v27, %v5257_v47  ;;  %v960_v14 = vsel %vm4342_vm2, %v955_v5, %v959_v0  ;;  %v1646_v47 = vshrl.u32 %v3728_v22, 16  ;;  %v2496_v36 = vunpack.c.l.b16 %v5317_v38 }
  0xf2   : > { %2479 = vrot.lane.b32.xlu0 %v2450_v32, %s4265_s23  ;;  %v2386_v50 = vpop.permute.xlu2 %2385  ;;  %v1056_v8 = vsel %vm4342_vm2, %v1051_v59, %v1055_v62  ;;  %v5292_v32 = vsel %vm4544_vm5, %v3707_v35, %v1398_v16  ;;  %v5339_v46 = vsel %vm4544_vm5, %v3783_v29, %v1982_v49  ;;  %v1655_v27 = vshll.u32 %v5321_v31, 16  ;;  %v3720_v62 = vld [vmem:[%s4314_s19 + $0x24] sm:$0xf]  ;;  %v3751_v35 = vld [vmem:[%s4314_s19 + $0x2c] sm:$0x1] }
  0xf3   : > { %2655 = vrot.lane.b32.xlu1 %v4062_v25, %s4268_s26  ;;  %v5286_v39 = vsel %vm2903_vm8, %v5219_v55, %v2386_v50  ;;  %v5298_v54 = vunpack.c.l.b16 %v1056_v8  ;;  %v950_v55 = vsel %vm4342_vm2, %v945_v34, %v949_v41  ;;  %v4058_v25 = vld [vmem:[%s4314_s19 + $0x84] sm:$0xff]  ;;  %v2495_v63 = vunpack.c.l.b16 %v5292_v32 }
  0xf4   : > { %v5282_v37 = vpop.permute.xlu0 %2293  ;;  %v5335_v23 = vunpack.c.l.b16 %v950_v55  ;;  %v1659_v1 = vshrl.u32 %v5321_v31, 16  ;;  %v5347_v24 = vunpack.c.l.b16 %v960_v14  ;;  %v1984_v56 = vrot.slane %v1982_v49, 4 }
  0xf5   : > { %v2302_v4 = vpop.permute.xlu1 %2301  ;;  %v2442_v53 = vpack.c.b16 %v5298_v54, %v5277_v20  ;;  %v1648_v41 = vrot.slane %v1646_v47, 4  ;;  %v1665_v19 = vshll.u32 %v5331_v12, 16  ;;  %v1657_v20 = vrot.slane %v1655_v27, 5  ;;  %v3658_v54 = vld [vmem:[%s4314_s19 + $0x84] sm:$0xf] }
  0xf6   : > { %v5309_v21 = vsel %vm2870_vm7, %v5170_v2, %v2302_v4  ;;  %v2518_v2 = vpack.c.b16 %v2488_v10, %v2487_v18  ;;  %v1649_v18 = vshll.u32 %v3728_v22, 16  ;;  %v1985_v10 = vrot.slane %v3751_v35, 5 }
  0xf7   : > { %v1661_v44 = vrot.slane %v1659_v1, 4  ;;  %v2743_v34 = vunpack.c.l.b16 %v5339_v46  ;;  %v1550_v6 = vshrl.u32 %v3720_v62, 16  ;;  %v1553_v0 = vshll.u32 %v3720_v62, 16 }
  0xf8   : > { %2815 = vrot.lane.b32.xlu2 %v2786_v52, %s4269_s27  ;;  %v1651_v59 = vrot.slane %v1649_v18, 5  ;;  %v1667_v52 = vrot.slane %v1665_v19, 5  ;;  %v1559_v22 = vshll.u32 %v5303_v28, 16  ;;  %v1569_v49 = vshll.u32 %v3751_v35, 16  ;;  %v5369_v18 = vld [vmem:[%s4314_s19 + $0x88] sm:$0xf] }
  0xf9   : > { %v1662_v4 = vor.u32 %v1661_v44, %v1657_v20  ;;  %v1555_v5 = vrot.slane %v1553_v0, 5  ;;  %v1154_v27 = vshrl.u32 %v3658_v54, 16  ;;  %v1157_v1 = vshll.u32 %v3658_v54, 16  ;;  %v5379_v35 = vld [vmem:[%s4314_s19 + $0x8c] sm:$0x1] }
  0xfa   : > { %2647 = vrot.lane.b32.xlu0 %v4058_v25, %s4268_s26  ;;  %v2392_v16 = vpop.permute.xlu2 %2391  ;;  %v1652_v29 = vor.u32 %v1651_v59, %v1648_v41  ;;  %v1561_v47 = vrot.slane %v1559_v22, 5  ;;  %v1986_v62 = vsel %vm4544_vm5, %v1984_v56, %v1985_v10  ;;  %v1163_v10 = vshll.u32 %v5369_v18, 16 }
  0xfb   : > { %2807 = vrot.lane.b32.xlu1 %v2782_v42, %s4269_s27  ;;  %v5354_v50 = vsel %vm2903_vm8, %v5264_v13, %v2392_v16  ;;  %v1552_v13 = vrot.slane %v1550_v6, 4  ;;  %v1663_v42 = vrot.slane %v1662_v4, 4  ;;  %v1571_v16 = vrot.slane %v1569_v49, 5 }
  0xfc   : > { %v2300_v48 = vpop.permute.xlu0 %2299  ;;  %v1653_v25 = vrot.slane %v1652_v29, 4  ;;  %v1156_v59 = vrot.slane %v1154_v27, 4  ;;  %v1159_v56 = vrot.slane %v1157_v1, 5  ;;  %v2010_v27 = vrot.slane %v5321_v31, 5  ;;  %v3667_v1 = vld [vmem:[%s4314_s19 + $0xb8] sm:$0xf] }
  0xfd   : > { %v5359_v7 = vsel %vm2870_vm7, %v4827_v43, %v2300_v48  ;;  %v2308_v8 = vpop.permute.xlu1 %2307  ;;  %v1563_v43 = vshrl.u32 %v5303_v28, 16  ;;  %v1556_v14 = vor.u32 %v1555_v5, %v1552_v13  ;;  %v1668_v19 = vsel %vm4342_vm2, %v1663_v42, %v1667_v52  ;;  %v4054_v52 = vld [vmem:[%s4314_s19 + $0x54] sm:$0xff] }
  0xfe   : > { %v5364_v55 = vsel %vm2870_vm7, %v5176_v3, %v2308_v8  ;;  %v2438_v3 = vpack.c.b16 %v5347_v24, %v5335_v23  ;;  %v1658_v41 = vsel %vm4342_vm2, %v1653_v25, %v1657_v20  ;;  %v1167_v20 = vshrl.u32 %v5369_v18, 16  ;;  %v4050_v25 = vld [vmem:[%s4314_s19 + $0x24] sm:$0xff] }
  0xff   : > { %v1565_v28 = vrot.slane %v1563_v43, 4  ;;  %v2744_v48 = vunpack.c.l.b16 %v1986_v62  ;;  %v5390_v6 = vunpack.c.l.b16 %v1658_v41  ;;  %v1173_v8 = vshll.u32 %v5379_v35, 16  ;;  %v3700_v62 = vld [vmem:[%s4314_s19 + $0xb4] sm:$0xe] }
 0x100   : > { %2535 = vrot.lane.b32.xlu2 %v2518_v2, %s4266_s24  ;;  %v1557_v2 = vrot.slane %v1556_v14, 4  ;;  %v5401_v54 = vunpack.c.l.b16 %v1668_v19  ;;  %v1160_v5 = vor.u32 %v1159_v56, %v1156_v59  ;;  %v1165_v42 = vrot.slane %v1163_v10, 5 }
 0x101   : > { %v1566_v24 = vor.u32 %v1565_v28, %v1561_v47  ;;  %v1169_v43 = vrot.slane %v1167_v20, 4  ;;  %v1175_v28 = vrot.slane %v1173_v8, 5  ;;  %v1461_v19 = vrot.slane %v3667_v1, 5 }
 0x102   : > { %2735 = vrot.lane.b32.xlu0 %v2706_v15, %s4267_s25  ;;  %v5385_v23 = vpop.permute.xlu2 %2469  ;;  %v3771_v15 = vld [vmem:[%s4314_s19 + $0x54] sm:$0xe]  ;;  %v1562_v0 = vsel %vm4342_vm2, %v1557_v2, %v1561_v47  ;;  %v1161_v47 = vrot.slane %v1160_v5, 4  ;;  %v2013_v59 = vrot.slane %v5331_v12, 5  ;;  %v3716_v10 = vrot.slane %v3700_v62, 9 }
 0x103   : > { %2463 = vrot.lane.b32.xlu1 %v2442_v53, %s4265_s23  ;;  %v4025_v53 = vld [vmem:[%s4314_s19 + $0x60] sm:$0xff]  ;;  %v1567_v13 = vrot.slane %v1566_v24, 4  ;;  %v3787_v49 = vrot.slane %v3771_v15, 9  ;;  %v5410_v14 = vunpack.c.l.b16 %v1562_v0  ;;  %v5424_v24 = vld [vmem:[%s4314_s19 + $0xbc] sm:$0x1]  ;;  %v1463_v0 = vrot.slane %v1461_v19, 4 }
 0x104   : > { %v2306_v44 = vpop.permute.xlu0 %2305  ;;  %v5419_v2 = vsel %vm2821_vm6, %v4025_v53, %v4760_v17  ;;  %v1166_v31 = vsel %vm4342_vm2, %v1161_v47, %v1165_v42  ;;  %v1464_v20 = vrot.slane %v5424_v24, 5  ;;  %v3696_v15 = vld [vmem:[%s4314_s19 + $0x84] sm:$0xe]  ;;  %v2522_v17 = vpack.c.b16 %v2496_v36, %v2495_v63  ;;  %v3666_v36 = vld [vmem:[%s4314_s19 + $0xb4] sm:$0xf] }
 0x105   : > { %v5398_v29 = vsel %vm2870_vm7, %v4958_v11, %v2306_v44  ;;  %v2378_v4 = vpop.permute.xlu1 %2377  ;;  %v1572_v11 = vsel %vm4342_vm2, %v1567_v13, %v1571_v16  ;;  %v2012_v16 = vrot.slane %v2010_v27, 4  ;;  %v5442_v44 = vsel %vm4544_vm5, %v3787_v49, %v2010_v27 }
 0x106   : > { %v5405_v22 = vsel %vm2903_vm8, %v5211_v57, %v2378_v4  ;;  %v5415_v41 = vunpack.c.l.b16 %v1572_v11  ;;  %v1170_v57 = vor.u32 %v1169_v43, %v1165_v42  ;;  %v2698_v53 = vpack.c.b16 %v5401_v54, %v5390_v6 }
 0x107   : > { %v1433_v63 = vrot.slane %v5369_v18, 5  ;;  %v2014_v4 = vsel %vm4544_vm5, %v2012_v16, %v2013_v59  ;;  %v3712_v6 = vrot.slane %v3696_v15, 9  ;;  %v2751_v54 = vunpack.c.l.b16 %v5442_v44 }
 0x108   : > { %2639 = vrot.lane.b32.xlu2 %v4054_v52, %s4268_s26  ;;  %v1171_v56 = vrot.slane %v1170_v57, 4  ;;  %v2694_v32 = vpack.c.b16 %v5415_v41, %v5410_v14  ;;  %v1462_v18 = vsel %vm4544_vm5, %v3716_v10, %v1461_v19  ;;  %v1250_v42 = vshrl.u32 %v3666_v36, 16  ;;  %v5473_v19 = vld [vmem:[%s4314_s19 + $0x94] sm:$0xf] }
 0x109   : > { %v1435_v5 = vrot.slane %v1433_v63, 4  ;;  %v2752_v43 = vunpack.c.l.b16 %v2014_v4  ;;  %v1253_v49 = vshll.u32 %v3666_v36, 16  ;;  %v1259_v11 = vshll.u32 %v3667_v1, 16 }
 0x10a   : > { %2455 = vrot.lane.b32.xlu0 %v2438_v3, %s4265_s23  ;;  %v5436_v12 = vpop.permute.xlu2 %2557  ;;  %v2774_v3 = vpack.c.b16 %v2744_v48, %v2743_v34  ;;  %v1176_v38 = vsel %vm4342_vm2, %v1171_v56, %v1175_v28  ;;  %v2425_v48 = vunpack.c.l.b16 %v1166_v31  ;;  %v1263_v47 = vshrl.u32 %v3667_v1, 16 }
 0x10b   : > { %2631 = vrot.lane.b32.xlu1 %v4050_v25, %s4268_s26  ;;  %v2426_v13 = vunpack.c.l.b16 %v1176_v38  ;;  %v1436_v25 = vrot.slane %v5379_v35, 5  ;;  %v2513_v27 = vunpack.c.l.b16 %v1462_v18  ;;  %v1434_v57 = vsel %vm4544_vm5, %v3712_v6, %v1433_v63 }
 0x10c   : > { %v2376_v8 = vpop.permute.xlu0 %2375  ;;  %v1252_v28 = vrot.slane %v1250_v42, 4  ;;  %v1255_v35 = vrot.slane %v1253_v49, 5  ;;  %v5476_v16 = vrot.slane %v1259_v11, 5  ;;  %v1265_v59 = vrot.slane %v1263_v47, 4 }
 0x10d   : > { %v5454_v46 = vsel %vm2903_vm8, %v4951_v30, %v2376_v8  ;;  %v2384_v34 = vpop.permute.xlu1 %2383  ;;  %v1465_v30 = vsel %vm4544_vm5, %v1463_v0, %v1464_v20  ;;  %v1269_v1 = vshll.u32 %v5424_v24, 16  ;;  %v2447_v56 = vpack.c.b16 %v2426_v13, %v2425_v48  ;;  %v5486_v8 = vld [vmem:[%s4314_s19 + $0x98] sm:$0x1]  ;;  %v3105_v48 = vld [vmem:[%s6190_s1 + $0x10] sm:$0x3] }
 0x10e   : > { %v5460_v52 = vsel %vm2903_vm8, %v5255_v33, %v2384_v34  ;;  %v3738_v33 = vld [vmem:[%s4314_s19 + $0x90] sm:$0xf]  ;;  %v2514_v62 = vunpack.c.l.b16 %v1465_v30  ;;  %v1437_v10 = vsel %vm4544_vm5, %v1435_v5, %v1436_v25  ;;  %v2505_v44 = vunpack.c.l.b16 %v1434_v57  ;;  %v4047_v13 = vld [vmem:[%s4314_s19 + $0xb4] sm:$0xff] }
 0x10f   : > { %v1766_v20 = vshrl.u32 %v3738_v33, 16  ;;  %v1769_v15 = vshll.u32 %v3738_v33, 16  ;;  %v1266_v0 = vor.u32 %v1265_v59, %v5476_v16  ;;  %v1775_v24 = vshll.u32 %v5473_v19, 16 }
 0x110   : > { %2791 = vrot.lane.b32.xlu2 %v2774_v3, %s4269_s27  ;;  %v1779_v34 = vshrl.u32 %v5473_v19, 16  ;;  %v2506_v4 = vunpack.c.l.b16 %v1437_v10  ;;  %v1271_v18 = vrot.slane %v1269_v1, 5  ;;  %v2888_v49 = vsel %vm2870_vm7, %v5419_v2, %v5282_v37  ;;  %v5509_v2 = vld [vmem:[%s4314_s19 + $0xc4] sm:$0xf] }
 0x111   : > { %v1768_v63 = vrot.slane %v1766_v20, 4  ;;  %v1771_v36 = vrot.slane %v1769_v15, 5  ;;  %v1777_v30 = vrot.slane %v1775_v24, 5  ;;  %v1267_v5 = vrot.slane %v1266_v0, 4  ;;  %v5526_v15 = vld [vmem:[%s4314_s19 + $0xc8] sm:$0x1] }
 0x112   : > { %2543 = vrot.lane.b32.xlu0 %v2522_v17, %s4266_s24  ;;  %v5480_v31 = vpop.permute.xlu2 %2725  ;;  %v1256_v17 = vor.u32 %v1255_v35, %v1252_v28  ;;  %v1781_v42 = vrot.slane %v1779_v34, 4  ;;  %v2778_v11 = vpack.c.b16 %v2752_v43, %v2751_v54  ;;  %v3119_v47 = vunpack.c.l.b16 %v3105_v48  ;;  %v3780_v35 = vld [vmem:[%s4314_s19 + $0xc0] sm:$0xe]  ;;  %v4066_v24 = vld [vmem:[%s6190_s1 + $0x8] sm:$0xff] }
 0x113   : > { %2719 = vrot.lane.b32.xlu1 %v2698_v53, %s4267_s25  ;;  %v1772_v25 = vor.u32 %v1771_v36, %v1768_v63  ;;  %v2531_v33 = vpack.c.b16 %v2514_v62, %v2513_v27  ;;  %v2527_v59 = vpack.c.b16 %v2506_v4, %v2505_v44  ;;  %v1272_v14 = vsel %vm4342_vm2, %v1267_v5, %v1271_v18  ;;  %v3776_v27 = vld [vmem:[%s4314_s19 + $0x90] sm:$0xe]  ;;  %v3746_v44 = vld [vmem:[%s4314_s19 + $0xc0] sm:$0xf] }
 0x114   : > { %v2382_v3 = vpop.permute.xlu0 %2381  ;;  %v1257_v6 = vrot.slane %v1256_v17, 4  ;;  %v1782_v28 = vor.u32 %v1781_v42, %v1777_v30  ;;  %v3122_v37 = vpack.c.b16 %v3119_v47, %v3119_v47  ;;  %v2076_v63 = vrot.slane %v5526_v15, 5  ;;  %v4065_v47 = vld [vmem:[%s6190_s1] sm:$0xff] }
 0x115   : > { %v5491_v53 = vsel %vm2903_vm8, %v5003_v40, %v2382_v3  ;;  %v2390_v38 = vpop.permute.xlu1 %2389  ;;  %v1785_v40 = vshll.u32 %v5486_v8, 16  ;;  %v1773_v57 = vrot.slane %v1772_v25, 4  ;;  %v3796_v3 = vrot.slane %v3780_v35, 9  ;;  %v3688_v35 = vld [vmem:[%s4314_s19 + $0x24] sm:$0xe] }
 0x116   : > { %v1262_v43 = vsel %vm4342_vm2, %v1257_v6, %v5476_v16  ;;  %v1783_v41 = vrot.slane %v1782_v28, 4  ;;  %v2921_v62 = vsel %vm2903_vm8, %v2888_v49, %v2390_v38  ;;  %v3160_v20 = vsel %vm3158_vm9, %v3122_v37, 0 }
 0x117   : > { %v1787_v1 = vrot.slane %v1785_v40, 5  ;;  %v1778_v10 = vsel %vm4342_vm2, %v1773_v57, %v1777_v30  ;;  %4068 = vmatpush.bf16.msra.mxu2 %v3160_v20  ;;  %4069 = vmatpush.bf16.msra.mxu3 %v3160_v20  ;;  %v5539_v36 = vunpack.c.l.b16 %v1262_v43  ;;  %v5541_v34 = vunpack.c.l.b16 %v1272_v14 }
 0x118   : > { %2473 = vrot.lane.b32.xlu2 %v2447_v56, %s4265_s23  ;;  %v3792_v48 = vrot.slane %v3776_v27, 9  ;;  %3167 = vmatpush.bf16.msra.mxu0 %v3160_v20  ;;  %v5546_v4 = vsel %vm2936_vm10, %v2921_v62, %v5385_v23  ;;  %v5548_v6 = vunpack.c.l.b16 %v1778_v10  ;;  %v1862_v18 = vshrl.u32 %v3746_v44, 16 }
 0x119   : > { %v1788_v0 = vsel %vm4342_vm2, %v1783_v41, %v1787_v1  ;;  %4067 = vmatpush.bf16.msra.mxu1 %v3160_v20  ;;  %v1865_v30 = vshll.u32 %v3746_v44, 16  ;;  %v2048_v42 = vrot.slane %v5486_v8, 5  ;;  %v1871_v49 = vshll.u32 %v5509_v2, 16  ;;  %v5590_v44 = vld [vmem:[%s4314_s19 + $0x2c] sm:$0x1] }
 0x11a   : > { %2711 = vrot.lane.b32.xlu0 %v2694_v32, %s4267_s25  ;;  %v5512_v54 = vpop.permute.xlu2 %2813  ;;  %v2073_v32 = vrot.slane %v5509_v2, 5  ;;  %v1864_v23 = vrot.slane %v1862_v18, 4  ;;  %v2451_v57 = vpack.c.b16 %v5541_v34, %v5539_v36  ;;  %v1881_v28 = vshll.u32 %v5526_v15, 16  ;;  %v4063_v36 = vld [vmem:[%s4314_s19 + $0xc0] sm:$0xff]  ;;  %v5596_v34 = vld [vmem:[%s4314_s19 + $0x5c] sm:$0x1] }
 0x11b   : > { %2401 = vrot.lane.b32.xlu1 %v4047_v13, %s4264_s22  ;;  %v2682_v13 = vunpack.c.l.b16 %v1788_v0  ;;  %4071 = vmatpush.bf16.msra.mxu2 %v4066_v24  ;;  %v1867_v40 = vrot.slane %v1865_v30, 5  ;;  %v1873_v14 = vrot.slane %v1871_v49, 5 }
 0x11c   : > { %v2388_v56 = vpop.permute.xlu0 %2387  ;;  %v2075_v38 = vrot.slane %v2073_v32, 4  ;;  %v2074_v5 = vsel %vm4544_vm5, %v3796_v3, %v2073_v32  ;;  %4072 = vmatpush.bf16.msra.mxu3 %v4066_v24  ;;  %3168 = vmatpush.bf16.msra.mxu0 %v4066_v24  ;;  %v5587_v3 = vld [vmem:[%s4314_s19 + $0x28] sm:$0xf] }
 0x11d   : > { %v5531_v16 = vsel %vm2903_vm8, %v5051_v61, %v2388_v56  ;;  %v2398_v17 = vpop.permute.xlu1 %2397  ;;  %v2045_v61 = vrot.slane %v5473_v19, 5  ;;  %v2769_v37 = vunpack.c.l.b16 %v2074_v5  ;;  %v1868_v43 = vor.u32 %v1867_v40, %v1864_v23  ;;  %v5580_v56 = vld [vmem:[%s4314_s19 + $0x58] sm:$0xf]  ;;  %4070 = vmatpush.bf16.msra.mxu1 %v4066_v24 }
 0x11e   : > { %v2077_v19 = vsel %vm4544_vm5, %v2075_v38, %v2076_v63  ;;  %v5570_v1 = vsel %vm2903_vm8, %v5309_v21, %v2398_v17  ;;  %v3650_v21 = vld [vmem:[%s4314_s19 + $0x54] sm:$0xf]  ;;  %v3704_v17 = vrot.slane %v3688_v35, 9  ;;  %v1883_v38 = vrot.slane %v1881_v28, 5 }
 0x11f   : > { %v2047_v25 = vrot.slane %v2045_v61, 4  ;;  %v2046_v8 = vsel %vm4544_vm5, %v3792_v48, %v2045_v61  ;;  %v2770_v32 = vunpack.c.l.b16 %v2077_v19  ;;  %v1869_v15 = vrot.slane %v1868_v43, 4  ;;  %4074 = vmatpush.bf16.msra.mxu2 %v4065_v47 }
 0x120   : > { %2561 = vrot.lane.b32.xlu2 %v2531_v33, %s4266_s24  ;;  %v1875_v33 = vshrl.u32 %v5509_v2, 16  ;;  %v2703_v2 = vpack.c.b16 %v2682_v13, %v5548_v6  ;;  %v2761_v20 = vunpack.c.l.b16 %v2046_v8  ;;  %4075 = vmatpush.bf16.msra.mxu3 %v4065_v47  ;;  %v1377_v24 = vrot.slane %v5587_v3, 5 }
 0x121   : > { %v2049_v27 = vsel %vm4544_vm5, %v2047_v25, %v2048_v42  ;;  %v1380_v63 = vrot.slane %v5590_v44, 5  ;;  %v1058_v48 = vshrl.u32 %v3650_v21, 16  ;;  %v1061_v61 = vshll.u32 %v3650_v21, 16  ;;  %3169 = vmatpush.bf16.msra.mxu0 %v4065_v47  ;;  %v3642_v25 = vld [vmem:[%s4314_s19 + $0x24] sm:$0xf]  ;;  %4073 = vmatpush.bf16.msra.mxu1 %v4065_v47 }
 0x122   : > { %2799 = vrot.lane.b32.xlu0 %v2778_v11, %s4269_s27  ;;  %v5573_v11 = vpop.permute.xlu2 %2533  ;;  %v1877_v62 = vrot.slane %v1875_v33, 4  ;;  %v1067_v6 = vshll.u32 %v5580_v56, 16  ;;  %v2787_v18 = vpack.c.b16 %v2770_v32, %v2769_v37  ;;  %v1874_v30 = vsel %vm4342_vm2, %v1869_v15, %v1873_v14 }
 0x123   : > { %2553 = vrot.lane.b32.xlu1 %v2527_v59, %s4266_s24  ;;  %v1379_v5 = vrot.slane %v1377_v24, 4  ;;  %v1378_v42 = vsel %vm4544_vm5, %v3704_v17, %v1377_v24  ;;  %v1060_v19 = vrot.slane %v1058_v48, 4  ;;  %v1063_v23 = vrot.slane %v1061_v61, 5 }
 0x124   : > { %v2394_v41 = vpop.permute.xlu0 %2393  ;;  %v1878_v0 = vor.u32 %v1877_v62, %v1873_v14  ;;  %v1069_v40 = vrot.slane %v1067_v6, 5  ;;  %v1071_v33 = vshrl.u32 %v5580_v56, 16  ;;  %v1077_v47 = vshll.u32 %v5596_v34, 16 }
 0x125   : > { %v5584_v59 = vsel %vm2903_vm8, %v5102_v9, %v2394_v41  ;;  %v2550_v10 = vpop.permute.xlu1 %2549  ;;  %v2762_v9 = vunpack.c.l.b16 %v2049_v27  ;;  %v1381_v8 = vsel %vm4544_vm5, %v1379_v5, %v1380_v63  ;;  %v5615_v37 = vunpack.c.l.b16 %v1874_v30 }
 0x126   : > { %v1879_v13 = vrot.slane %v1878_v0, 4  ;;  %v962_v43 = vshrl.u32 %v3642_v25, 16  ;;  %v965_v32 = vshll.u32 %v3642_v25, 16  ;;  %v971_v27 = vshll.u32 %v5587_v3, 16  ;;  %v4059_v0 = vld [vmem:[%s4314_s19 + $0x90] sm:$0xff] }
 0x127   : > { %v2783_v35 = vpack.c.b16 %v2762_v9, %v2761_v20  ;;  %v2987_v62 = vsel %vm2969_vm11, %v5546_v4, %v2550_v10  ;;  %v2489_v20 = vunpack.c.l.b16 %v1378_v42  ;;  %v2490_v15 = vunpack.c.l.b16 %v1381_v8  ;;  %v3692_v9 = vld [vmem:[%s4314_s19 + $0x54] sm:$0xe] }
 0x128   : > { %2729 = vrot.lane.b32.xlu2 %v2703_v2, %s4267_s25  ;;  %v1884_v49 = vsel %vm4342_vm2, %v1879_v13, %v1883_v38  ;;  %v1073_v2 = vrot.slane %v1071_v33, 4  ;;  %v1079_v24 = vrot.slane %v1077_v47, 5  ;;  %v964_v63 = vrot.slane %v962_v43, 4 }
 0x129   : > { %v5617_v41 = vunpack.c.l.b16 %v1884_v49  ;;  %v973_v6 = vrot.slane %v971_v27, 5  ;;  %v975_v4 = vshrl.u32 %v5587_v3, 16  ;;  %v981_v5 = vshll.u32 %v5590_v44, 16 }
 0x12a   : > { %2481 = vrot.lane.b32.xlu0 %v2451_v57, %s4265_s23  ;;  %v5613_v28 = vpop.permute.xlu2 %2637  ;;  %v1064_v57 = vor.u32 %v1063_v23, %v1060_v19  ;;  %v1074_v38 = vor.u32 %v1073_v2, %v1069_v40  ;;  %v2519_v25 = vpack.c.b16 %v2490_v15, %v2489_v20  ;;  %v3708_v19 = vrot.slane %v3692_v9, 9  ;;  %v3768_v23 = vld [vmem:[%s4314_s19 + $0x30] sm:$0xe]  ;;  %v3730_v15 = vld [vmem:[%s4314_s19 + $0x60] sm:$0xf] }
 0x12b   : > { %2657 = vrot.lane.b32.xlu1 %v4063_v36, %s4268_s26  ;;  %v967_v36 = vrot.slane %v965_v32, 5  ;;  %v2707_v10 = vpack.c.b16 %v5617_v41, %v5615_v37  ;;  %v977_v42 = vrot.slane %v975_v4, 4  ;;  %v1408_v8 = vrot.slane %v5596_v34, 5  ;;  %v5643_v37 = vld [vmem:[%s4314_s19 + $0x34] sm:$0xf] }
 0x12c   : > { %v2478_v14 = vpop.permute.xlu0 %2477  ;;  %v1065_v17 = vrot.slane %v1064_v57, 4  ;;  %v1075_v30 = vrot.slane %v1074_v38, 4  ;;  %v983_v47 = vrot.slane %v981_v5, 5  ;;  %v5652_v34 = vld [vmem:[%s4314_s19 + $0x38] sm:$0x1]  ;;  %v1989_v41 = vrot.slane %v5643_v37, 5 }
 0x12d   : > { %v2654_v21 = vpop.permute.xlu1 %2653  ;;  %v2962_v48 = vsel %vm2936_vm10, %v5570_v1, %v2478_v14  ;;  %v968_v13 = vor.u32 %v967_v36, %v964_v63  ;;  %v1405_v1 = vrot.slane %v5580_v56, 5  ;;  %v978_v33 = vor.u32 %v977_v42, %v973_v6  ;;  %v5666_v63 = vld [vmem:[%s4314_s19 + $0x64] sm:$0xf] }
 0x12e   : > { %v1070_v61 = vsel %vm4342_vm2, %v1065_v17, %v1069_v40  ;;  %v1080_v3 = vsel %vm4342_vm2, %v1075_v30, %v1079_v24  ;;  %v2995_v57 = vsel %vm2969_vm11, %v2962_v48, %v5436_v12  ;;  %v1992_v12 = vrot.slane %v5652_v34, 5  ;;  %v3722_v30 = vld [vmem:[%s4314_s19 + $0x30] sm:$0xf] }
 0x12f   : > { %v2417_v40 = vunpack.c.l.b16 %v1070_v61  ;;  %v969_v49 = vrot.slane %v968_v13, 4  ;;  %v1407_v56 = vrot.slane %v1405_v1, 4  ;;  %v5649_v14 = vsel %vm4544_vm5, %v3708_v19, %v1405_v1  ;;  %v5673_v61 = vld [vmem:[%s4314_s19 + $0x68] sm:$0x1] }
 0x130   : > { %2817 = vrot.lane.b32.xlu2 %v2787_v18, %s4269_s27  ;;  %v2418_v18 = vunpack.c.l.b16 %v1080_v3  ;;  %v979_v20 = vrot.slane %v978_v33, 4  ;;  %v3028_v17 = vsel %vm3002_vm12, %v2995_v57, %v2654_v21  ;;  %v1991_v24 = vrot.slane %v1989_v41, 4 }
 0x131   : > { %v974_v27 = vsel %vm4342_vm2, %v969_v49, %v973_v6  ;;  %v1409_v38 = vsel %vm4544_vm5, %v1407_v56, %v1408_v8  ;;  %v2497_v48 = vunpack.c.l.b16 %v5649_v14  ;;  %v1670_v6 = vshrl.u32 %v3730_v15, 16 }
 0x132   : > { %2649 = vrot.lane.b32.xlu0 %v4059_v0, %s4268_s26  ;;  %v5640_v44 = vpop.permute.xlu2 %2789  ;;  %v2443_v36 = vpack.c.b16 %v2418_v18, %v2417_v40  ;;  %v984_v9 = vsel %vm4342_vm2, %v979_v20, %v983_v47  ;;  %v2409_v21 = vunpack.c.l.b16 %v974_v27  ;;  %v1673_v4 = vshll.u32 %v3730_v15, 16  ;;  %v3772_v20 = vld [vmem:[%s4314_s19 + $0x60] sm:$0xe] }
 0x133   : > { %2809 = vrot.lane.b32.xlu1 %v2783_v35, %s4269_s27  ;;  %v3784_v35 = vrot.slane %v3768_v23, 9  ;;  %v2498_v13 = vunpack.c.l.b16 %v1409_v38  ;;  %v1993_v5 = vsel %vm4544_vm5, %v1991_v24, %v1992_v12  ;;  %v1679_v42 = vshll.u32 %v5666_v63, 16  ;;  %v4051_v24 = vld [vmem:[%s4314_s19 + $0x30] sm:$0xff] }
 0x134   : > { %v2646_v43 = vpop.permute.xlu0 %2645  ;;  %v1683_v19 = vshrl.u32 %v5666_v63, 16  ;;  %v2410_v1 = vunpack.c.l.b16 %v984_v9  ;;  %v1672_v23 = vrot.slane %v1670_v6, 4  ;;  %v1675_v3 = vrot.slane %v1673_v4, 5 }
 0x135   : > { %v3020_v2 = vsel %vm3002_vm12, %v2987_v62, %v2646_v43  ;;  %v2806_v32 = vpop.permute.xlu1 %2805  ;;  %v1689_v40 = vshll.u32 %v5673_v61, 16  ;;  %v1681_v8 = vrot.slane %v1679_v42, 5  ;;  %v1574_v33 = vshrl.u32 %v3722_v30, 16 }
 0x136   : > { %v3053_v0 = vsel %vm3035_vm13, %v3020_v2, %v5480_v31  ;;  %v5678_v31 = vsel %vm4544_vm5, %v3784_v35, %v1989_v41  ;;  %v1685_v18 = vrot.slane %v1683_v19, 4  ;;  %v2746_v56 = vunpack.c.l.b16 %v1993_v5  ;;  %v4055_v41 = vld [vmem:[%s4314_s19 + $0x60] sm:$0xff] }
 0x137   : > { %v3086_v62 = vsel %vm3068_vm14, %v3053_v0, %v2806_v32  ;;  %v1676_v57 = vor.u32 %v1675_v3, %v1672_v23  ;;  %v1577_v43 = vshll.u32 %v3722_v30, 16  ;;  %v1576_v32 = vrot.slane %v1574_v33, 4 }
 0x138   : > { %4006 = vmatmul.msk.bf16.vlgmr.msra.gmra.mxu2 %vm3125_vm15, %v3086_v62  ;;  %2537 = vrot.lane.b32.xlu2 %v2519_v25, %s4266_s24  ;;  %v2745_v25 = vunpack.c.l.b16 %v5678_v31  ;;  %v1686_v2 = vor.u32 %v1685_v18, %v1681_v8  ;;  %v1583_v27 = vshll.u32 %v5643_v37, 16  ;;  %v2439_v15 = vpack.c.b16 %v2410_v1, %v2409_v21 }
 0x139   : > { %v1677_v0 = vrot.slane %v1676_v57, 4  ;;  %v1579_v38 = vrot.slane %v1577_v43, 5  ;;  %v1593_v9 = vshll.u32 %v5652_v34, 16  ;;  %v3788_v4 = vrot.slane %v3772_v20, 9  ;;  %v3668_v43 = vld [vmem:[%s4314_s19 + $0xc0] sm:$0xf] }
 0x13a   : > { %2737 = vrot.lane.b32.xlu0 %v2707_v10, %s4267_s25  ;;  %v2472_v49 = vpop.permute.xlu2 %2471  ;;  %v1691_v10 = vrot.slane %v1689_v40, 5  ;;  %v1687_v62 = vrot.slane %v1686_v2, 4  ;;  %v2017_v30 = vrot.slane %v5666_v63, 5  ;;  %v2523_v21 = vpack.c.b16 %v2498_v13, %v2497_v48  ;;  %v5717_v40 = vld [vmem:[%s4314_s19 + $0x94] sm:$0xf] }
 0x13b   : > { %2465 = vrot.lane.b32.xlu1 %v2443_v36, %s4265_s23  ;;  %v1585_v36 = vrot.slane %v1583_v27, 5  ;;  %v1682_v31 = vsel %vm4342_vm2, %v1677_v0, %v1681_v8  ;;  %v1580_v6 = vor.u32 %v1579_v38, %v1576_v32  ;;  %v1595_v1 = vrot.slane %v1593_v9, 5  ;;  %v3660_v0 = vld [vmem:[%s4314_s19 + $0x90] sm:$0xf] }
 0x13c   : > { %v2734_v47 = vpop.permute.xlu0 %2733  ;;  %v1692_v5 = vsel %vm4342_vm2, %v1687_v62, %v1691_v10  ;;  %v2673_v42 = vunpack.c.l.b16 %v1682_v31  ;;  %v2019_v23 = vrot.slane %v2017_v30, 4  ;;  %v5713_v48 = vsel %vm4544_vm5, %v3788_v4, %v2017_v30 }
 0x13d   : > { %v3061_v14 = vsel %vm3035_vm13, %v3028_v17, %v2734_v47  ;;  %v2462_v35 = vpop.permute.xlu1 %2461  ;;  %v1587_v17 = vshrl.u32 %v5643_v37, 16  ;;  %v2674_v37 = vunpack.c.l.b16 %v1692_v5  ;;  %v1581_v34 = vrot.slane %v1580_v6, 4 }
 0x13e   : > { %v3094_v12 = vsel %vm3068_vm14, %v3061_v14, %v5512_v54  ;;  %v3697_v54 = vld [vmem:[%s4314_s19 + $0x90] sm:$0xe]  ;;  %v2020_v13 = vrot.slane %v5673_v61, 5  ;;  %v5721_v18 = vsel %vm2936_vm10, %v5354_v50, %v2472_v49  ;;  %v2946_v33 = vsel %vm2936_vm10, %v5491_v53, %v2462_v35  ;;  %v3681_v53 = vld [vmem:[%s4314_s19 + $0x98] sm:$0x1] }
 0x13f   : > { %4010 = vmatmul.msk.bf16.vlgmr.msra.gmra.mxu3 %vm3125_vm15, %v3094_v12  ;;  %v1589_v19 = vrot.slane %v1587_v17, 4  ;;  %v3713_v8 = vrot.slane %v3697_v54, 9  ;;  %v2775_v57 = vpack.c.b16 %v2746_v56, %v2745_v25  ;;  %v1440_v10 = vrot.slane %v5717_v40, 5  ;;  %v5747_v12 = vld [vmem:[%s4314_s19 + $0xc8] sm:$0x1] }
 0x140   : > { %2641 = vrot.lane.b32.xlu2 %v4055_v41, %s4268_s26  ;;  %v1586_v41 = vsel %vm4342_vm2, %v1581_v34, %v1585_v36  ;;  %v5733_v49 = vsel %vm4544_vm5, %v2019_v23, %v2020_v13  ;;  %v2699_v35 = vpack.c.b16 %v2674_v37, %v2673_v42  ;;  %v2753_v25 = vunpack.c.l.b16 %v5713_v48 }
 0x141   : > { %v1590_v3 = vor.u32 %v1589_v19, %v1585_v36  ;;  %v5739_v56 = vsel %vm4544_vm5, %v3713_v8, %v1440_v10  ;;  %v1443_v2 = vrot.slane %v3681_v53, 5  ;;  %v1442_v20 = vrot.slane %v1440_v10, 4 }
 0x142   : > { %2457 = vrot.lane.b32.xlu0 %v2439_v15, %s4265_s23  ;;  %v5709_v63 = vpop.permute.xlu2 %2559  ;;  %v1274_v15 = vshrl.u32 %v3668_v43, 16  ;;  %v2754_v62 = vunpack.c.l.b16 %v5733_v49  ;;  %v1277_v36 = vshll.u32 %v3668_v43, 16  ;;  %v2507_v17 = vunpack.c.l.b16 %v5739_v56 }
 0x143   : > { %2633 = vrot.lane.b32.xlu1 %v4051_v24, %s4268_s26  ;;  %v1591_v50 = vrot.slane %v1590_v3, 4  ;;  %v2665_v24 = vunpack.c.l.b16 %v1586_v41  ;;  %v1293_v30 = vshll.u32 %v5747_v12, 16  ;;  %v1178_v54 = vshrl.u32 %v3660_v0, 16 }
 0x144   : > { %v2454_v47 = vpop.permute.xlu0 %2453  ;;  %v1279_v4 = vrot.slane %v1277_v36, 5  ;;  %v1444_v42 = vsel %vm4544_vm5, %v1442_v20, %v1443_v2  ;;  %v1181_v34 = vshll.u32 %v3660_v0, 16  ;;  %v1187_v13 = vshll.u32 %v5717_v40, 16  ;;  %v4044_v2 = vld [vmem:[%s4314_s19 + $0x90] sm:$0xff] }
 0x145   : > { %v2938_v61 = vsel %vm2936_vm10, %v5206_v58, %v2454_v47  ;;  %v2630_v14 = vpop.permute.xlu1 %2629  ;;  %v3669_v58 = vld [vmem:[%s4314_s19 + $0xc4] sm:$0xf]  ;;  %v1596_v27 = vsel %vm4342_vm2, %v1591_v50, %v1595_v1  ;;  %v1295_v23 = vrot.slane %v1293_v30, 5  ;;  %v1180_v3 = vrot.slane %v1178_v54, 4 }
 0x146   : > { %v2971_v32 = vsel %vm2969_vm11, %v2938_v61, %v5573_v11  ;;  %v1276_v11 = vrot.slane %v1274_v15, 4  ;;  %v1283_v9 = vshll.u32 %v3669_v58, 16  ;;  %v1287_v31 = vshrl.u32 %v3669_v58, 16 }
 0x147   : > { %v5751_v38 = vsel %vm3002_vm12, %v2971_v32, %v2630_v14  ;;  %v2666_v6 = vunpack.c.l.b16 %v1596_v27  ;;  %v1183_v43 = vrot.slane %v1181_v34, 5  ;;  %v1191_v61 = vshrl.u32 %v5717_v40, 16  ;;  %v3701_v14 = vld [vmem:[%s4314_s19 + $0xc0] sm:$0xe] }
 0x148   : > { %2793 = vrot.lane.b32.xlu2 %v2775_v57, %s4269_s27  ;;  %v1285_v19 = vrot.slane %v1283_v9, 5  ;;  %v1289_v37 = vrot.slane %v1287_v31, 4  ;;  %v4048_v57 = vld [vmem:[%s4314_s19 + $0xc0] sm:$0xff]  ;;  %v1197_v56 = vshll.u32 %v3681_v53, 16  ;;  %v2508_v32 = vunpack.c.l.b16 %v1444_v42  ;;  %v3777_v9 = vld [vmem:[%s4314_s19 + $0x9c] sm:$0xe] }
 0x149   : > { %v2695_v41 = vpack.c.b16 %v2666_v6, %v2665_v24  ;;  %v1184_v20 = vor.u32 %v1183_v43, %v1180_v3  ;;  %v1193_v15 = vrot.slane %v1191_v61, 4  ;;  %v3717_v36 = vrot.slane %v3701_v14, 9  ;;  %v5824_v61 = vld [vmem:[%s4314_s19 + $0xd4] sm:$0x1]  ;;  %v3740_v14 = vld [vmem:[%s4314_s19 + $0x9c] sm:$0xf] }
 0x14a   : > { %2545 = vrot.lane.b32.xlu0 %v2523_v21, %s4266_s24  ;;  %v5759_v5 = vpop.permute.xlu2 %2727  ;;  %v1280_v21 = vor.u32 %v1279_v4, %v1276_v11  ;;  %v1290_v10 = vor.u32 %v1289_v37, %v1285_v19  ;;  %v1468_v11 = vrot.slane %v3669_v58, 5  ;;  %v1199_v31 = vrot.slane %v1197_v56, 5  ;;  %v5789_v37 = vld [vmem:[%s4314_s19 + $0xa0] sm:$0xf] }
 0x14b   : > { %2721 = vrot.lane.b32.xlu1 %v2699_v35, %s4267_s25  ;;  %v1189_v35 = vrot.slane %v1187_v13, 5  ;;  %v1185_v53 = vrot.slane %v1184_v20, 4  ;;  %v1471_v58 = vrot.slane %v5747_v12, 5  ;;  %v3793_v34 = vrot.slane %v3777_v9, 9  ;;  %v3748_v13 = vld [vmem:[%s4314_s19 + $0xcc] sm:$0xf] }
 0x14c   : > { %v2542_v1 = vpop.permute.xlu0 %2541  ;;  %v1281_v50 = vrot.slane %v1280_v21, 4  ;;  %v1291_v27 = vrot.slane %v1290_v10, 4  ;;  %v1470_v4 = vrot.slane %v1468_v11, 4  ;;  %v2779_v12 = vpack.c.b16 %v2754_v62, %v2753_v25  ;;  %v5810_v25 = vld [vmem:[%s4314_s19 + $0xd0] sm:$0xf] }
 0x14d   : > { %v2979_v8 = vsel %vm2969_vm11, %v2946_v33, %v2542_v1  ;;  %v2718_v47 = vpop.permute.xlu1 %2717  ;;  %v1194_v24 = vor.u32 %v1193_v15, %v1189_v35  ;;  %v1190_v42 = vsel %vm4342_vm2, %v1185_v53, %v1189_v35  ;;  %v2052_v3 = vrot.slane %v5789_v37, 5 }
 0x14e   : > { %v3012_v33 = vsel %vm3002_vm12, %v2979_v8, %v5613_v28  ;;  %v1286_v0 = vsel %vm4342_vm2, %v1281_v50, %v1285_v19  ;;  %v1296_v40 = vsel %vm4342_vm2, %v1291_v27, %v1295_v23  ;;  %v5780_v28 = vsel %vm4544_vm5, %v3717_v36, %v1468_v11 }
 0x14f   : > { %v2435_v6 = vunpack.c.l.b16 %v1286_v0  ;;  %v2436_v54 = vunpack.c.l.b16 %v1296_v40  ;;  %v1195_v19 = vrot.slane %v1194_v24, 4  ;;  %v3045_v1 = vsel %vm3035_vm13, %v3012_v33, %v2718_v47 }
 0x150   : > { %2403 = vrot.lane.b32.xlu2 %v4048_v57, %s4264_s22  ;;  %v2528_v23 = vpack.c.b16 %v2508_v32, %v2507_v17  ;;  %v5806_v48 = vsel %vm4544_vm5, %v1470_v4, %v1471_v58  ;;  %v2515_v49 = vunpack.c.l.b16 %v5780_v28  ;;  %v5814_v17 = vunpack.c.l.b16 %v1190_v42 }
 0x151   : > { %v1200_v47 = vsel %vm4342_vm2, %v1195_v19, %v1199_v31  ;;  %v5821_v43 = vsel %vm4544_vm5, %v3793_v34, %v2052_v3  ;;  %v2054_v50 = vrot.slane %v2052_v3, 4  ;;  %v1886_v56 = vshrl.u32 %v3748_v13, 16  ;;  %v3652_v34 = vld [vmem:[%s4314_s19 + $0x60] sm:$0xf]  ;;  %v4064_v3 = vld [vmem:[%s4314_s19 + $0xcc] sm:$0xff] }
 0x152   : > { %2713 = vrot.lane.b32.xlu0 %v2695_v41, %s4267_s25  ;;  %v5784_v30 = vpop.permute.xlu2 %2815  ;;  %v5816_v10 = vunpack.c.l.b16 %v1200_v47  ;;  %v2452_v41 = vpack.c.b16 %v2436_v54, %v2435_v6  ;;  %v1895_v32 = vshll.u32 %v5810_v25, 16  ;;  %v1899_v27 = vshrl.u32 %v5810_v25, 16 }
 0x153   : > { %2395 = vrot.lane.b32.xlu1 %v4044_v2, %s4264_s22  ;;  %v1889_v2 = vshll.u32 %v3748_v13, 16  ;;  %v2763_v20 = vunpack.c.l.b16 %v5821_v43  ;;  %v1888_v15 = vrot.slane %v1886_v56, 4  ;;  %v1905_v33 = vshll.u32 %v5824_v61, 16  ;;  %v4060_v43 = vld [vmem:[%s4314_s19 + $0x9c] sm:$0xff] }
 0x154   : > { %v2710_v21 = vpop.permute.xlu0 %2709  ;;  %v1790_v0 = vshrl.u32 %v3740_v14, 16  ;;  %v2448_v36 = vpack.c.b16 %v5816_v10, %v5814_v17  ;;  %v1897_v9 = vrot.slane %v1895_v32, 5  ;;  %v1901_v40 = vrot.slane %v1899_v27, 4  ;;  %v3644_v27 = vld [vmem:[%s4314_s19 + $0x30] sm:$0xf] }
 0x155   : > { %v3037_v8 = vsel %vm3035_vm13, %v5751_v38, %v2710_v21  ;;  %v5800_v57 = vpop.permute.xlu1 %2399  ;;  %v3761_v38 = vld [vmem:[%s4314_s19 + $0xa4] sm:$0x1]  ;;  %v1891_v11 = vrot.slane %v1889_v2, 5  ;;  %v1793_v31 = vshll.u32 %v3740_v14, 16  ;;  %v1799_v6 = vshll.u32 %v5789_v37, 16 }
 0x156   : > { %v3070_v62 = vsel %vm3068_vm14, %v3037_v8, %v5640_v44  ;;  %v2055_v35 = vrot.slane %v3761_v38, 5  ;;  %v2516_v44 = vunpack.c.l.b16 %v5806_v48  ;;  %v1792_v24 = vrot.slane %v1790_v0, 4  ;;  %v5848_v48 = vld [vmem:[%s4314_s19 + $0x64] sm:$0xf]  ;;  %v5857_v2 = vld [vmem:[%s4314_s19 + $0x68] sm:$0x1] }
 0x157   : > { %3998 = vmatmul.msk.bf16.vlgmr.msra.gmra.mxu0 %vm3125_vm15, %v3070_v62  ;;  %v1892_v58 = vor.u32 %v1891_v11, %v1888_v15  ;;  %v1902_v54 = vor.u32 %v1901_v40, %v1897_v9  ;;  %v1907_v42 = vrot.slane %v1905_v33, 5  ;;  %v1803_v19 = vshrl.u32 %v5789_v37, 16 }
 0x158   : > { %2555 = vrot.lane.b32.xlu2 %v2528_v23, %s4266_s24  ;;  %v2056_v53 = vsel %vm4544_vm5, %v2054_v50, %v2055_v35  ;;  %v1795_v13 = vrot.slane %v1793_v31, 5  ;;  %v1801_v8 = vrot.slane %v1799_v6, 5  ;;  %v1809_v47 = vshll.u32 %v3761_v38, 16 }
 0x159   : > { %v2764_v62 = vunpack.c.l.b16 %v2056_v53  ;;  %v1893_v17 = vrot.slane %v1892_v58, 4  ;;  %v1903_v10 = vrot.slane %v1902_v54, 4  ;;  %v1805_v37 = vrot.slane %v1803_v19, 4 }
 0x15a   : > { %2801 = vrot.lane.b32.xlu0 %v2779_v12, %s4269_s27  ;;  %v5844_v12 = vpop.permute.xlu2 %2535  ;;  %v1796_v14 = vor.u32 %v1795_v13, %v1792_v24  ;;  %v1085_v50 = vshll.u32 %v3652_v34, 16  ;;  %v1091_v32 = vshll.u32 %v5848_v48, 16  ;;  %v1095_v24 = vshrl.u32 %v5848_v48, 16 }
 0x15b   : > { %2483 = vrot.lane.b32.xlu1 %v2452_v41, %s4265_s23  ;;  %v1082_v41 = vshrl.u32 %v3652_v34, 16  ;;  %v1898_v35 = vsel %vm4342_vm2, %v1893_v17, %v1897_v9  ;;  %v1908_v38 = vsel %vm4342_vm2, %v1903_v10, %v1907_v42  ;;  %v1806_v56 = vor.u32 %v1805_v37, %v1801_v8 }
 0x15c   : > { %v2798_v4 = vpop.permute.xlu0 %2797  ;;  %v2691_v15 = vunpack.c.l.b16 %v1898_v35  ;;  %v2692_v33 = vunpack.c.l.b16 %v1908_v38  ;;  %v1797_v0 = vrot.slane %v1796_v14, 4  ;;  %v1087_v9 = vrot.slane %v1085_v50, 5 }
 0x15d   : > { %v3078_v21 = vsel %vm3068_vm14, %v3045_v1, %v2798_v4  ;;  %v2552_v23 = vpop.permute.xlu1 %2551  ;;  %v1811_v1 = vrot.slane %v1809_v47, 5  ;;  %v1084_v11 = vrot.slane %v1082_v41, 4  ;;  %v1807_v40 = vrot.slane %v1806_v56, 4 }
 0x15e   : > { %4002 = vmatmul.msk.bf16.vlgmr.msra.gmra.mxu1 %vm3125_vm15, %v3078_v21  ;;  %v1093_v53 = vrot.slane %v1091_v32, 5  ;;  %v2931_v31 = vsel %vm2903_vm8, %v5148_v45, %v5800_v57  ;;  %v2532_v6 = vpack.c.b16 %v2516_v44, %v2515_v49  ;;  %v1101_v4 = vshll.u32 %v5857_v2, 16  ;;  %v5874_v21 = vld [vmem:[%s4314_s19 + $0x34] sm:$0xf]  ;;  %v3693_v32 = vld [vmem:[%s4314_s19 + $0x60] sm:$0xe] }
 0x15f   : > { %v986_v58 = vshrl.u32 %v3644_v27, 16  ;;  %v1802_v42 = vsel %vm4342_vm2, %v1797_v0, %v1801_v8  ;;  %v1088_v19 = vor.u32 %v1087_v9, %v1084_v11  ;;  %v1097_v34 = vrot.slane %v1095_v24, 4 }
 0x160   : > { %2659 = vrot.lane.b32.xlu2 %v4064_v3, %s4268_s26  ;;  %v2989_v45 = vsel %vm2969_vm11, %v5721_v18, %v2552_v23  ;;  %v2708_v28 = vpack.c.b16 %v2692_v33, %v2691_v15  ;;  %v1812_v49 = vsel %vm4342_vm2, %v1807_v40, %v1811_v1  ;;  %v1103_v44 = vrot.slane %v1101_v4, 5  ;;  %v5883_v3 = vld [vmem:[%s4314_s19 + $0x38] sm:$0x1] }
 0x161   : > { %v1098_v13 = vor.u32 %v1097_v34, %v1093_v53  ;;  %v988_v47 = vrot.slane %v986_v58, 4  ;;  %v989_v8 = vshll.u32 %v3644_v27, 16  ;;  %v2683_v18 = vunpack.c.l.b16 %v1802_v42 }
 0x162   : > { %2475 = vrot.lane.b32.xlu0 %v2448_v36, %s4265_s23  ;;  %v2784_v36 = vpack.c.b16 %v2764_v62, %v2763_v20  ;;  %v1089_v20 = vrot.slane %v1088_v19, 4  ;;  %v3781_v62 = vld [vmem:[%s4314_s19 + $0xcc] sm:$0xe]  ;;  %v5887_v10 = vpop.permute.xlu2 %2639  ;;  %v995_v23 = vshll.u32 %v5874_v21, 16  ;;  %v999_v37 = vshrl.u32 %v5874_v21, 16 }
 0x163   : > { %2651 = vrot.lane.b32.xlu1 %v4060_v43, %s4268_s26  ;;  %v1099_v14 = vrot.slane %v1098_v13, 4  ;;  %v991_v1 = vrot.slane %v989_v8, 5  ;;  %v1005_v41 = vshll.u32 %v5883_v3, 16  ;;  %v3797_v56 = vrot.slane %v3781_v62, 9 }
 0x164   : > { %v2480_v54 = vpop.permute.xlu0 %2479  ;;  %v1094_v43 = vsel %vm4342_vm2, %v1089_v20, %v1093_v53  ;;  %v997_v35 = vrot.slane %v995_v23, 5  ;;  %v1001_v38 = vrot.slane %v999_v37, 4  ;;  %v2684_v27 = vunpack.c.l.b16 %v1812_v49  ;;  %v5922_v23 = vld [vmem:[%s4314_s19 + $0x40] sm:$0xf] }
 0x165   : > { %v5878_v57 = vpop.permute.xlu1 %2655  ;;  %v2964_v17 = vsel %vm2936_vm10, %v2931_v31, %v2480_v54  ;;  %v2419_v50 = vunpack.c.l.b16 %v1094_v43  ;;  %v1104_v15 = vsel %vm4342_vm2, %v1099_v14, %v1103_v44  ;;  %v992_v33 = vor.u32 %v991_v1, %v988_v47  ;;  %v3724_v47 = vld [vmem:[%s4314_s19 + $0x3c] sm:$0xf] }
 0x166   : > { %v2080_v0 = vrot.slane %v5810_v25, 5  ;;  %v2420_v11 = vunpack.c.l.b16 %v1104_v15  ;;  %v1002_v40 = vor.u32 %v1001_v38, %v997_v35  ;;  %v1007_v9 = vrot.slane %v1005_v41, 5 }
 0x167   : > { %v2083_v53 = vrot.slane %v5824_v61, 5  ;;  %v993_v31 = vrot.slane %v992_v33, 4  ;;  %v3709_v58 = vrot.slane %v3693_v32, 9  ;;  %v2704_v34 = vpack.c.b16 %v2684_v27, %v2683_v18  ;;  %v5939_v33 = vld [vmem:[%s4314_s19 + $0x44] sm:$0x1] }
 0x168   : > { %2811 = vrot.lane.b32.xlu2 %v2784_v36, %s4269_s27  ;;  %v2082_v4 = vrot.slane %v2080_v0, 4  ;;  %v2444_v42 = vpack.c.b16 %v2420_v11, %v2419_v50  ;;  %v1003_v25 = vrot.slane %v1002_v40, 4  ;;  %v2081_v19 = vsel %vm4544_vm5, %v3797_v56, %v2080_v0 }
 0x169   : > { %v2771_v8 = vunpack.c.l.b16 %v2081_v19  ;;  %v1415_v18 = vrot.slane %v5857_v2, 5  ;;  %v1384_v14 = vrot.slane %v5874_v21, 5  ;;  %v1598_v41 = vshrl.u32 %v3724_v47, 16  ;;  %v3732_v19 = vld [vmem:[%s4314_s19 + $0x6c] sm:$0xf] }
 0x16a   : > { %2563 = vrot.lane.b32.xlu0 %v2532_v6, %s4266_s24  ;;  %v1412_v6 = vrot.slane %v5848_v48, 5  ;;  %v2084_v49 = vsel %vm4544_vm5, %v2082_v4, %v2083_v53  ;;  %v3689_v48 = vld [vmem:[%s4314_s19 + $0x30] sm:$0xe]  ;;  %v1008_v20 = vsel %vm4342_vm2, %v1003_v25, %v1007_v9  ;;  %v5924_v37 = vpop.permute.xlu2 %2791  ;;  %v1601_v50 = vshll.u32 %v3724_v47, 16  ;;  %v4052_v4 = vld [vmem:[%s4314_s19 + $0x3c] sm:$0xff] }
 0x16b   : > { %2739 = vrot.lane.b32.xlu1 %v2708_v28, %s4267_s25  ;;  %v998_v28 = vsel %vm4342_vm2, %v993_v31, %v997_v35  ;;  %v3705_v43 = vrot.slane %v3689_v48, 9  ;;  %v1386_v38 = vrot.slane %v1384_v14, 4  ;;  %v1387_v56 = vrot.slane %v5883_v3, 5  ;;  %v3733_v31 = vld [vmem:[%s4314_s19 + $0x70] sm:$0xf] }
 0x16c   : > { %v2648_v24 = vpop.permute.xlu0 %2647  ;;  %v2411_v13 = vunpack.c.l.b16 %v998_v28  ;;  %v1414_v62 = vrot.slane %v1412_v6, 4  ;;  %v1607_v32 = vshll.u32 %v5922_v23, 16  ;;  %v1600_v0 = vrot.slane %v1598_v41, 4  ;;  %v3757_v48 = vld [vmem:[%s4314_s19 + $0x74] sm:$0x1] }
 0x16d   : > { %v3022_v54 = vsel %vm3002_vm12, %v2989_v45, %v2648_v24  ;;  %v2808_v36 = vpop.permute.xlu1 %2807  ;;  %v2997_v45 = vsel %vm2969_vm11, %v2964_v17, %v5709_v63  ;;  %v2772_v63 = vunpack.c.l.b16 %v2084_v49  ;;  %v1413_v17 = vsel %vm4544_vm5, %v3709_v58, %v1412_v6 }
 0x16e   : > { %v3055_v61 = vsel %vm3035_vm13, %v3022_v54, %v5759_v5  ;;  %v2412_v5 = vunpack.c.l.b16 %v1008_v20  ;;  %v1416_v2 = vsel %vm4544_vm5, %v1414_v62, %v1415_v18  ;;  %v3030_v35 = vsel %vm3002_vm12, %v2997_v45, %v5878_v57 }
 0x16f   : > { %v3088_v44 = vsel %vm3068_vm14, %v3055_v61, %v2808_v36  ;;  %v2499_v21 = vunpack.c.l.b16 %v1413_v17  ;;  %v2500_v15 = vunpack.c.l.b16 %v1416_v2  ;;  %v1603_v11 = vrot.slane %v1601_v50, 5 }
 0x170   : > { %4007 = vmatmul.msk.bf16.gmra.mxu2 %vm3125_vm15, %v3088_v44  ;;  %2467 = vrot.lane.b32.xlu2 %v2444_v42, %s4265_s23  ;;  %v2440_v1 = vpack.c.b16 %v2412_v5, %v2411_v13  ;;  %v2788_v9 = vpack.c.b16 %v2772_v63, %v2771_v8  ;;  %v1385_v53 = vsel %vm4544_vm5, %v3705_v43, %v1384_v14  ;;  %v1609_v6 = vrot.slane %v1607_v32, 5  ;;  %v3773_v42 = vld [vmem:[%s4314_s19 + $0x6c] sm:$0xe] }
 0x171   : > { %v1604_v24 = vor.u32 %v1603_v11, %v1600_v0  ;;  %v1388_v58 = vsel %vm4544_vm5, %v1386_v38, %v1387_v56  ;;  %v1611_v54 = vshrl.u32 %v5922_v23, 16  ;;  %v1617_v36 = vshll.u32 %v5939_v33, 16 }
 0x172   : > { %2731 = vrot.lane.b32.xlu0 %v2704_v34, %s4267_s25  ;;  %v2024_v61 = vrot.slane %v3733_v31, 5  ;;  %v2491_v28 = vunpack.c.l.b16 %v1385_v53  ;;  %v2492_v49 = vunpack.c.l.b16 %v1388_v58  ;;  %v3789_v45 = vrot.slane %v3773_v42, 9  ;;  %v5960_v44 = vpop.permute.xlu2 %2473 }
 0x173   : > { %2459 = vrot.lane.b32.xlu1 %v2440_v1, %s4265_s23  ;;  %v1605_v25 = vrot.slane %v1604_v24, 4  ;;  %v1613_v34 = vrot.slane %v1611_v54, 4  ;;  %v1619_v47 = vrot.slane %v1617_v36, 5  ;;  %v1694_v5 = vshrl.u32 %v3732_v19, 16 }
 0x174   : > { %v2736_v27 = vpop.permute.xlu0 %2735  ;;  %v1697_v62 = vshll.u32 %v3732_v19, 16  ;;  %v2026_v17 = vrot.slane %v2024_v61, 4  ;;  %v2027_v43 = vrot.slane %v3757_v48, 5  ;;  %v2520_v1 = vpack.c.b16 %v2492_v49, %v2491_v28  ;;  %v4056_v19 = vld [vmem:[%s4314_s19 + $0x6c] sm:$0xff] }
 0x175   : > { %v3063_v40 = vsel %vm3035_vm13, %v3030_v35, %v2736_v27  ;;  %v5942_v57 = vpop.permute.xlu1 %2463  ;;  %v1610_v20 = vsel %vm4342_vm2, %v1605_v25, %v1609_v6  ;;  %v1614_v13 = vor.u32 %v1613_v34, %v1609_v6  ;;  %v1696_v14 = vrot.slane %v1694_v5, 4  ;;  %v3769_v27 = vld [vmem:[%s4314_s19 + $0x3c] sm:$0xe] }
 0x176   : > { %v3096_v3 = vsel %vm3068_vm14, %v3063_v40, %v5784_v30  ;;  %v2524_v30 = vpack.c.b16 %v2500_v15, %v2499_v21  ;;  %v2667_v2 = vunpack.c.l.b16 %v1610_v20  ;;  %v1699_v41 = vrot.slane %v1697_v62, 5 }
 0x177   : > { %4011 = vmatmul.msk.bf16.gmra.mxu3 %vm3125_vm15, %v3096_v3  ;;  %v1615_v63 = vrot.slane %v1614_v13, 4  ;;  %v2025_v35 = vsel %vm4544_vm5, %v3789_v45, %v2024_v61  ;;  %v1996_v38 = vrot.slane %v5922_v23, 5  ;;  %v1703_v56 = vshll.u32 %v3733_v31, 16 }
 0x178   : > { %2635 = vrot.lane.b32.xlu2 %v4052_v4, %s4268_s26  ;;  %v1700_v21 = vor.u32 %v1699_v41, %v1696_v14  ;;  %v1707_v15 = vshrl.u32 %v3733_v31, 16  ;;  %v1713_v0 = vshll.u32 %v3757_v48, 16  ;;  %v2028_v11 = vsel %vm4544_vm5, %v2026_v17, %v2027_v43 }
 0x179   : > { %v1620_v50 = vsel %vm4342_vm2, %v1615_v63, %v1619_v47  ;;  %v1705_v40 = vrot.slane %v1703_v56, 5  ;;  %v2755_v24 = vunpack.c.l.b16 %v2025_v35  ;;  %v3785_v4 = vrot.slane %v3769_v27, 9 }
 0x17a   : > { %2819 = vrot.lane.b32.xlu0 %v2788_v9, %s4269_s27  ;;  %v2668_v32 = vunpack.c.l.b16 %v1620_v50  ;;  %v1701_v9 = vrot.slane %v1700_v21, 4  ;;  %v1709_v53 = vrot.slane %v1707_v15, 4  ;;  %v1998_v58 = vrot.slane %v1996_v38, 4 }
 0x17b   : > { %2547 = vrot.lane.b32.xlu1 %v2524_v30, %s4266_s24  ;;  %v1999_v23 = vrot.slane %v5939_v33, 5  ;;  %v2756_v31 = vunpack.c.l.b16 %v2028_v11  ;;  %v1715_v42 = vrot.slane %v1713_v0, 5  ;;  %v2562_v30 = vpop.permute.xlu2 %2561  ;;  %v1997_v61 = vsel %vm4544_vm5, %v3785_v4, %v1996_v38 }
 0x17c   : > { %v2456_v8 = vpop.permute.xlu0 %2455  ;;  %v2696_v3 = vpack.c.b16 %v2668_v32, %v2667_v2  ;;  %v1706_v54 = vsel %vm4342_vm2, %v1701_v9, %v1705_v40  ;;  %v1710_v36 = vor.u32 %v1709_v53, %v1705_v40  ;;  %v2747_v13 = vunpack.c.l.b16 %v1997_v61 }
 0x17d   : > { %v2632_v18 = vpop.permute.xlu1 %2631  ;;  %v2000_v28 = vsel %vm4544_vm5, %v1998_v58, %v1999_v23  ;;  %v2675_v33 = vunpack.c.l.b16 %v1706_v54  ;;  %v2940_v49 = vsel %vm2936_vm10, %v5454_v46, %v2456_v8  ;;  %v2780_v48 = vpack.c.b16 %v2756_v31, %v2755_v24  ;;  %v6026_v23 = vld [vmem:[%s6191_s2] ss:$0 sm:$0xff] }
 0x17e   : > { %v1711_v34 = vrot.slane %v1710_v36, 4  ;;  %v2748_v47 = vunpack.c.l.b16 %v2000_v28  ;;  %v2973_v5 = vsel %vm2969_vm11, %v2940_v49, %v5844_v12  ;;  %v2948_v43 = vsel %vm2936_vm10, %v5460_v52, %v5942_v57 }
 0x17f   : > { %v3006_v60 = vsel %vm3002_vm12, %v2973_v5, %v2632_v18  ;;  %v2958_v35 = vsel %vm2936_vm10, %v5584_v59, %v5960_v44 }
 0x180   : > { %v1716_v45 = vsel %vm4342_vm2, %v1711_v34, %v1715_v42  ;;  %v2776_v17 = vpack.c.b16 %v2748_v47, %v2747_v13 }
 0x181   : > { %v2676_v20 = vunpack.c.l.b16 %v1716_v45 }
 0x182   : > { %2539 = vrot.lane.b32.xlu0 %v2520_v1, %s4266_s24 }
 0x183   : > { %2715 = vrot.lane.b32.xlu1 %v2696_v3, %s4267_s25  ;;  %v2700_v62 = vpack.c.b16 %v2676_v20, %v2675_v33  ;;  %v2730_v12 = vpop.permute.xlu2 %2729 }
 0x184   : > { %v2544_v6 = vpop.permute.xlu0 %2543 }
 0x185   : > { %v2720_v25 = vpop.permute.xlu1 %2719  ;;  %2723 = vrot.lane.b32.xlu2 %v2700_v62, %s4267_s25  ;;  %v2981_v18 = vsel %vm2969_vm11, %v2948_v43, %v2544_v6 }
 0x186   : > { %v3014_v14 = vsel %vm3002_vm12, %v2981_v18, %v5887_v10 }
 0x187   : > { %v3047_v1 = vsel %vm3035_vm13, %v3014_v14, %v2720_v25 }
 0x18a   : > { %2643 = vrot.lane.b32.xlu0 %v4056_v19, %s4268_s26 }
 0x18b   : > { %2803 = vrot.lane.b32.xlu1 %v2780_v48, %s4269_s27  ;;  %v2818_v50 = vpop.permute.xlu2 %2817 }
 0x18c   : > { %v2712_v63 = vpop.permute.xlu0 %2711 }
 0x18d   : > { %v3039_v46 = vsel %vm3035_vm13, %v3006_v60, %v2712_v63  ;;  %v2402_v8 = vpop.permute.xlu1 %2401 }
 0x18e   : > { %v3072_v26 = vsel %vm3068_vm14, %v3039_v46, %v5924_v37  ;;  %v2933_v15 = vsel %vm2903_vm8, %v5398_v29, %v2402_v8 }
 0x18f   : > { %3999 = vmatmul.msk.bf16.gmra.mxu0 %vm3125_vm15, %v3072_v26 }
 0x192   : > { %2795 = vrot.lane.b32.xlu0 %v2776_v17, %s4269_s27 }
 0x193   : > { %v2538_v38 = vpop.permute.xlu2 %2537 }
 0x194   : > { %v2800_v2 = vpop.permute.xlu0 %2799 }
 0x195   : > { %v3080_v37 = vsel %vm3068_vm14, %v3047_v1, %v2800_v2  ;;  %v2554_v41 = vpop.permute.xlu1 %2553 }
 0x196   : > { %4003 = vmatmul.msk.bf16.gmra.mxu1 %vm3125_vm15, %v3080_v37  ;;  %v2991_v56 = vsel %vm2969_vm11, %v2958_v35, %v2554_v41 }
 0x19b   : > { %v2642_v3 = vpop.permute.xlu2 %2641 }
 0x19c   : > { %v2482_v52 = vpop.permute.xlu0 %2481 }
 0x19d   : > { %v2658_v57 = vpop.permute.xlu1 %2657  ;;  %v2966_v11 = vsel %vm2936_vm10, %v2933_v15, %v2482_v52 }
 0x19e   : > { %v2999_v59 = vsel %vm2969_vm11, %v2966_v11, %v2562_v30 }
 0x19f   : > { %v3032_v44 = vsel %vm3002_vm12, %v2999_v59, %v2658_v57 }
 0x1a3   : > { %v2794_v58 = vpop.permute.xlu2 %2793 }
 0x1a4   : > { %v2650_v32 = vpop.permute.xlu0 %2649 }
 0x1a5   : > { %v3024_v10 = vsel %vm3002_vm12, %v2991_v56, %v2650_v32  ;;  %v2810_v27 = vpop.permute.xlu1 %2809 }
 0x1a6   : > { %v3057_v21 = vsel %vm3035_vm13, %v3024_v10, %v2730_v12 }
 0x1a7   : > { %v3090_v0 = vsel %vm3068_vm14, %v3057_v21, %v2810_v27 }
 0x1a8   : > { %4008 = vmatmul.msk.bf16.gmra.mxu2 %vm3125_vm15, %v3090_v0 }
 0x1ab   : > { %v6031_v19 = vpop.permute.xlu2 %2403 }
 0x1ac   : > { %v2738_v40 = vpop.permute.xlu0 %2737 }
 0x1ad   : > { %v3065_v9 = vsel %vm3035_vm13, %v3032_v44, %v2738_v40  ;;  %v2466_v53 = vpop.permute.xlu1 %2465 }
 0x1ae   : > { %v3098_v24 = vsel %vm3068_vm14, %v3065_v9, %v2818_v50  ;;  %v2950_v62 = vsel %vm2936_vm10, %v5286_v39, %v2466_v53 }
 0x1af   : > { %4012 = vmatmul.msk.bf16.gmra.mxu3 %vm3125_vm15, %v3098_v24 }
 0x1b3   : > { %v2556_v43 = vpop.permute.xlu2 %2555 }
 0x1b4   : > { %v2458_v29 = vpop.permute.xlu0 %2457 }
 0x1b5   : > { %v2634_v4 = vpop.permute.xlu1 %2633  ;;  %v2942_v30 = vsel %vm2936_vm10, %v5405_v22, %v2458_v29 }
 0x1b6   : > { %v2975_v61 = vsel %vm2969_vm11, %v2942_v30, %v2538_v38 }
 0x1b7   : > { %v3008_v49 = vsel %vm3002_vm12, %v2975_v61, %v2634_v4 }
 0x1bb   : > { %v3211_v6 = vpop.f32.mrf.mxu2  ;;  %v2660_v27 = vpop.permute.xlu2 %2659 }
 0x1bc   : > { %v2546_v31 = vpop.permute.xlu0 %2545  ;;  %v3212_v54 = vadd.f32 %v6026_v23, %v3211_v6 }
 0x1bd   : > { %v2722_v36 = vpop.permute.xlu1 %2721  ;;  %v2983_v46 = vsel %vm2969_vm11, %v2950_v62, %v2546_v31 }
 0x1be   : > { %v3267_v42 = vsub.f32 0.0, %v3212_v54  ;;  %v3016_v12 = vsel %vm3002_vm12, %v2983_v46, %v2642_v3 }
 0x1bf   : > { %v3049_v39 = vsel %vm3035_vm13, %v3016_v12, %v2722_v36 }
 0x1c0   : > { %v3315_v25 = vmul.f32 1.442695, %v3267_v42 }
 0x1c2   : > { %4110 = vpow2.f32 %v3315_v25  ;;  %v3231_v34 = vpop.f32.mrf.mxu3 }
 0x1c3   : > { %v3232_v28 = vadd.f32 %v6026_v23, %v3231_v34  ;;  %v3213_v33 = vpop.f32.mrf.mxu2  ;;  %v2812_v36 = vpop.permute.xlu2 %2811 }
 0x1c4   : > { %v2714_v48 = vpop.permute.xlu0 %2713  ;;  %v3214_v45 = vadd.f32 %v6026_v23, %v3213_v33 }
 0x1c5   : > { %v3275_v20 = vsub.f32 0.0, %v3232_v28  ;;  %v3041_v13 = vsel %vm3035_vm13, %v3008_v49, %v2714_v48  ;;  %v2396_v47 = vpop.permute.xlu1 %2395 }
 0x1c6   : > { %v3074_v22 = vsel %vm3068_vm14, %v3041_v13, %v2794_v58  ;;  %v3268_v5 = vsub.f32 0.0, %v3214_v45  ;;  %v2927_v42 = vsel %vm2903_vm8, %v5359_v7, %v2396_v47 }
 0x1c7   : > { %v3331_v60 = vmul.f32 1.442695, %v3275_v20  ;;  %4000 = vmatmul.msk.bf16.gmra.mxu0 %vm3125_vm15, %v3074_v22 }
 0x1c8   : > { %v4111_v63 = vpop.eup %4110  ;;  %v3317_v8 = vmul.f32 1.442695, %v3268_v5  ;;  %v2935_v5 = vsel %vm2903_vm8, %v5364_v55, %v6031_v19 }
 0x1c9   : > { %v3363_v26 = vadd.f32 1.0, %v4111_v63  ;;  %4112 = vpow2.f32 %v3331_v60 }
 0x1ca   : > { %4114 = vpow2.f32 %v3317_v8  ;;  %v3233_v17 = vpop.f32.mrf.mxu3 }
 0x1cb   : > { %4116 = vrcp.f32 %v3363_v26  ;;  %v3234_v18 = vadd.f32 %v6026_v23, %v3233_v17  ;;  %v2468_v12 = vpop.permute.xlu2 %2467 }
 0x1cc   : > { %v2802_v14 = vpop.permute.xlu0 %2801 }
 0x1cd   : > { %v3276_v1 = vsub.f32 0.0, %v3234_v18  ;;  %v3082_v2 = vsel %vm3068_vm14, %v3049_v39, %v2802_v14  ;;  %v6047_v37 = vpop.permute.xlu1 %2483 }
 0x1ce   : > { %4004 = vmatmul.msk.bf16.gmra.mxu1 %vm3125_vm15, %v3082_v2  ;;  %v2968_v46 = vsel %vm2936_vm10, %v2935_v5, %v6047_v37 }
 0x1cf   : > { %v4113_v41 = vpop.eup %4112  ;;  %v3333_v50 = vmul.f32 1.442695, %v3276_v1 }
 0x1d0   : > { %v4115_v52 = vpop.eup %4114  ;;  %v3371_v57 = vadd.f32 1.0, %v4113_v41 }
 0x1d1   : > { %v4117_v35 = vpop.eup %4116  ;;  %v3364_v38 = vadd.f32 1.0, %v4115_v52  ;;  %4118 = vpow2.f32 %v3333_v50 }
 0x1d2   : > { %v3427_v56 = vmul.f32 %v4117_v35, %v3212_v54  ;;  %4120 = vrcp.f32 %v3371_v57 }
 0x1d3   : > { %4122 = vrcp.f32 %v3364_v38  ;;  %v2636_v35 = vpop.permute.xlu2 %2635 }
 0x1d4   : > { %3459 = vst.msk [vmem:[%s6054_s16 + $0x80] sm:$0xff] %vm3068_vm14, %v3427_v56  ;;  %v3171_v32 = vpop.f32.mrf.mxu0  ;;  %v2476_v10 = vpop.permute.xlu0 %2475 }
 0x1d5   : > { %v3172_v21 = vadd.f32 %v6026_v23, %v3171_v32  ;;  %v2652_v15 = vpop.permute.xlu1 %2651  ;;  %v2960_v34 = vsel %vm2936_vm10, %v2927_v42, %v2476_v10 }
 0x1d7   : > { %v4119_v0 = vpop.eup %4118  ;;  %v3251_v11 = vsub.f32 0.0, %v3172_v21 }
 0x1d8   : > { %v4121_v59 = vpop.eup %4120  ;;  %v3372_v44 = vadd.f32 1.0, %v4119_v0 }
 0x1d9   : > { %v4123_v40 = vpop.eup %4122  ;;  %v3435_v3 = vmul.f32 %v4121_v59, %v3232_v28  ;;  %v3283_v9 = vmul.f32 1.442695, %v3251_v11 }
 0x1da   : > { %v3428_v53 = vmul.f32 %v4123_v40, %v3214_v45  ;;  %4124 = vrcp.f32 %v3372_v44  ;;  %v2993_v45 = vsel %vm2969_vm11, %v2960_v34, %v2556_v43 }
 0x1db   : > { %3467 = vst.msk [vmem:[%s6054_s16 + $0xc0] sm:$0xff] %vm3068_vm14, %v3435_v3  ;;  %4126 = vpow2.f32 %v3283_v9  ;;  %v3191_v24 = vpop.f32.mrf.mxu1  ;;  %v3026_v13 = vsel %vm3002_vm12, %v2993_v45, %v2652_v15  ;;  %v2952_v3 = vsel %vm2936_vm10, %v5531_v16, %v2468_v12 }
 0x1dc   : > { %3460 = vst.msk [vmem:[%s6054_s16 + $0x88] sm:$0xff] %vm3068_vm14, %v3428_v53  ;;  %v3192_v29 = vadd.f32 %v6026_v23, %v3191_v24  ;;  %v3173_v4 = vpop.f32.mrf.mxu0  ;;  %v2564_v58 = vpop.permute.xlu0 %2563 }
 0x1dd   : > { %v3174_v6 = vadd.f32 %v6026_v23, %v3173_v4  ;;  %v2740_v31 = vpop.permute.xlu1 %2739  ;;  %v3001_v26 = vsel %vm2969_vm11, %v2968_v46, %v2564_v58 }
 0x1de   : > { %v3259_v54 = vsub.f32 0.0, %v3192_v29  ;;  %v3034_v19 = vsel %vm3002_vm12, %v3001_v26, %v2660_v27 }
 0x1df   : > { %v3252_v30 = vsub.f32 0.0, %v3174_v6  ;;  %v3067_v1 = vsel %vm3035_vm13, %v3034_v19, %v2740_v31  ;;  %v2724_v53 = vpop.permute.xlu2 %2723 }
 0x1e0   : > { %v4125_v25 = vpop.eup %4124  ;;  %v3299_v61 = vmul.f32 1.442695, %v3259_v54 }
 0x1e1   : > { %v4127_v28 = vpop.eup %4126  ;;  %v3436_v33 = vmul.f32 %v4125_v25, %v3234_v18  ;;  %v3285_v49 = vmul.f32 1.442695, %v3252_v30 }
 0x1e2   : > { %v3347_v48 = vadd.f32 1.0, %v4127_v28  ;;  %4128 = vpow2.f32 %v3299_v61 }
 0x1e3   : > { %3468 = vst.msk [vmem:[%s6054_s16 + $0xc8] sm:$0xff] %vm3068_vm14, %v3436_v33  ;;  %4130 = vpow2.f32 %v3285_v49  ;;  %v3193_v20 = vpop.f32.mrf.mxu1 }
 0x1e4   : > { %4132 = vrcp.f32 %v3347_v48  ;;  %v3194_v7 = vadd.f32 %v6026_v23, %v3193_v20  ;;  %v2732_v47 = vpop.permute.xlu0 %2731 }
 0x1e5   : > { %v3059_v22 = vsel %vm3035_vm13, %v3026_v13, %v2732_v47  ;;  %v2460_v63 = vpop.permute.xlu1 %2459 }
 0x1e6   : > { %v3260_v62 = vsub.f32 0.0, %v3194_v7  ;;  %v3092_v60 = vsel %vm3068_vm14, %v3059_v22, %v2812_v36  ;;  %v2944_v16 = vsel %vm2936_vm10, %v5250_v51, %v2460_v63 }
 0x1e7   : > { %4009 = vmatmul.msk.bf16.gmra.mxu2 %vm3125_vm15, %v3092_v60 }
 0x1e8   : > { %v4129_v8 = vpop.eup %4128  ;;  %v3301_v17 = vmul.f32 1.442695, %v3260_v62 }
 0x1e9   : > { %v4131_v43 = vpop.eup %4130  ;;  %v3355_v18 = vadd.f32 1.0, %v4129_v8 }
 0x1ea   : > { %v4133_v39 = vpop.eup %4132  ;;  %v3348_v14 = vadd.f32 1.0, %v4131_v43  ;;  %4134 = vpow2.f32 %v3301_v17 }
 0x1eb   : > { %v3411_v55 = vmul.f32 %v4133_v39, %v3172_v21  ;;  %4136 = vrcp.f32 %v3355_v18 }
 0x1ec   : > { %4138 = vrcp.f32 %v3348_v14  ;;  %v2820_v2 = vpop.permute.xlu0 %2819 }
 0x1ed   : > { %3443 = vst.msk [vmem:[%s6054_s16] sm:$0xff] %vm3068_vm14, %v3411_v55  ;;  %v3100_v37 = vsel %vm3068_vm14, %v3067_v1, %v2820_v2  ;;  %v2548_v41 = vpop.permute.xlu1 %2547 }
 0x1ee   : > { %4013 = vmatmul.msk.bf16.gmra.mxu3 %vm3125_vm15, %v3100_v37 }
 0x1f0   : > { %v4135_v50 = vpop.eup %4134 }
 0x1f1   : > { %v4137_v52 = vpop.eup %4136  ;;  %v3356_v57 = vadd.f32 1.0, %v4135_v50 }
 0x1f2   : > { %v4139_v38 = vpop.eup %4138  ;;  %v3419_v56 = vmul.f32 %v4137_v52, %v3192_v29  ;;  %v2985_v29 = vsel %vm2969_vm11, %v2952_v3, %v2548_v41 }
 0x1f3   : > { %v3412_v32 = vmul.f32 %v4139_v38, %v3174_v6  ;;  %4140 = vrcp.f32 %v3356_v57  ;;  %v3216_v10 = vpop.f32.mrf.mxu2 }
 0x1f4   : > { %3451 = vst.msk [vmem:[%s6054_s16 + $0x40] sm:$0xff] %vm3068_vm14, %v3419_v56  ;;  %v2540_v27 = vpop.permute.xlu0 %2539  ;;  %v3217_v21 = vadd.f32 %v6026_v23, %v3216_v10 }
 0x1f5   : > { %3444 = vst.msk [vmem:[%s6054_s16 + $0x8] sm:$0xff] %vm3068_vm14, %v3412_v32  ;;  %v2716_v0 = vpop.permute.xlu1 %2715  ;;  %v2977_v61 = vsel %vm2969_vm11, %v2944_v16, %v2540_v27 }
 0x1f6   : > { %v3269_v15 = vsub.f32 0.0, %v3217_v21  ;;  %v3010_v48 = vsel %vm3002_vm12, %v2977_v61, %v2636_v35 }
 0x1f7   : > { %v3043_v51 = vsel %vm3035_vm13, %v3010_v48, %v2716_v0 }
 0x1f8   : > { %v3319_v11 = vmul.f32 1.442695, %v3269_v15 }
 0x1f9   : > { %v4141_v59 = vpop.eup %4140 }
 0x1fa   : > { %v3420_v44 = vmul.f32 %v4141_v59, %v3194_v7  ;;  %4142 = vpow2.f32 %v3319_v11  ;;  %v3236_v40 = vpop.f32.mrf.mxu3 }
 0x1fb   : > { %v3237_v9 = vadd.f32 %v6026_v23, %v3236_v40  ;;  %v3218_v24 = vpop.f32.mrf.mxu2 }
 0x1fc   : > { %3452 = vst.msk [vmem:[%s6054_s16 + $0x48] sm:$0xff] %vm3068_vm14, %v3420_v44  ;;  %v2644_v4 = vpop.permute.xlu0 %2643  ;;  %v3219_v58 = vadd.f32 %v6026_v23, %v3218_v24 }
 0x1fd   : > { %v3277_v6 = vsub.f32 0.0, %v3237_v9  ;;  %v3018_v31 = vsel %vm3002_vm12, %v2985_v29, %v2644_v4  ;;  %v2804_v42 = vpop.permute.xlu1 %2803 }
 0x1fe   : > { %v3051_v54 = vsel %vm3035_vm13, %v3018_v31, %v2724_v53  ;;  %v3270_v36 = vsub.f32 0.0, %v3219_v58 }
 0x1ff   : > { %v3335_v30 = vmul.f32 1.442695, %v3277_v6  ;;  %v3084_v25 = vsel %vm3068_vm14, %v3051_v54, %v2804_v42 }
 0x200   : > { %v4143_v34 = vpop.eup %4142  ;;  %v3321_v28 = vmul.f32 1.442695, %v3270_v36  ;;  %4005 = vmatmul.msk.bf16.gmra.mxu1 %vm3125_vm15, %v3084_v25 }
 0x201   : > { %v3365_v33 = vadd.f32 1.0, %v4143_v34  ;;  %4144 = vpow2.f32 %v3335_v30 }
 0x202   : > { %4146 = vpow2.f32 %v3321_v28  ;;  %v3238_v49 = vpop.f32.mrf.mxu3 }
 0x203   : > { %4148 = vrcp.f32 %v3365_v33  ;;  %v3239_v45 = vadd.f32 %v6026_v23, %v3238_v49 }
 0x204   : > { %v2796_v20 = vpop.permute.xlu0 %2795 }
 0x205   : > { %v3278_v13 = vsub.f32 0.0, %v3239_v45  ;;  %v3076_v7 = vsel %vm3068_vm14, %v3043_v51, %v2796_v20 }
 0x206   : > { %4001 = vmatmul.msk.bf16.gmra.mxu0 %vm3125_vm15, %v3076_v7 }
 0x207   : > { %v4145_v47 = vpop.eup %4144  ;;  %v3337_v22 = vmul.f32 1.442695, %v3278_v13 }
 0x208   : > { %v4147_v5 = vpop.eup %4146  ;;  %v3373_v62 = vadd.f32 1.0, %v4145_v47 }
 0x209   : > { %v4149_v60 = vpop.eup %4148  ;;  %v3366_v63 = vadd.f32 1.0, %v4147_v5  ;;  %4150 = vpow2.f32 %v3337_v22 }
 0x20a   : > { %v3429_v46 = vmul.f32 %v4149_v60, %v3217_v21  ;;  %4152 = vrcp.f32 %v3373_v62 }
 0x20b   : > { %4154 = vrcp.f32 %v3366_v63 }
 0x20c   : > { %3461 = vst.msk [vmem:[%s6054_s16 + $0x90] sm:$0xff] %vm3068_vm14, %v3429_v46  ;;  %v3176_v8 = vpop.f32.mrf.mxu0 }
 0x20d   : > { %v3177_v26 = vadd.f32 %v6026_v23, %v3176_v8 }
 0x20f   : > { %v4151_v17 = vpop.eup %4150  ;;  %v3253_v43 = vsub.f32 0.0, %v3177_v26 }
 0x210   : > { %v4153_v12 = vpop.eup %4152  ;;  %v3374_v18 = vadd.f32 1.0, %v4151_v17 }
 0x211   : > { %v4155_v39 = vpop.eup %4154  ;;  %v3437_v14 = vmul.f32 %v4153_v12, %v3237_v9  ;;  %v3287_v55 = vmul.f32 1.442695, %v3253_v43 }
 0x212   : > { %v3430_v19 = vmul.f32 %v4155_v39, %v3219_v58  ;;  %4156 = vrcp.f32 %v3374_v18 }
 0x213   : > { %3469 = vst.msk [vmem:[%s6054_s16 + $0xd0] sm:$0xff] %vm3068_vm14, %v3437_v14  ;;  %4158 = vpow2.f32 %v3287_v55  ;;  %v3196_v1 = vpop.f32.mrf.mxu1 }
 0x214   : > { %3462 = vst.msk [vmem:[%s6054_s16 + $0x98] sm:$0xff] %vm3068_vm14, %v3430_v19  ;;  %v3197_v2 = vadd.f32 %v6026_v23, %v3196_v1  ;;  %v3178_v37 = vpop.f32.mrf.mxu0 }
 0x215   : > { %v3179_v41 = vadd.f32 %v6026_v23, %v3178_v37 }
 0x216   : > { %v3261_v50 = vsub.f32 0.0, %v3197_v2 }
 0x217   : > { %v3254_v52 = vsub.f32 0.0, %v3179_v41 }
 0x218   : > { %v4157_v57 = vpop.eup %4156  ;;  %v3303_v35 = vmul.f32 1.442695, %v3261_v50 }
 0x219   : > { %v4159_v38 = vpop.eup %4158  ;;  %v3438_v56 = vmul.f32 %v4157_v57, %v3239_v45  ;;  %v3289_v32 = vmul.f32 1.442695, %v3254_v52 }
 0x21a   : > { %v3349_v10 = vadd.f32 1.0, %v4159_v38  ;;  %4160 = vpow2.f32 %v3303_v35 }
 0x21b   : > { %3470 = vst.msk [vmem:[%s6054_s16 + $0xd8] sm:$0xff] %vm3068_vm14, %v3438_v56  ;;  %4162 = vpow2.f32 %v3289_v32  ;;  %v3198_v27 = vpop.f32.mrf.mxu1 }
 0x21c   : > { %4164 = vrcp.f32 %v3349_v10  ;;  %v3199_v21 = vadd.f32 %v6026_v23, %v3198_v27 }
 0x21e   : > { %v3262_v15 = vsub.f32 0.0, %v3199_v21 }
 0x220   : > { %v4161_v0 = vpop.eup %4160  ;;  %v3305_v11 = vmul.f32 1.442695, %v3262_v15 }
 0x221   : > { %v4163_v59 = vpop.eup %4162  ;;  %v3357_v44 = vadd.f32 1.0, %v4161_v0 }
 0x222   : > { %v4165_v40 = vpop.eup %4164  ;;  %v3350_v3 = vadd.f32 1.0, %v4163_v59  ;;  %4166 = vpow2.f32 %v3305_v11 }
 0x223   : > { %v3413_v9 = vmul.f32 %v4165_v40, %v3177_v26  ;;  %4168 = vrcp.f32 %v3357_v44 }
 0x224   : > { %4170 = vrcp.f32 %v3350_v3 }
 0x225   : > { %3445 = vst.msk [vmem:[%s6054_s16 + $0x10] sm:$0xff] %vm3068_vm14, %v3413_v9 }
 0x228   : > { %v4167_v53 = vpop.eup %4166 }
 0x229   : > { %v4169_v24 = vpop.eup %4168  ;;  %v3358_v29 = vadd.f32 1.0, %v4167_v53 }
 0x22a   : > { %v4171_v4 = vpop.eup %4170  ;;  %v3421_v58 = vmul.f32 %v4169_v24, %v3197_v2 }
 0x22b   : > { %v3414_v6 = vmul.f32 %v4171_v4, %v3179_v41  ;;  %4172 = vrcp.f32 %v3358_v29  ;;  %v3221_v31 = vpop.f32.mrf.mxu2 }
 0x22c   : > { %3453 = vst.msk [vmem:[%s6054_s16 + $0x50] sm:$0xff] %vm3068_vm14, %v3421_v58  ;;  %v3222_v54 = vadd.f32 %v6026_v23, %v3221_v31 }
 0x22d   : > { %3446 = vst.msk [vmem:[%s6054_s16 + $0x18] sm:$0xff] %vm3068_vm14, %v3414_v6 }
 0x22e   : > { %v3271_v36 = vsub.f32 0.0, %v3222_v54 }
 0x230   : > { %v3323_v42 = vmul.f32 1.442695, %v3271_v36 }
 0x231   : > { %v4173_v16 = vpop.eup %4172 }
 0x232   : > { %v3422_v30 = vmul.f32 %v4173_v16, %v3199_v21  ;;  %4174 = vpow2.f32 %v3323_v42  ;;  %v3241_v25 = vpop.f32.mrf.mxu3 }
 0x233   : > { %v3242_v34 = vadd.f32 %v6026_v23, %v3241_v25  ;;  %v3223_v61 = vpop.f32.mrf.mxu2 }
 0x234   : > { %3454 = vst.msk [vmem:[%s6054_s16 + $0x58] sm:$0xff] %vm3068_vm14, %v3422_v30  ;;  %v3224_v28 = vadd.f32 %v6026_v23, %v3223_v61 }
 0x235   : > { %v3279_v33 = vsub.f32 0.0, %v3242_v34 }
 0x236   : > { %v3272_v49 = vsub.f32 0.0, %v3224_v28 }
 0x237   : > { %v3339_v48 = vmul.f32 1.442695, %v3279_v33 }
 0x238   : > { %v4175_v45 = vpop.eup %4174  ;;  %v3325_v51 = vmul.f32 1.442695, %v3272_v49 }
 0x239   : > { %v3367_v20 = vadd.f32 1.0, %v4175_v45  ;;  %4176 = vpow2.f32 %v3339_v48 }
 0x23a   : > { %4178 = vpow2.f32 %v3325_v51  ;;  %v3243_v13 = vpop.f32.mrf.mxu3 }
 0x23b   : > { %4180 = vrcp.f32 %v3367_v20  ;;  %v3244_v7 = vadd.f32 %v6026_v23, %v3243_v13 }
 0x23d   : > { %v3280_v47 = vsub.f32 0.0, %v3244_v7 }
 0x23f   : > { %v4177_v22 = vpop.eup %4176  ;;  %v3341_v5 = vmul.f32 1.442695, %v3280_v47 }
 0x240   : > { %v4179_v62 = vpop.eup %4178  ;;  %v3375_v60 = vadd.f32 1.0, %v4177_v22 }
 0x241   : > { %v4181_v63 = vpop.eup %4180  ;;  %v3368_v46 = vadd.f32 1.0, %v4179_v62  ;;  %4182 = vpow2.f32 %v3341_v5 }
 0x242   : > { %v3431_v8 = vmul.f32 %v4181_v63, %v3222_v54  ;;  %4184 = vrcp.f32 %v3375_v60 }
 0x243   : > { %4186 = vrcp.f32 %v3368_v46 }
 0x244   : > { %3463 = vst.msk [vmem:[%s6054_s16 + $0xa0] sm:$0xff] %vm3068_vm14, %v3431_v8  ;;  %v3181_v26 = vpop.f32.mrf.mxu0 }
 0x245   : > { %v3182_v17 = vadd.f32 %v6026_v23, %v3181_v26 }
 0x247   : > { %v4183_v43 = vpop.eup %4182  ;;  %v3255_v12 = vsub.f32 0.0, %v3182_v17 }
 0x248   : > { %v4185_v18 = vpop.eup %4184  ;;  %v3376_v39 = vadd.f32 1.0, %v4183_v43 }
 0x249   : > { %v4187_v14 = vpop.eup %4186  ;;  %v3439_v55 = vmul.f32 %v4185_v18, %v3242_v34  ;;  %v3291_v19 = vmul.f32 1.442695, %v3255_v12 }
 0x24a   : > { %v3432_v1 = vmul.f32 %v4187_v14, %v3224_v28  ;;  %4188 = vrcp.f32 %v3376_v39 }
 0x24b   : > { %3471 = vst.msk [vmem:[%s6054_s16 + $0xe0] sm:$0xff] %vm3068_vm14, %v3439_v55  ;;  %4190 = vpow2.f32 %v3291_v19  ;;  %v3201_v2 = vpop.f32.mrf.mxu1 }
 0x24c   : > { %3464 = vst.msk [vmem:[%s6054_s16 + $0xa8] sm:$0xff] %vm3068_vm14, %v3432_v1  ;;  %v3202_v37 = vadd.f32 %v6026_v23, %v3201_v2  ;;  %v3183_v41 = vpop.f32.mrf.mxu0 }
 0x24d   : > { %v3184_v50 = vadd.f32 %v6026_v23, %v3183_v41 }
 0x24e   : > { %v3263_v52 = vsub.f32 0.0, %v3202_v37 }
 0x24f   : > { %v3256_v57 = vsub.f32 0.0, %v3184_v50 }
 0x250   : > { %v4189_v35 = vpop.eup %4188  ;;  %v3307_v38 = vmul.f32 1.442695, %v3263_v52 }
 0x251   : > { %v4191_v56 = vpop.eup %4190  ;;  %v3440_v32 = vmul.f32 %v4189_v35, %v3244_v7  ;;  %v3293_v10 = vmul.f32 1.442695, %v3256_v57 }
 0x252   : > { %v3351_v27 = vadd.f32 1.0, %v4191_v56  ;;  %4192 = vpow2.f32 %v3307_v38 }
 0x253   : > { %3472 = vst.msk [vmem:[%s6054_s16 + $0xe8] sm:$0xff] %vm3068_vm14, %v3440_v32  ;;  %4194 = vpow2.f32 %v3293_v10  ;;  %v3203_v21 = vpop.f32.mrf.mxu1 }
 0x254   : > { %4196 = vrcp.f32 %v3351_v27  ;;  %v3204_v15 = vadd.f32 %v6026_v23, %v3203_v21 }
 0x256   : > { %v3264_v0 = vsub.f32 0.0, %v3204_v15 }
 0x258   : > { %v4193_v11 = vpop.eup %4192  ;;  %v3309_v59 = vmul.f32 1.442695, %v3264_v0 }
 0x259   : > { %v4195_v44 = vpop.eup %4194  ;;  %v3359_v40 = vadd.f32 1.0, %v4193_v11 }
 0x25a   : > { %v4197_v3 = vpop.eup %4196  ;;  %v3352_v9 = vadd.f32 1.0, %v4195_v44  ;;  %4198 = vpow2.f32 %v3309_v59 }
 0x25b   : > { %v3415_v53 = vmul.f32 %v4197_v3, %v3182_v17  ;;  %4200 = vrcp.f32 %v3359_v40 }
 0x25c   : > { %4202 = vrcp.f32 %v3352_v9 }
 0x25d   : > { %3447 = vst.msk [vmem:[%s6054_s16 + $0x20] sm:$0xff] %vm3068_vm14, %v3415_v53 }
 0x260   : > { %v4199_v24 = vpop.eup %4198 }
 0x261   : > { %v4201_v29 = vpop.eup %4200  ;;  %v3360_v4 = vadd.f32 1.0, %v4199_v24 }
 0x262   : > { %v4203_v58 = vpop.eup %4202  ;;  %v3423_v6 = vmul.f32 %v4201_v29, %v3202_v37 }
 0x263   : > { %v3416_v31 = vmul.f32 %v4203_v58, %v3184_v50  ;;  %4204 = vrcp.f32 %v3360_v4 }
 0x264   : > { %3455 = vst.msk [vmem:[%s6054_s16 + $0x60] sm:$0xff] %vm3068_vm14, %v3423_v6 }
 0x265   : > { %3448 = vst.msk [vmem:[%s6054_s16 + $0x28] sm:$0xff] %vm3068_vm14, %v3416_v31 }
 0x269   : > { %v4205_v54 = vpop.eup %4204 }
 0x26a   : > { %v3424_v36 = vmul.f32 %v4205_v54, %v3204_v15  ;;  %v3226_v42 = vpop.f32.mrf.mxu2 }
 0x26b   : > { %v3227_v16 = vadd.f32 %v6026_v23, %v3226_v42 }
 0x26c   : > { %3456 = vst.msk [vmem:[%s6054_s16 + $0x68] sm:$0xff] %vm3068_vm14, %v3424_v36 }
 0x26d   : > { %v3273_v30 = vsub.f32 0.0, %v3227_v16 }
 0x26f   : > { %v3327_v25 = vmul.f32 1.442695, %v3273_v30 }
 0x271   : > { %4206 = vpow2.f32 %v3327_v25  ;;  %v3246_v34 = vpop.f32.mrf.mxu3 }
 0x272   : > { %v3247_v61 = vadd.f32 %v6026_v23, %v3246_v34  ;;  %v3228_v28 = vpop.f32.mrf.mxu2 }
 0x273   : > { %v3229_v33 = vadd.f32 %v6026_v23, %v3228_v28 }
 0x274   : > { %v3281_v49 = vsub.f32 0.0, %v3247_v61 }
 0x275   : > { %v3274_v48 = vsub.f32 0.0, %v3229_v33 }
 0x276   : > { %v3343_v45 = vmul.f32 1.442695, %v3281_v49 }
 0x277   : > { %v4207_v51 = vpop.eup %4206  ;;  %v3329_v20 = vmul.f32 1.442695, %v3274_v48 }
 0x278   : > { %v3369_v13 = vadd.f32 1.0, %v4207_v51  ;;  %4208 = vpow2.f32 %v3343_v45 }
 0x279   : > { %4210 = vpow2.f32 %v3329_v20  ;;  %v3248_v7 = vpop.f32.mrf.mxu3 }
 0x27a   : > { %4212 = vrcp.f32 %v3369_v13  ;;  %v3249_v47 = vadd.f32 %v6026_v23, %v3248_v7 }
 0x27c   : > { %v3282_v22 = vsub.f32 0.0, %v3249_v47 }
 0x27d   : > { %v3206_v5 = vpop.f32.mrf.mxu1 }
 0x27e   : > { %v4209_v62 = vpop.eup %4208  ;;  %v3345_v60 = vmul.f32 1.442695, %v3282_v22  ;;  %v3207_v63 = vadd.f32 %v6026_v23, %v3206_v5 }
 0x27f   : > { %v4211_v46 = vpop.eup %4210  ;;  %v3377_v8 = vadd.f32 1.0, %v4209_v62 }
 0x280   : > { %v4213_v26 = vpop.eup %4212  ;;  %v3370_v17 = vadd.f32 1.0, %v4211_v46  ;;  %4214 = vpow2.f32 %v3345_v60  ;;  %v3265_v43 = vsub.f32 0.0, %v3207_v63 }
 0x281   : > { %v3433_v12 = vmul.f32 %v4213_v26, %v3227_v16  ;;  %4216 = vrcp.f32 %v3377_v8 }
 0x282   : > { %4218 = vrcp.f32 %v3370_v17  ;;  %v3311_v18 = vmul.f32 1.442695, %v3265_v43 }
 0x283   : > { %3465 = vst.msk [vmem:[%s6054_s16 + $0xb0] sm:$0xff] %vm3068_vm14, %v3433_v12  ;;  %v3186_v39 = vpop.f32.mrf.mxu0 }
 0x284   : > { %v3187_v14 = vadd.f32 %v6026_v23, %v3186_v39  ;;  %4220 = vpow2.f32 %v3311_v18 }
 0x285   : > { %v3208_v55 = vpop.f32.mrf.mxu1 }
 0x286   : > { %v4215_v19 = vpop.eup %4214  ;;  %v3257_v1 = vsub.f32 0.0, %v3187_v14  ;;  %v3209_v2 = vadd.f32 %v6026_v23, %v3208_v55 }
 0x287   : > { %v4217_v37 = vpop.eup %4216  ;;  %v3378_v41 = vadd.f32 1.0, %v4215_v19 }
 0x288   : > { %v4219_v50 = vpop.eup %4218  ;;  %v3441_v52 = vmul.f32 %v4217_v37, %v3247_v61  ;;  %v3295_v57 = vmul.f32 1.442695, %v3257_v1  ;;  %v3266_v35 = vsub.f32 0.0, %v3209_v2 }
 0x289   : > { %v3434_v38 = vmul.f32 %v4219_v50, %v3229_v33  ;;  %4222 = vrcp.f32 %v3378_v41 }
 0x28a   : > { %v4221_v56 = vpop.eup %4220  ;;  %3473 = vst.msk [vmem:[%s6054_s16 + $0xf0] sm:$0xff] %vm3068_vm14, %v3441_v52  ;;  %4224 = vpow2.f32 %v3295_v57  ;;  %v3313_v32 = vmul.f32 1.442695, %v3266_v35 }
 0x28b   : > { %3466 = vst.msk [vmem:[%s6054_s16 + $0xb8] sm:$0xff] %vm3068_vm14, %v3434_v38  ;;  %v3361_v10 = vadd.f32 1.0, %v4221_v56  ;;  %v3188_v27 = vpop.f32.mrf.mxu0 }
 0x28c   : > { %v3189_v21 = vadd.f32 %v6026_v23, %v3188_v27  ;;  %4226 = vpow2.f32 %v3313_v32 }
 0x28d   : > { %4228 = vrcp.f32 %v3361_v10 }
 0x28e   : > { %v3258_v15 = vsub.f32 0.0, %v3189_v21 }
 0x28f   : > { %v4223_v0 = vpop.eup %4222 }
 0x290   : > { %v4225_v11 = vpop.eup %4224  ;;  %v3442_v59 = vmul.f32 %v4223_v0, %v3249_v47  ;;  %v3297_v44 = vmul.f32 1.442695, %v3258_v15 }
 0x291   : > { %v3353_v40 = vadd.f32 1.0, %v4225_v11 }
 0x292   : > { %v4227_v3 = vpop.eup %4226  ;;  %3474 = vst.msk [vmem:[%s6054_s16 + $0xf8] sm:$0xff] %vm3068_vm14, %v3442_v59  ;;  %4230 = vpow2.f32 %v3297_v44 }
 0x293   : > { %v4229_v9 = vpop.eup %4228  ;;  %4232 = vrcp.f32 %v3353_v40  ;;  %v3362_v53 = vadd.f32 1.0, %v4227_v3 }
 0x294   : > { %v3425_v23 = vmul.f32 %v4229_v9, %v3207_v63 }
 0x295   : > { %4234 = vrcp.f32 %v3362_v53 }
 0x296   : > { %3457 = vst.msk [vmem:[%s6054_s16 + $0x70] sm:$0xff] %vm3068_vm14, %v3425_v23 }
 0x298   : > { %v4231_v24 = vpop.eup %4230 }
 0x299   : > { %v4233_v29 = vpop.eup %4232  ;;  %v3354_v4 = vadd.f32 1.0, %v4231_v24 }
 0x29a   : > { %v3417_v58 = vmul.f32 %v4233_v29, %v3187_v14 }
 0x29b   : > { %v4235_v6 = vpop.eup %4234  ;;  %4236 = vrcp.f32 %v3354_v4 }
 0x29c   : > { %3449 = vst.msk [vmem:[%s6054_s16 + $0x30] sm:$0xff] %vm3068_vm14, %v3417_v58  ;;  %v3426_v31 = vmul.f32 %v4235_v6, %v3209_v2 }
 0x29e   : > { %3458 = vst.msk [vmem:[%s6054_s16 + $0x78] sm:$0xff] %vm3068_vm14, %v3426_v31 }
 0x2a1   : > { %v4237_v54 = vpop.eup %4236 }
 0x2a2   : > { %v3418_v36 = vmul.f32 %v4237_v54, %v3189_v21 }
 0x2a4   : > { %3450 = vst.msk [vmem:[%s6054_s16 + $0x38] sm:$0xff] %vm3068_vm14, %v3418_v36 }
 0x2a5 PF: > { %s13_s14 = sadd.s32 1, %s4260_s14   ;;  %s6197_s12 = smov %s4256_s13 }
 0x2a6   : > { %p10_p5 = scmp.ge.s32.totalorder %s13_s14, 4   ;;  %s6198_s13 = smov %s6200_s15 }
 0x2a8   :  { %12 = sbr.rel (!%p10_p5) target bundleno = 2 (0x2), region = 71 }

</bundles_post_ra>
